<compile_context>
chip_gen: v5e
topology: v5e:2x2
jax: 0.10.0
libtpu: 0.0.40
codegen_flags: <defaults>
</compile_context>

<pallas_src>
import math

import jax
import jax.numpy as jnp
from jax import lax
from jax.experimental import pallas as pl
from jax.experimental.pallas import tpu as pltpu

# ----------------------------- model dims ---------------------------------
PAD_ID = 0
D_MODEL = 32
N_HEAD = 4
HEAD_DIM = D_MODEL // N_HEAD
D_FF = 64
VOCAB = 40
VOCAB_PAD = 128          # lane-dense output head; sliced back to VOCAB outside
F_INT = 16
F_PAD = 32               # interaction features zero-padded to 32 lanes
H_INT = 32
MAX_LEN = 64
ATTN_SCALE = 1.0 / math.sqrt(HEAD_DIM)
NEG_INF = -1e9

# ------------------------- packed-weight layout -----------------------------
# mats32 : (14, D, D)
M_TEXT_SA = 0            # wq, wk, wv, wo
M_DEC_SA = 4
M_DEC_CA = 8
M_INT_W1 = 12            # (F_INT, H_INT) zero-padded to (D, D)
M_INT_W2 = 13
# vec_slab : (29, 128)  (rows 0..25 use 32 lanes, 26..27 use 64, 28 uses 128)
V_TEXT_SA = 0            # bq, bk, bv, bo
V_DEC_SA = 4
V_DEC_CA = 8
V_TEXT_FFN_B2 = 12
V_DEC_FFN_B2 = 13
V_TEXT_LN1 = 14          # g, b
V_TEXT_LN2 = 16
V_DEC_LN1 = 18
V_DEC_LN2 = 20
V_DEC_LN3 = 22
V_INT_B1 = 24
V_INT_B2 = 25
ROW_FFN_B1 = 26          # text ffn b1, dec ffn b1 (64 lanes each)
ROW_OUT_B = 28           # vocab-head bias (128 lanes)

_WEIGHT_ORDER = ("mats32", "ffn_w1", "ffn_w2", "vec_slab", "out_w")


# ------------------------- in-kernel building blocks ------------------------
def _add_ln(x, y, g, b):
    """Residual add + LayerNorm over last dim. x, y: (N, D); g/b: (1, D)."""
    h = x + y
    mu = jnp.mean(h, axis=-1, keepdims=True)
    var = jnp.mean(jnp.square(h - mu), axis=-1, keepdims=True)
    return (h - mu) * lax.rsqrt(var + 1e-5) * g + b


def _ffn(x, w1, b1, w2, b2):
    """2-layer ReLU MLP on flat rows. x: (N, D)."""
    f = jnp.maximum(
        jnp.dot(x, w1, preferred_element_type=jnp.float32) + b1, 0.0)
    return jnp.dot(f, w2, preferred_element_type=jnp.float32) + b2


def _self_attn(x, key_bias, wq, wk, wv, wo, bq, bk, bv, bo):
    """Multi-head self-attention over a batch block.

    x: (BT, L, D); key_bias broadcastable to (BT, L, L).
    Fused (D, D) projections; per-head loop only for the small score / PV
    products.  Returns flat (BT*L, D).
    """
    BT, L, D = x.shape
    xf = x.reshape(BT * L, D)
    q = (jnp.dot(xf, wq, preferred_element_type=jnp.float32) + bq).reshape(BT, L, D)
    k = (jnp.dot(xf, wk, preferred_element_type=jnp.float32) + bk).reshape(BT, L, D)
    v = (jnp.dot(xf, wv, preferred_element_type=jnp.float32) + bv).reshape(BT, L, D)
    heads = []
    for h in range(N_HEAD):
        sl = slice(h * HEAD_DIM, (h + 1) * HEAD_DIM)
        s = jnp.einsum("bqd,bkd->bqk", q[..., sl], k[..., sl],
                       preferred_element_type=jnp.float32) * ATTN_SCALE + key_bias
        m = jnp.max(s, axis=-1, keepdims=True)
        e = jnp.exp(s - m)
        inv = pl.reciprocal(jnp.sum(e, axis=-1, keepdims=True), approx=True)
        heads.append(jnp.einsum("bqk,bkd->bqd", e, v[..., sl],
                                preferred_element_type=jnp.float32) * inv)
    o = jnp.concatenate(heads, axis=-1).reshape(BT * L, D)
    return jnp.dot(o, wo, preferred_element_type=jnp.float32) + bo


def _cross_attn(x_q, mem_a, bias_a, mem_b, wq, wk, wv, wo, bq, bk, bv, bo):
    """Cross-attention over [mem_a ; mem_b] with a shared max / denominator
    (exactly equivalent to concatenating the memories, no in-kernel concat of
    the memory rows).

    x_q: (BT, T, D); mem_a: (BT, S, D) with key bias bias_a (BT, 1, S);
    mem_b: (BT, D) (interaction memory, never padded).  Returns (BT*T, D).
    """
    BT, T, D = x_q.shape
    S = mem_a.shape[1]
    q = (jnp.dot(x_q.reshape(BT * T, D), wq,
                 preferred_element_type=jnp.float32) + bq).reshape(BT, T, D)
    ka = (jnp.dot(mem_a.reshape(BT * S, D), wk,
                  preferred_element_type=jnp.float32) + bk).reshape(BT, S, D)
    va = (jnp.dot(mem_a.reshape(BT * S, D), wv,
                  preferred_element_type=jnp.float32) + bv).reshape(BT, S, D)
    kb = jnp.dot(mem_b, wk, preferred_element_type=jnp.float32) + bk   # (BT, D)
    vb = jnp.dot(mem_b, wv, preferred_element_type=jnp.float32) + bv   # (BT, D)
    heads = []
    for h in range(N_HEAD):
        sl = slice(h * HEAD_DIM, (h + 1) * HEAD_DIM)
        qh = q[..., sl]                                                # (BT, T, Dh)
        sa = jnp.einsum("bqd,bkd->bqk", qh, ka[..., sl],
                        preferred_element_type=jnp.float32) * ATTN_SCALE + bias_a
        sb = jnp.sum(qh * kb[:, None, sl], axis=-1, keepdims=True) * ATTN_SCALE
        m = jnp.maximum(jnp.max(sa, axis=-1, keepdims=True), sb)
        ea = jnp.exp(sa - m)
        eb = jnp.exp(sb - m)
        inv = pl.reciprocal(jnp.sum(ea, axis=-1, keepdims=True) + eb, approx=True)
        oh = (jnp.einsum("bqk,bkd->bqd", ea, va[..., sl],
                         preferred_element_type=jnp.float32)
              + eb * vb[:, None, sl]) * inv
        heads.append(oh)
    o = jnp.concatenate(heads, axis=-1).reshape(BT * T, D)
    return jnp.dot(o, wo, preferred_element_type=jnp.float32) + bo


# ----------------------------- the fused kernel -----------------------------
def _cfom_kernel(src_x_ref, src_bias_ref, tgt_x_ref, tgt_bias_ref, feat_ref,
                 mats_ref, fw1_ref, fw2_ref, vslab_ref, ow_ref, out_ref):
    BT, S, D = src_x_ref.shape
    T = tgt_x_ref.shape[1]

    VS = vslab_ref[...]                       # (29, 128)

    def vec(i):                               # (1, D) bias / LN row
        return VS[i:i + 1, :D_MODEL]

    def vec64(i):                             # (1, D_FF) FFN hidden bias
        return VS[ROW_FFN_B1 + i:ROW_FFN_B1 + i + 1, :D_FF]

    def attn_w(base):
        return (mats_ref[base], mats_ref[base + 1],
                mats_ref[base + 2], mats_ref[base + 3])

    def attn_b(base):
        return (vec(base), vec(base + 1), vec(base + 2), vec(base + 3))

    # ---------------- text encoder (1 post-norm layer) ----------------
    x = src_x_ref[...]                        # (BT, S, D)
    src_bias = src_bias_ref[...]              # (BT, 1, S), -1e9 on padded keys
    attn = _self_attn(x, src_bias, *attn_w(M_TEXT_SA), *attn_b(V_TEXT_SA))
    xf = x.reshape(BT * S, D)
    h = _add_ln(xf, attn, vec(V_TEXT_LN1), vec(V_TEXT_LN1 + 1))
    ff = _ffn(h, fw1_ref[0], vec64(0), fw2_ref[0], vec(V_TEXT_FFN_B2))
    smem = _add_ln(h, ff, vec(V_TEXT_LN2), vec(V_TEXT_LN2 + 1)).reshape(BT, S, D)

    # ---------------- interaction encoder (2-layer MLP) ----------------
    feat = feat_ref[...]                      # (BT, F_PAD), zero-padded lanes
    ih = jnp.maximum(
        jnp.dot(feat, mats_ref[M_INT_W1], preferred_element_type=jnp.float32)
        + vec(V_INT_B1), 0.0)
    imem = (jnp.dot(ih, mats_ref[M_INT_W2], preferred_element_type=jnp.float32)
            + vec(V_INT_B2))                  # (BT, D)

    # ---------------- decoder (1 layer + vocab head) ----------------
    y = tgt_x_ref[...]                        # (BT, T, D)
    r = lax.broadcasted_iota(jnp.int32, (T, T), 0)
    c = lax.broadcasted_iota(jnp.int32, (T, T), 1)
    causal = jnp.where(c > r, NEG_INF, 0.0).astype(jnp.float32)        # (T, T)
    self_bias = causal[None, :, :] + tgt_bias_ref[...]                 # (BT, T, T)

    sa = _self_attn(y, self_bias, *attn_w(M_DEC_SA), *attn_b(V_DEC_SA))
    yf = y.reshape(BT * T, D)
    h1 = _add_ln(yf, sa, vec(V_DEC_LN1), vec(V_DEC_LN1 + 1))
    ca = _cross_attn(h1.reshape(BT, T, D), smem, src_bias, imem,
                     *attn_w(M_DEC_CA), *attn_b(V_DEC_CA))
    h2 = _add_ln(h1, ca, vec(V_DEC_LN2), vec(V_DEC_LN2 + 1))
    ff2 = _ffn(h2, fw1_ref[1], vec64(1), fw2_ref[1], vec(V_DEC_FFN_B2))
    h3 = _add_ln(h2, ff2, vec(V_DEC_LN3), vec(V_DEC_LN3 + 1))

    # lane-dense (128-wide) vocab head
    logits = (jnp.dot(h3, ow_ref[...], preferred_element_type=jnp.float32)
              + VS[ROW_OUT_B:ROW_OUT_B + 1, :])
    out_ref[...] = logits.reshape(BT, T, VOCAB_PAD)


# -------------------------- weight packing (run once, outside jit) ----------
def pack_params(params):
    assert H_INT == D_MODEL  # vec() slices assume 32-wide interaction hidden
    text, dec, inter = params["text"], params["dec"], params["inter"]

    def mats(p):
        return [p["wq"], p["wk"], p["wv"], p["wo"]]

    def bvecs(p):
        return [p["bq"], p["bk"], p["bv"], p["bo"]]

    inter_w1_pad = jnp.zeros((D_MODEL, H_INT), jnp.float32).at[:F_INT, :].set(inter["w1"])
    mats32 = jnp.stack(mats(text["sa"]) + mats(dec["sa"]) + mats(dec["ca"])
                       + [inter_w1_pad, inter["w2"]], axis=0)          # (14, D, D)
    ffn_w1 = jnp.stack([text["ffn"]["w1"], dec["ffn"]["w1"]], axis=0)  # (2, D, D_FF)
    ffn_w2 = jnp.stack([text["ffn"]["w2"], dec["ffn"]["w2"]], axis=0)  # (2, D_FF, D)

    vecs32 = jnp.stack(
        bvecs(text["sa"]) + bvecs(dec["sa"]) + bvecs(dec["ca"])
        + [text["ffn"]["b2"], dec["ffn"]["b2"],
           text["ln1_g"], text["ln1_b"], text["ln2_g"], text["ln2_b"],
           dec["ln1_g"], dec["ln1_b"], dec["ln2_g"], dec["ln2_b"],
           dec["ln3_g"], dec["ln3_b"],
           inter["b1"], inter["b2"]], axis=0)                          # (26, 32)
    vecs64 = jnp.stack([text["ffn"]["b1"], dec["ffn"]["b1"]], axis=0)  # (2, 64)

    vec_slab = jnp.zeros((29, VOCAB_PAD), jnp.float32)
    vec_slab = vec_slab.at[:26, :D_MODEL].set(vecs32)
    vec_slab = vec_slab.at[26:28, :D_FF].set(vecs64)
    vec_slab = vec_slab.at[ROW_OUT_B, :VOCAB].set(dec["out_b"])

    out_w = jnp.zeros((D_MODEL, VOCAB_PAD), jnp.float32).at[:, :VOCAB].set(dec["out_w"])

    return dict(text_tok=text["tok"], text_pos=text["pos"],
                dec_tok=dec["tok"], dec_pos=dec["pos"],
                mats32=mats32, ffn_w1=ffn_w1, ffn_w2=ffn_w2,
                vec_slab=vec_slab, out_w=out_w)


# ----------------------------- model glue ----------------------------------
def embed(tokens, tok_table, pos_table):
    L = tokens.shape[1]
    return (jnp.take(tok_table, tokens, axis=0) * math.sqrt(D_MODEL)
            + pos_table[:L][None, :, :]).astype(jnp.float32)


# ------------------------ CfomDock forward ---------------------------------
def cfom_dock_forward(packed, smiles_tokens_src, smiles_tokens_tgt,
                      graph_data, interaction_data,
                      molecule_sidechain_mask_idx=1):
    # TODO(synk): graph_encoder is None here (no concrete GNN sub-module was
    # provided); the reference module explicitly supports this branch.
    del graph_data, molecule_sidechain_mask_idx

    B, S0 = smiles_tokens_src.shape
    T0 = smiles_tokens_tgt.shape[1]
    feat = interaction_data[0].astype(jnp.float32)

    # Batch block size + static padding so every in-kernel reshape is tile
    # aligned.  Padded rows / columns are fully masked (or sliced off).
    BT = B if B <= 8 else 8
    B_pad = -(-B // BT) * BT
    S = -(-S0 // 8) * 8
    T = -(-T0 // 8) * 8

    src = jnp.pad(smiles_tokens_src, ((0, B_pad - B), (0, S - S0)),
                  constant_values=PAD_ID)
    tgt = jnp.pad(smiles_tokens_tgt, ((0, B_pad - B), (0, T - T0)),
                  constant_values=PAD_ID)
    feat = jnp.pad(feat, ((0, B_pad - B), (0, F_PAD - feat.shape[1])))

    # NOTE: the reference module drops memory columns that are padded in every
    # batch row.  Padded columns are kept here (static shapes, no host sync)
    # and neutralised by the -1e9 key bias inside the kernel — numerically
    # identical (exp underflows to 0).
    src_x = embed(src, packed["text_tok"], packed["text_pos"])          # (B_pad, S, D)
    tgt_x = embed(tgt, packed["dec_tok"], packed["dec_pos"])            # (B_pad, T, D)
    src_bias = jnp.where(src == PAD_ID, NEG_INF, 0.0).astype(jnp.float32)[:, None, :]
    tgt_bias = jnp.where(tgt == PAD_ID, NEG_INF, 0.0).astype(jnp.float32)[:, None, :]

    weights = [packed[k] for k in _WEIGHT_ORDER]

    act_specs = [
        pl.BlockSpec((BT, S, D_MODEL), lambda b: (b, 0, 0)),
        pl.BlockSpec((BT, 1, S), lambda b: (b, 0, 0)),
        pl.BlockSpec((BT, T, D_MODEL), lambda b: (b, 0, 0)),
        pl.BlockSpec((BT, 1, T), lambda b: (b, 0, 0)),
        pl.BlockSpec((BT, F_PAD), lambda b: (b, 0)),
    ]
    # Weights: whole-array blocks with constant index maps -> fetched once,
    # resident in VMEM across the (parallel) batch grid.
    w_specs = [pl.BlockSpec(w.shape, lambda b, _n=w.ndim: (0,) * _n)
               for w in weights]

    logits = pl.pallas_call(
        _cfom_kernel,
        out_shape=jax.ShapeDtypeStruct((B_pad, T, VOCAB_PAD), jnp.float32),
        grid=(B_pad // BT,),
        in_specs=act_specs + w_specs,
        out_specs=pl.BlockSpec((BT, T, VOCAB_PAD), lambda b: (b, 0, 0)),
        compiler_params=pltpu.CompilerParams(
            dimension_semantics=("parallel",)),
    )(src_x, src_bias, tgt_x, tgt_bias, feat, *weights)

    return logits[:B, :T0, :VOCAB]


# ----------------------------- parameter init ------------------------------
def init_params(key):
    ks = iter(jax.random.split(key, 128))

    def w(shape, scale=0.02):
        return (scale * jax.random.normal(next(ks), shape)).astype(jnp.float32)

    def zeros(shape):
        return jnp.zeros(shape, jnp.float32)

    def ones(shape):
        return jnp.ones(shape, jnp.float32)

    def attn_block():
        return dict(
            wq=w((D_MODEL, D_MODEL)), bq=zeros((D_MODEL,)),
            wk=w((D_MODEL, D_MODEL)), bk=zeros((D_MODEL,)),
            wv=w((D_MODEL, D_MODEL)), bv=zeros((D_MODEL,)),
            wo=w((D_MODEL, D_MODEL)), bo=zeros((D_MODEL,)),
        )

    def ffn():
        return dict(w1=w((D_MODEL, D_FF)), b1=zeros((D_FF,)),
                    w2=w((D_FF, D_MODEL)), b2=zeros((D_MODEL,)))

    text = dict(
        tok=w((VOCAB, D_MODEL)), pos=w((MAX_LEN, D_MODEL)),
        sa=attn_block(), ffn=ffn(),
        ln1_g=ones((D_MODEL,)), ln1_b=zeros((D_MODEL,)),
        ln2_g=ones((D_MODEL,)), ln2_b=zeros((D_MODEL,)),
    )
    dec = dict(
        tok=w((VOCAB, D_MODEL)), pos=w((MAX_LEN, D_MODEL)),
        sa=attn_block(), ca=attn_block(), ffn=ffn(),
        ln1_g=ones((D_MODEL,)), ln1_b=zeros((D_MODEL,)),
        ln2_g=ones((D_MODEL,)), ln2_b=zeros((D_MODEL,)),
        ln3_g=ones((D_MODEL,)), ln3_b=zeros((D_MODEL,)),
        out_w=w((D_MODEL, VOCAB)), out_b=zeros((VOCAB,)),
    )
    inter = dict(w1=w((F_INT, H_INT)), b1=zeros((H_INT,)),
                 w2=w((H_INT, D_MODEL)), b2=zeros((D_MODEL,)))
    return dict(text=text, dec=dec, inter=inter)


# ----------------------------- main -----------------------------------------
if __name__ == "__main__":
    root = jax.random.PRNGKey(0)
    kp, k1, k2, k3 = jax.random.split(root, 4)

    params = init_params(kp)
    packed = pack_params(params)     # weight re-layout hoisted out of the jit

    B, S, T = 2, 8, 8
    # source tokens: pad (=0) in the last two columns of every batch row plus
    # one extra pad in a single row (exercises both mask cases).
    src = jax.random.randint(k1, (B, S), 1, VOCAB).astype(jnp.int32)
    src = src.at[:, -2:].set(PAD_ID)
    src = src.at[0, -3].set(PAD_ID)

    tgt = jax.random.randint(k2, (B, T), 1, VOCAB).astype(jnp.int32)
    tgt = tgt.at[1, -1].set(PAD_ID)

    interaction_feat = jax.random.normal(k3, (B, F_INT), dtype=jnp.float32)

    fwd = jax.jit(cfom_dock_forward)
    out = fwd(packed, src, tgt, None, (interaction_feat,))
    out = jax.block_until_ready(out)
    assert out.shape == (B, T, VOCAB), out.shape
    assert bool(jnp.all(jnp.isfinite(out)))
    print("KERNEL_OK")
</pallas_src>

<mosaic_0001>
module attributes {stable_mosaic.version = 11 : i64} {
  func.func @_cfom_kernel(%arg0: i32, %arg1: memref<2x8x32xf32, #tpu.memory_space<vmem>>, %arg2: memref<2x1x8xf32, #tpu.memory_space<vmem>>, %arg3: memref<2x8x32xf32, #tpu.memory_space<vmem>>, %arg4: memref<2x1x8xf32, #tpu.memory_space<vmem>>, %arg5: memref<2x32xf32, #tpu.memory_space<vmem>>, %arg6: memref<14x32x32xf32, #tpu.memory_space<vmem>>, %arg7: memref<2x32x64xf32, #tpu.memory_space<vmem>>, %arg8: memref<2x64x32xf32, #tpu.memory_space<vmem>>, %arg9: memref<29x128xf32, #tpu.memory_space<vmem>>, %arg10: memref<32x128xf32, #tpu.memory_space<vmem>>, %arg11: memref<2x8x128xf32, #tpu.memory_space<vmem>>) attributes {dimension_semantics = [#tpu.dimension_semantics<parallel>], iteration_bounds = array<i64: 1>, scalar_prefetch = 0 : i64, scratch_operands = 0 : i64, tpu.core_type = #tpu.core_type<tc>, window_params = [{transform_indices = @transform_0, window_bounds = array<i64: 2, 8, 32>}, {transform_indices = @transform_1, window_bounds = array<i64: 2, 1, 8>}, {transform_indices = @transform_2, window_bounds = array<i64: 2, 8, 32>}, {transform_indices = @transform_3, window_bounds = array<i64: 2, 1, 8>}, {transform_indices = @transform_4, window_bounds = array<i64: 2, 32>}, {pipeline_mode = #tpu.pipeline_mode<synchronous>, transform_indices = @transform_5, window_bounds = array<i64: 14, 32, 32>}, {pipeline_mode = #tpu.pipeline_mode<synchronous>, transform_indices = @transform_6, window_bounds = array<i64: 2, 32, 64>}, {pipeline_mode = #tpu.pipeline_mode<synchronous>, transform_indices = @transform_7, window_bounds = array<i64: 2, 64, 32>}, {pipeline_mode = #tpu.pipeline_mode<synchronous>, transform_indices = @transform_8, window_bounds = array<i64: 29, 128>}, {pipeline_mode = #tpu.pipeline_mode<synchronous>, transform_indices = @transform_9, window_bounds = array<i64: 32, 128>}, {transform_indices = @transform_10, window_bounds = array<i64: 2, 8, 128>}]} {
    %c0 = arith.constant 0 : index
    %c0_0 = arith.constant 0 : index
    %0 = vector.load %arg9[%c0, %c0_0] : memref<29x128xf32, #tpu.memory_space<vmem>>, vector<29x128xf32>
    %c0_1 = arith.constant 0 : index
    %c0_2 = arith.constant 0 : index
    %c0_3 = arith.constant 0 : index
    %1 = vector.load %arg1[%c0_1, %c0_2, %c0_3] : memref<2x8x32xf32, #tpu.memory_space<vmem>>, vector<2x8x32xf32>
    %c0_4 = arith.constant 0 : index
    %c0_5 = arith.constant 0 : index
    %c0_6 = arith.constant 0 : index
    %2 = vector.load %arg2[%c0_4, %c0_5, %c0_6] : memref<2x1x8xf32, #tpu.memory_space<vmem>>, vector<2x1x8xf32>
    %c0_7 = arith.constant 0 : index
    %c0_8 = arith.constant 0 : index
    %c0_9 = arith.constant 0 : index
    %3 = vector.load %arg6[%c0_7, %c0_8, %c0_9] : memref<14x32x32xf32, #tpu.memory_space<vmem>>, vector<1x32x32xf32>
    %4 = vector.shape_cast %3 : vector<1x32x32xf32> to vector<32x32xf32>
    %c1 = arith.constant 1 : index
    %c0_10 = arith.constant 0 : index
    %c0_11 = arith.constant 0 : index
    %5 = vector.load %arg6[%c1, %c0_10, %c0_11] : memref<14x32x32xf32, #tpu.memory_space<vmem>>, vector<1x32x32xf32>
    %6 = vector.shape_cast %5 : vector<1x32x32xf32> to vector<32x32xf32>
    %c2 = arith.constant 2 : index
    %c0_12 = arith.constant 0 : index
    %c0_13 = arith.constant 0 : index
    %7 = vector.load %arg6[%c2, %c0_12, %c0_13] : memref<14x32x32xf32, #tpu.memory_space<vmem>>, vector<1x32x32xf32>
    %8 = vector.shape_cast %7 : vector<1x32x32xf32> to vector<32x32xf32>
    %c3 = arith.constant 3 : index
    %c0_14 = arith.constant 0 : index
    %c0_15 = arith.constant 0 : index
    %9 = vector.load %arg6[%c3, %c0_14, %c0_15] : memref<14x32x32xf32, #tpu.memory_space<vmem>>, vector<1x32x32xf32>
    %10 = vector.shape_cast %9 : vector<1x32x32xf32> to vector<32x32xf32>
    %11 = vector.extract_strided_slice %0 {offsets = [0, 0], sizes = [1, 32], strides = [1, 1]} : vector<29x128xf32> to vector<1x32xf32>
    %12 = vector.extract_strided_slice %0 {offsets = [1, 0], sizes = [1, 32], strides = [1, 1]} : vector<29x128xf32> to vector<1x32xf32>
    %13 = vector.extract_strided_slice %0 {offsets = [2, 0], sizes = [1, 32], strides = [1, 1]} : vector<29x128xf32> to vector<1x32xf32>
    %14 = vector.extract_strided_slice %0 {offsets = [3, 0], sizes = [1, 32], strides = [1, 1]} : vector<29x128xf32> to vector<1x32xf32>
    %15 = vector.shape_cast %1 : vector<2x8x32xf32> to vector<16x32xf32>
    %cst = arith.constant dense<0.000000e+00> : vector<16x32xf32>
    %16 = tpu.matmul %15, %4, %cst {dimension_numbers = #tpu.dot_dimension_numbers<[1], [0], [0], [1], [0, 0, 1, 1], [], []>} : vector<16x32xf32>, vector<32x32xf32>, vector<16x32xf32> -> vector<16x32xf32>
    %17 = vector.broadcast %11 : vector<1x32xf32> to vector<16x32xf32>
    %18 = arith.addf %16, %17 : vector<16x32xf32>
    %19 = vector.shape_cast %18 : vector<16x32xf32> to vector<2x8x32xf32>
    %cst_16 = arith.constant dense<0.000000e+00> : vector<16x32xf32>
    %20 = tpu.matmul %15, %6, %cst_16 {dimension_numbers = #tpu.dot_dimension_numbers<[1], [0], [0], [1], [0, 0, 1, 1], [], []>} : vector<16x32xf32>, vector<32x32xf32>, vector<16x32xf32> -> vector<16x32xf32>
    %21 = vector.broadcast %12 : vector<1x32xf32> to vector<16x32xf32>
    %22 = arith.addf %20, %21 : vector<16x32xf32>
    %23 = vector.shape_cast %22 : vector<16x32xf32> to vector<2x8x32xf32>
    %cst_17 = arith.constant dense<0.000000e+00> : vector<16x32xf32>
    %24 = tpu.matmul %15, %8, %cst_17 {dimension_numbers = #tpu.dot_dimension_numbers<[1], [0], [0], [1], [0, 0, 1, 1], [], []>} : vector<16x32xf32>, vector<32x32xf32>, vector<16x32xf32> -> vector<16x32xf32>
    %25 = vector.broadcast %13 : vector<1x32xf32> to vector<16x32xf32>
    %26 = arith.addf %24, %25 : vector<16x32xf32>
    %27 = vector.shape_cast %26 : vector<16x32xf32> to vector<2x8x32xf32>
    %28 = vector.extract_strided_slice %19 {offsets = [0, 0, 0], sizes = [2, 8, 8], strides = [1, 1, 1]} : vector<2x8x32xf32> to vector<2x8x8xf32>
    %29 = vector.extract_strided_slice %23 {offsets = [0, 0, 0], sizes = [2, 8, 8], strides = [1, 1, 1]} : vector<2x8x32xf32> to vector<2x8x8xf32>
    "tpu.trace_start"() <{level = 10 : i32, message = "bqd,bkd->bqk"}> : () -> ()
    %cst_18 = arith.constant dense<0.000000e+00> : vector<2x8x8xf32>
    %30 = tpu.matmul %28, %29, %cst_18 {dimension_numbers = #tpu.dot_dimension_numbers<[2], [2], [1], [1], [0, 0, 0, 1, 1, 1], [0], [0]>} : vector<2x8x8xf32>, vector<2x8x8xf32>, vector<2x8x8xf32> -> vector<2x8x8xf32>
    "tpu.trace_stop"() : () -> ()
    %cst_19 = arith.constant 0.353553385 : f32
    %31 = vector.broadcast %cst_19 : f32 to vector<2x8x8xf32>
    %32 = arith.mulf %30, %31 : vector<2x8x8xf32>
    %33 = vector.broadcast %2 : vector<2x1x8xf32> to vector<2x8x8xf32>
    %34 = arith.addf %32, %33 : vector<2x8x8xf32>
    %cst_20 = arith.constant dense<0xFF800000> : vector<2x8xf32>
    %35 = vector.multi_reduction <maximumf>, %34, %cst_20 [2] : vector<2x8x8xf32> to vector<2x8xf32>
    %36 = vector.shape_cast %35 : vector<2x8xf32> to vector<2x8x1xf32>
    %37 = vector.broadcast %36 : vector<2x8x1xf32> to vector<2x8x8xf32>
    %38 = arith.subf %34, %37 : vector<2x8x8xf32>
    %39 = math.exp %38 : vector<2x8x8xf32>
    %cst_21 = arith.constant dense<0.000000e+00> : vector<2x8xf32>
    %40 = vector.multi_reduction <add>, %39, %cst_21 [2] : vector<2x8x8xf32> to vector<2x8xf32>
    %41 = vector.shape_cast %40 : vector<2x8xf32> to vector<2x8x1xf32>
    %42 = tpu.reciprocal %41 {approx = true} : vector<2x8x1xf32> -> vector<2x8x1xf32>
    %43 = vector.extract_strided_slice %27 {offsets = [0, 0, 0], sizes = [2, 8, 8], strides = [1, 1, 1]} : vector<2x8x32xf32> to vector<2x8x8xf32>
    "tpu.trace_start"() <{level = 10 : i32, message = "bqk,bkd->bqd"}> : () -> ()
    %cst_22 = arith.constant dense<0.000000e+00> : vector<2x8x8xf32>
    %44 = tpu.matmul %39, %43, %cst_22 {dimension_numbers = #tpu.dot_dimension_numbers<[2], [1], [1], [2], [0, 0, 0, 1, 1, 2], [0], [0]>} : vector<2x8x8xf32>, vector<2x8x8xf32>, vector<2x8x8xf32> -> vector<2x8x8xf32>
    "tpu.trace_stop"() : () -> ()
    %45 = vector.broadcast %42 : vector<2x8x1xf32> to vector<2x8x8xf32>
    %46 = arith.mulf %44, %45 : vector<2x8x8xf32>
    %47 = vector.extract_strided_slice %19 {offsets = [0, 0, 8], sizes = [2, 8, 8], strides = [1, 1, 1]} : vector<2x8x32xf32> to vector<2x8x8xf32>
    %48 = vector.extract_strided_slice %23 {offsets = [0, 0, 8], sizes = [2, 8, 8], strides = [1, 1, 1]} : vector<2x8x32xf32> to vector<2x8x8xf32>
    "tpu.trace_start"() <{level = 10 : i32, message = "bqd,bkd->bqk"}> : () -> ()
    %cst_23 = arith.constant dense<0.000000e+00> : vector<2x8x8xf32>
    %49 = tpu.matmul %47, %48, %cst_23 {dimension_numbers = #tpu.dot_dimension_numbers<[2], [2], [1], [1], [0, 0, 0, 1, 1, 1], [0], [0]>} : vector<2x8x8xf32>, vector<2x8x8xf32>, vector<2x8x8xf32> -> vector<2x8x8xf32>
    "tpu.trace_stop"() : () -> ()
    %cst_24 = arith.constant 0.353553385 : f32
    %50 = vector.broadcast %cst_24 : f32 to vector<2x8x8xf32>
    %51 = arith.mulf %49, %50 : vector<2x8x8xf32>
    %52 = vector.broadcast %2 : vector<2x1x8xf32> to vector<2x8x8xf32>
    %53 = arith.addf %51, %52 : vector<2x8x8xf32>
    %cst_25 = arith.constant dense<0xFF800000> : vector<2x8xf32>
    %54 = vector.multi_reduction <maximumf>, %53, %cst_25 [2] : vector<2x8x8xf32> to vector<2x8xf32>
    %55 = vector.shape_cast %54 : vector<2x8xf32> to vector<2x8x1xf32>
    %56 = vector.broadcast %55 : vector<2x8x1xf32> to vector<2x8x8xf32>
    %57 = arith.subf %53, %56 : vector<2x8x8xf32>
    %58 = math.exp %57 : vector<2x8x8xf32>
    %cst_26 = arith.constant dense<0.000000e+00> : vector<2x8xf32>
    %59 = vector.multi_reduction <add>, %58, %cst_26 [2] : vector<2x8x8xf32> to vector<2x8xf32>
    %60 = vector.shape_cast %59 : vector<2x8xf32> to vector<2x8x1xf32>
    %61 = tpu.reciprocal %60 {approx = true} : vector<2x8x1xf32> -> vector<2x8x1xf32>
    %62 = vector.extract_strided_slice %27 {offsets = [0, 0, 8], sizes = [2, 8, 8], strides = [1, 1, 1]} : vector<2x8x32xf32> to vector<2x8x8xf32>
    "tpu.trace_start"() <{level = 10 : i32, message = "bqk,bkd->bqd"}> : () -> ()
    %cst_27 = arith.constant dense<0.000000e+00> : vector<2x8x8xf32>
    %63 = tpu.matmul %58, %62, %cst_27 {dimension_numbers = #tpu.dot_dimension_numbers<[2], [1], [1], [2], [0, 0, 0, 1, 1, 2], [0], [0]>} : vector<2x8x8xf32>, vector<2x8x8xf32>, vector<2x8x8xf32> -> vector<2x8x8xf32>
    "tpu.trace_stop"() : () -> ()
    %64 = vector.broadcast %61 : vector<2x8x1xf32> to vector<2x8x8xf32>
    %65 = arith.mulf %63, %64 : vector<2x8x8xf32>
    %66 = vector.extract_strided_slice %19 {offsets = [0, 0, 16], sizes = [2, 8, 8], strides = [1, 1, 1]} : vector<2x8x32xf32> to vector<2x8x8xf32>
    %67 = vector.extract_strided_slice %23 {offsets = [0, 0, 16], sizes = [2, 8, 8], strides = [1, 1, 1]} : vector<2x8x32xf32> to vector<2x8x8xf32>
    "tpu.trace_start"() <{level = 10 : i32, message = "bqd,bkd->bqk"}> : () -> ()
    %cst_28 = arith.constant dense<0.000000e+00> : vector<2x8x8xf32>
    %68 = tpu.matmul %66, %67, %cst_28 {dimension_numbers = #tpu.dot_dimension_numbers<[2], [2], [1], [1], [0, 0, 0, 1, 1, 1], [0], [0]>} : vector<2x8x8xf32>, vector<2x8x8xf32>, vector<2x8x8xf32> -> vector<2x8x8xf32>
    "tpu.trace_stop"() : () -> ()
    %cst_29 = arith.constant 0.353553385 : f32
    %69 = vector.broadcast %cst_29 : f32 to vector<2x8x8xf32>
    %70 = arith.mulf %68, %69 : vector<2x8x8xf32>
    %71 = vector.broadcast %2 : vector<2x1x8xf32> to vector<2x8x8xf32>
    %72 = arith.addf %70, %71 : vector<2x8x8xf32>
    %cst_30 = arith.constant dense<0xFF800000> : vector<2x8xf32>
    %73 = vector.multi_reduction <maximumf>, %72, %cst_30 [2] : vector<2x8x8xf32> to vector<2x8xf32>
    %74 = vector.shape_cast %73 : vector<2x8xf32> to vector<2x8x1xf32>
    %75 = vector.broadcast %74 : vector<2x8x1xf32> to vector<2x8x8xf32>
    %76 = arith.subf %72, %75 : vector<2x8x8xf32>
    %77 = math.exp %76 : vector<2x8x8xf32>
    %cst_31 = arith.constant dense<0.000000e+00> : vector<2x8xf32>
    %78 = vector.multi_reduction <add>, %77, %cst_31 [2] : vector<2x8x8xf32> to vector<2x8xf32>
    %79 = vector.shape_cast %78 : vector<2x8xf32> to vector<2x8x1xf32>
    %80 = tpu.reciprocal %79 {approx = true} : vector<2x8x1xf32> -> vector<2x8x1xf32>
    %81 = vector.extract_strided_slice %27 {offsets = [0, 0, 16], sizes = [2, 8, 8], strides = [1, 1, 1]} : vector<2x8x32xf32> to vector<2x8x8xf32>
    "tpu.trace_start"() <{level = 10 : i32, message = "bqk,bkd->bqd"}> : () -> ()
    %cst_32 = arith.constant dense<0.000000e+00> : vector<2x8x8xf32>
    %82 = tpu.matmul %77, %81, %cst_32 {dimension_numbers = #tpu.dot_dimension_numbers<[2], [1], [1], [2], [0, 0, 0, 1, 1, 2], [0], [0]>} : vector<2x8x8xf32>, vector<2x8x8xf32>, vector<2x8x8xf32> -> vector<2x8x8xf32>
    "tpu.trace_stop"() : () -> ()
    %83 = vector.broadcast %80 : vector<2x8x1xf32> to vector<2x8x8xf32>
    %84 = arith.mulf %82, %83 : vector<2x8x8xf32>
    %85 = vector.extract_strided_slice %19 {offsets = [0, 0, 24], sizes = [2, 8, 8], strides = [1, 1, 1]} : vector<2x8x32xf32> to vector<2x8x8xf32>
    %86 = vector.extract_strided_slice %23 {offsets = [0, 0, 24], sizes = [2, 8, 8], strides = [1, 1, 1]} : vector<2x8x32xf32> to vector<2x8x8xf32>
    "tpu.trace_start"() <{level = 10 : i32, message = "bqd,bkd->bqk"}> : () -> ()
    %cst_33 = arith.constant dense<0.000000e+00> : vector<2x8x8xf32>
    %87 = tpu.matmul %85, %86, %cst_33 {dimension_numbers = #tpu.dot_dimension_numbers<[2], [2], [1], [1], [0, 0, 0, 1, 1, 1], [0], [0]>} : vector<2x8x8xf32>, vector<2x8x8xf32>, vector<2x8x8xf32> -> vector<2x8x8xf32>
    "tpu.trace_stop"() : () -> ()
    %cst_34 = arith.constant 0.353553385 : f32
    %88 = vector.broadcast %cst_34 : f32 to vector<2x8x8xf32>
    %89 = arith.mulf %87, %88 : vector<2x8x8xf32>
    %90 = vector.broadcast %2 : vector<2x1x8xf32> to vector<2x8x8xf32>
    %91 = arith.addf %89, %90 : vector<2x8x8xf32>
    %cst_35 = arith.constant dense<0xFF800000> : vector<2x8xf32>
    %92 = vector.multi_reduction <maximumf>, %91, %cst_35 [2] : vector<2x8x8xf32> to vector<2x8xf32>
    %93 = vector.shape_cast %92 : vector<2x8xf32> to vector<2x8x1xf32>
    %94 = vector.broadcast %93 : vector<2x8x1xf32> to vector<2x8x8xf32>
    %95 = arith.subf %91, %94 : vector<2x8x8xf32>
    %96 = math.exp %95 : vector<2x8x8xf32>
    %cst_36 = arith.constant dense<0.000000e+00> : vector<2x8xf32>
    %97 = vector.multi_reduction <add>, %96, %cst_36 [2] : vector<2x8x8xf32> to vector<2x8xf32>
    %98 = vector.shape_cast %97 : vector<2x8xf32> to vector<2x8x1xf32>
    %99 = tpu.reciprocal %98 {approx = true} : vector<2x8x1xf32> -> vector<2x8x1xf32>
    %100 = vector.extract_strided_slice %27 {offsets = [0, 0, 24], sizes = [2, 8, 8], strides = [1, 1, 1]} : vector<2x8x32xf32> to vector<2x8x8xf32>
    "tpu.trace_start"() <{level = 10 : i32, message = "bqk,bkd->bqd"}> : () -> ()
    %cst_37 = arith.constant dense<0.000000e+00> : vector<2x8x8xf32>
    %101 = tpu.matmul %96, %100, %cst_37 {dimension_numbers = #tpu.dot_dimension_numbers<[2], [1], [1], [2], [0, 0, 0, 1, 1, 2], [0], [0]>} : vector<2x8x8xf32>, vector<2x8x8xf32>, vector<2x8x8xf32> -> vector<2x8x8xf32>
    "tpu.trace_stop"() : () -> ()
    %102 = vector.broadcast %99 : vector<2x8x1xf32> to vector<2x8x8xf32>
    %103 = arith.mulf %101, %102 : vector<2x8x8xf32>
    %104 = tpu.concatenate %46, %65, %84, %103 in 2 : vector<2x8x8xf32>, vector<2x8x8xf32>, vector<2x8x8xf32>, vector<2x8x8xf32> -> vector<2x8x32xf32>
    %105 = vector.shape_cast %104 : vector<2x8x32xf32> to vector<16x32xf32>
    %cst_38 = arith.constant dense<0.000000e+00> : vector<16x32xf32>
    %106 = tpu.matmul %105, %10, %cst_38 {dimension_numbers = #tpu.dot_dimension_numbers<[1], [0], [0], [1], [0, 0, 1, 1], [], []>} : vector<16x32xf32>, vector<32x32xf32>, vector<16x32xf32> -> vector<16x32xf32>
    %107 = vector.broadcast %14 : vector<1x32xf32> to vector<16x32xf32>
    %108 = arith.addf %106, %107 : vector<16x32xf32>
    %109 = vector.shape_cast %1 : vector<2x8x32xf32> to vector<16x32xf32>
    %110 = vector.extract_strided_slice %0 {offsets = [14, 0], sizes = [1, 32], strides = [1, 1]} : vector<29x128xf32> to vector<1x32xf32>
    %111 = vector.extract_strided_slice %0 {offsets = [15, 0], sizes = [1, 32], strides = [1, 1]} : vector<29x128xf32> to vector<1x32xf32>
    %112 = arith.addf %109, %108 : vector<16x32xf32>
    %cst_39 = arith.constant dense<0.000000e+00> : vector<16xf32>
    %113 = vector.multi_reduction <add>, %112, %cst_39 [1] : vector<16x32xf32> to vector<16xf32>
    %114 = vector.shape_cast %113 : vector<16xf32> to vector<16x1xf32>
    %cst_40 = arith.constant 3.200000e+01 : f32
    %115 = vector.broadcast %cst_40 : f32 to vector<16x1xf32>
    %116 = arith.divf %114, %115 : vector<16x1xf32>
    %117 = vector.broadcast %116 : vector<16x1xf32> to vector<16x32xf32>
    %118 = arith.subf %112, %117 : vector<16x32xf32>
    %119 = arith.mulf %118, %118 : vector<16x32xf32>
    %cst_41 = arith.constant dense<0.000000e+00> : vector<16xf32>
    %120 = vector.multi_reduction <add>, %119, %cst_41 [1] : vector<16x32xf32> to vector<16xf32>
    %121 = vector.shape_cast %120 : vector<16xf32> to vector<16x1xf32>
    %cst_42 = arith.constant 3.200000e+01 : f32
    %122 = vector.broadcast %cst_42 : f32 to vector<16x1xf32>
    %123 = arith.divf %121, %122 : vector<16x1xf32>
    %124 = vector.broadcast %116 : vector<16x1xf32> to vector<16x32xf32>
    %125 = arith.subf %112, %124 : vector<16x32xf32>
    %cst_43 = arith.constant 9.99999974E-6 : f32
    %126 = vector.broadcast %cst_43 : f32 to vector<16x1xf32>
    %127 = arith.addf %123, %126 : vector<16x1xf32>
    %128 = math.rsqrt %127 : vector<16x1xf32>
    %129 = vector.broadcast %128 : vector<16x1xf32> to vector<16x32xf32>
    %130 = arith.mulf %125, %129 : vector<16x32xf32>
    %131 = vector.broadcast %110 : vector<1x32xf32> to vector<16x32xf32>
    %132 = arith.mulf %130, %131 : vector<16x32xf32>
    %133 = vector.broadcast %111 : vector<1x32xf32> to vector<16x32xf32>
    %134 = arith.addf %132, %133 : vector<16x32xf32>
    %c0_44 = arith.constant 0 : index
    %c0_45 = arith.constant 0 : index
    %c0_46 = arith.constant 0 : index
    %135 = vector.load %arg7[%c0_44, %c0_45, %c0_46] : memref<2x32x64xf32, #tpu.memory_space<vmem>>, vector<1x32x64xf32>
    %136 = vector.shape_cast %135 : vector<1x32x64xf32> to vector<32x64xf32>
    %137 = vector.extract_strided_slice %0 {offsets = [26, 0], sizes = [1, 64], strides = [1, 1]} : vector<29x128xf32> to vector<1x64xf32>
    %c0_47 = arith.constant 0 : index
    %c0_48 = arith.constant 0 : index
    %c0_49 = arith.constant 0 : index
    %138 = vector.load %arg8[%c0_47, %c0_48, %c0_49] : memref<2x64x32xf32, #tpu.memory_space<vmem>>, vector<1x64x32xf32>
    %139 = vector.shape_cast %138 : vector<1x64x32xf32> to vector<64x32xf32>
    %140 = vector.extract_strided_slice %0 {offsets = [12, 0], sizes = [1, 32], strides = [1, 1]} : vector<29x128xf32> to vector<1x32xf32>
    %cst_50 = arith.constant dense<0.000000e+00> : vector<16x64xf32>
    %141 = tpu.matmul %134, %136, %cst_50 {dimension_numbers = #tpu.dot_dimension_numbers<[1], [0], [0], [1], [0, 0, 1, 1], [], []>} : vector<16x32xf32>, vector<32x64xf32>, vector<16x64xf32> -> vector<16x64xf32>
    %142 = vector.broadcast %137 : vector<1x64xf32> to vector<16x64xf32>
    %143 = arith.addf %141, %142 : vector<16x64xf32>
    %cst_51 = arith.constant 0.000000e+00 : f32
    %144 = vector.broadcast %cst_51 : f32 to vector<16x64xf32>
    %145 = arith.maximumf %143, %144 : vector<16x64xf32>
    %cst_52 = arith.constant dense<0.000000e+00> : vector<16x32xf32>
    %146 = tpu.matmul %145, %139, %cst_52 {dimension_numbers = #tpu.dot_dimension_numbers<[1], [0], [0], [1], [0, 0, 1, 1], [], []>} : vector<16x64xf32>, vector<64x32xf32>, vector<16x32xf32> -> vector<16x32xf32>
    %147 = vector.broadcast %140 : vector<1x32xf32> to vector<16x32xf32>
    %148 = arith.addf %146, %147 : vector<16x32xf32>
    %149 = vector.extract_strided_slice %0 {offsets = [16, 0], sizes = [1, 32], strides = [1, 1]} : vector<29x128xf32> to vector<1x32xf32>
    %150 = vector.extract_strided_slice %0 {offsets = [17, 0], sizes = [1, 32], strides = [1, 1]} : vector<29x128xf32> to vector<1x32xf32>
    %151 = arith.addf %134, %148 : vector<16x32xf32>
    %cst_53 = arith.constant dense<0.000000e+00> : vector<16xf32>
    %152 = vector.multi_reduction <add>, %151, %cst_53 [1] : vector<16x32xf32> to vector<16xf32>
    %153 = vector.shape_cast %152 : vector<16xf32> to vector<16x1xf32>
    %cst_54 = arith.constant 3.200000e+01 : f32
    %154 = vector.broadcast %cst_54 : f32 to vector<16x1xf32>
    %155 = arith.divf %153, %154 : vector<16x1xf32>
    %156 = vector.broadcast %155 : vector<16x1xf32> to vector<16x32xf32>
    %157 = arith.subf %151, %156 : vector<16x32xf32>
    %158 = arith.mulf %157, %157 : vector<16x32xf32>
    %cst_55 = arith.constant dense<0.000000e+00> : vector<16xf32>
    %159 = vector.multi_reduction <add>, %158, %cst_55 [1] : vector<16x32xf32> to vector<16xf32>
    %160 = vector.shape_cast %159 : vector<16xf32> to vector<16x1xf32>
    %cst_56 = arith.constant 3.200000e+01 : f32
    %161 = vector.broadcast %cst_56 : f32 to vector<16x1xf32>
    %162 = arith.divf %160, %161 : vector<16x1xf32>
    %163 = vector.broadcast %155 : vector<16x1xf32> to vector<16x32xf32>
    %164 = arith.subf %151, %163 : vector<16x32xf32>
    %cst_57 = arith.constant 9.99999974E-6 : f32
    %165 = vector.broadcast %cst_57 : f32 to vector<16x1xf32>
    %166 = arith.addf %162, %165 : vector<16x1xf32>
    %167 = math.rsqrt %166 : vector<16x1xf32>
    %168 = vector.broadcast %167 : vector<16x1xf32> to vector<16x32xf32>
    %169 = arith.mulf %164, %168 : vector<16x32xf32>
    %170 = vector.broadcast %149 : vector<1x32xf32> to vector<16x32xf32>
    %171 = arith.mulf %169, %170 : vector<16x32xf32>
    %172 = vector.broadcast %150 : vector<1x32xf32> to vector<16x32xf32>
    %173 = arith.addf %171, %172 : vector<16x32xf32>
    %174 = vector.shape_cast %173 : vector<16x32xf32> to vector<2x8x32xf32>
    %c0_58 = arith.constant 0 : index
    %c0_59 = arith.constant 0 : index
    %175 = vector.load %arg5[%c0_58, %c0_59] : memref<2x32xf32, #tpu.memory_space<vmem>>, vector<2x32xf32>
    %c12 = arith.constant 12 : index
    %c0_60 = arith.constant 0 : index
    %c0_61 = arith.constant 0 : index
    %176 = vector.load %arg6[%c12, %c0_60, %c0_61] : memref<14x32x32xf32, #tpu.memory_space<vmem>>, vector<1x32x32xf32>
    %177 = vector.shape_cast %176 : vector<1x32x32xf32> to vector<32x32xf32>
    %cst_62 = arith.constant dense<0.000000e+00> : vector<2x32xf32>
    %178 = tpu.matmul %175, %177, %cst_62 {dimension_numbers = #tpu.dot_dimension_numbers<[1], [0], [0], [1], [0, 0, 1, 1], [], []>} : vector<2x32xf32>, vector<32x32xf32>, vector<2x32xf32> -> vector<2x32xf32>
    %179 = vector.extract_strided_slice %0 {offsets = [24, 0], sizes = [1, 32], strides = [1, 1]} : vector<29x128xf32> to vector<1x32xf32>
    %180 = vector.broadcast %179 : vector<1x32xf32> to vector<2x32xf32>
    %181 = arith.addf %178, %180 : vector<2x32xf32>
    %cst_63 = arith.constant 0.000000e+00 : f32
    %182 = vector.broadcast %cst_63 : f32 to vector<2x32xf32>
    %183 = arith.maximumf %181, %182 : vector<2x32xf32>
    %c13 = arith.constant 13 : index
    %c0_64 = arith.constant 0 : index
    %c0_65 = arith.constant 0 : index
    %184 = vector.load %arg6[%c13, %c0_64, %c0_65] : memref<14x32x32xf32, #tpu.memory_space<vmem>>, vector<1x32x32xf32>
    %185 = vector.shape_cast %184 : vector<1x32x32xf32> to vector<32x32xf32>
    %cst_66 = arith.constant dense<0.000000e+00> : vector<2x32xf32>
    %186 = tpu.matmul %183, %185, %cst_66 {dimension_numbers = #tpu.dot_dimension_numbers<[1], [0], [0], [1], [0, 0, 1, 1], [], []>} : vector<2x32xf32>, vector<32x32xf32>, vector<2x32xf32> -> vector<2x32xf32>
    %187 = vector.extract_strided_slice %0 {offsets = [25, 0], sizes = [1, 32], strides = [1, 1]} : vector<29x128xf32> to vector<1x32xf32>
    %188 = vector.broadcast %187 : vector<1x32xf32> to vector<2x32xf32>
    %189 = arith.addf %186, %188 : vector<2x32xf32>
    %c0_67 = arith.constant 0 : index
    %c0_68 = arith.constant 0 : index
    %c0_69 = arith.constant 0 : index
    %190 = vector.load %arg3[%c0_67, %c0_68, %c0_69] : memref<2x8x32xf32, #tpu.memory_space<vmem>>, vector<2x8x32xf32>
    %191 = tpu.iota {dimensions = array<i32: 0>} : vector<8x8xi32>
    %192 = tpu.iota {dimensions = array<i32: 1>} : vector<8x8xi32>
    %193 = arith.cmpi sgt, %192, %191 : vector<8x8xi32>
    %cst_70 = arith.constant -1.000000e+09 : f32
    %cst_71 = arith.constant 0.000000e+00 : f32
    %194 = vector.broadcast %cst_70 : f32 to vector<8x8xf32>
    %195 = vector.broadcast %cst_71 : f32 to vector<8x8xf32>
    %196 = arith.select %193, %194, %195 : vector<8x8xi1>, vector<8x8xf32>
    %197 = vector.shape_cast %196 : vector<8x8xf32> to vector<1x8x8xf32>
    %c0_72 = arith.constant 0 : index
    %c0_73 = arith.constant 0 : index
    %c0_74 = arith.constant 0 : index
    %198 = vector.load %arg4[%c0_72, %c0_73, %c0_74] : memref<2x1x8xf32, #tpu.memory_space<vmem>>, vector<2x1x8xf32>
    %199 = vector.broadcast %197 : vector<1x8x8xf32> to vector<2x8x8xf32>
    %200 = vector.broadcast %198 : vector<2x1x8xf32> to vector<2x8x8xf32>
    %201 = arith.addf %199, %200 : vector<2x8x8xf32>
    %c4 = arith.constant 4 : index
    %c0_75 = arith.constant 0 : index
    %c0_76 = arith.constant 0 : index
    %202 = vector.load %arg6[%c4, %c0_75, %c0_76] : memref<14x32x32xf32, #tpu.memory_space<vmem>>, vector<1x32x32xf32>
    %203 = vector.shape_cast %202 : vector<1x32x32xf32> to vector<32x32xf32>
    %c5 = arith.constant 5 : index
    %c0_77 = arith.constant 0 : index
    %c0_78 = arith.constant 0 : index
    %204 = vector.load %arg6[%c5, %c0_77, %c0_78] : memref<14x32x32xf32, #tpu.memory_space<vmem>>, vector<1x32x32xf32>
    %205 = vector.shape_cast %204 : vector<1x32x32xf32> to vector<32x32xf32>
    %c6 = arith.constant 6 : index
    %c0_79 = arith.constant 0 : index
    %c0_80 = arith.constant 0 : index
    %206 = vector.load %arg6[%c6, %c0_79, %c0_80] : memref<14x32x32xf32, #tpu.memory_space<vmem>>, vector<1x32x32xf32>
    %207 = vector.shape_cast %206 : vector<1x32x32xf32> to vector<32x32xf32>
    %c7 = arith.constant 7 : index
    %c0_81 = arith.constant 0 : index
    %c0_82 = arith.constant 0 : index
    %208 = vector.load %arg6[%c7, %c0_81, %c0_82] : memref<14x32x32xf32, #tpu.memory_space<vmem>>, vector<1x32x32xf32>
    %209 = vector.shape_cast %208 : vector<1x32x32xf32> to vector<32x32xf32>
    %210 = vector.extract_strided_slice %0 {offsets = [4, 0], sizes = [1, 32], strides = [1, 1]} : vector<29x128xf32> to vector<1x32xf32>
    %211 = vector.extract_strided_slice %0 {offsets = [5, 0], sizes = [1, 32], strides = [1, 1]} : vector<29x128xf32> to vector<1x32xf32>
    %212 = vector.extract_strided_slice %0 {offsets = [6, 0], sizes = [1, 32], strides = [1, 1]} : vector<29x128xf32> to vector<1x32xf32>
    %213 = vector.extract_strided_slice %0 {offsets = [7, 0], sizes = [1, 32], strides = [1, 1]} : vector<29x128xf32> to vector<1x32xf32>
    %214 = vector.shape_cast %190 : vector<2x8x32xf32> to vector<16x32xf32>
    %cst_83 = arith.constant dense<0.000000e+00> : vector<16x32xf32>
    %215 = tpu.matmul %214, %203, %cst_83 {dimension_numbers = #tpu.dot_dimension_numbers<[1], [0], [0], [1], [0, 0, 1, 1], [], []>} : vector<16x32xf32>, vector<32x32xf32>, vector<16x32xf32> -> vector<16x32xf32>
    %216 = vector.broadcast %210 : vector<1x32xf32> to vector<16x32xf32>
    %217 = arith.addf %215, %216 : vector<16x32xf32>
    %218 = vector.shape_cast %217 : vector<16x32xf32> to vector<2x8x32xf32>
    %cst_84 = arith.constant dense<0.000000e+00> : vector<16x32xf32>
    %219 = tpu.matmul %214, %205, %cst_84 {dimension_numbers = #tpu.dot_dimension_numbers<[1], [0], [0], [1], [0, 0, 1, 1], [], []>} : vector<16x32xf32>, vector<32x32xf32>, vector<16x32xf32> -> vector<16x32xf32>
    %220 = vector.broadcast %211 : vector<1x32xf32> to vector<16x32xf32>
    %221 = arith.addf %219, %220 : vector<16x32xf32>
    %222 = vector.shape_cast %221 : vector<16x32xf32> to vector<2x8x32xf32>
    %cst_85 = arith.constant dense<0.000000e+00> : vector<16x32xf32>
    %223 = tpu.matmul %214, %207, %cst_85 {dimension_numbers = #tpu.dot_dimension_numbers<[1], [0], [0], [1], [0, 0, 1, 1], [], []>} : vector<16x32xf32>, vector<32x32xf32>, vector<16x32xf32> -> vector<16x32xf32>
    %224 = vector.broadcast %212 : vector<1x32xf32> to vector<16x32xf32>
    %225 = arith.addf %223, %224 : vector<16x32xf32>
    %226 = vector.shape_cast %225 : vector<16x32xf32> to vector<2x8x32xf32>
    %227 = vector.extract_strided_slice %218 {offsets = [0, 0, 0], sizes = [2, 8, 8], strides = [1, 1, 1]} : vector<2x8x32xf32> to vector<2x8x8xf32>
    %228 = vector.extract_strided_slice %222 {offsets = [0, 0, 0], sizes = [2, 8, 8], strides = [1, 1, 1]} : vector<2x8x32xf32> to vector<2x8x8xf32>
    "tpu.trace_start"() <{level = 10 : i32, message = "bqd,bkd->bqk"}> : () -> ()
    %cst_86 = arith.constant dense<0.000000e+00> : vector<2x8x8xf32>
    %229 = tpu.matmul %227, %228, %cst_86 {dimension_numbers = #tpu.dot_dimension_numbers<[2], [2], [1], [1], [0, 0, 0, 1, 1, 1], [0], [0]>} : vector<2x8x8xf32>, vector<2x8x8xf32>, vector<2x8x8xf32> -> vector<2x8x8xf32>
    "tpu.trace_stop"() : () -> ()
    %cst_87 = arith.constant 0.353553385 : f32
    %230 = vector.broadcast %cst_87 : f32 to vector<2x8x8xf32>
    %231 = arith.mulf %229, %230 : vector<2x8x8xf32>
    %232 = arith.addf %231, %201 : vector<2x8x8xf32>
    %cst_88 = arith.constant dense<0xFF800000> : vector<2x8xf32>
    %233 = vector.multi_reduction <maximumf>, %232, %cst_88 [2] : vector<2x8x8xf32> to vector<2x8xf32>
    %234 = vector.shape_cast %233 : vector<2x8xf32> to vector<2x8x1xf32>
    %235 = vector.broadcast %234 : vector<2x8x1xf32> to vector<2x8x8xf32>
    %236 = arith.subf %232, %235 : vector<2x8x8xf32>
    %237 = math.exp %236 : vector<2x8x8xf32>
    %cst_89 = arith.constant dense<0.000000e+00> : vector<2x8xf32>
    %238 = vector.multi_reduction <add>, %237, %cst_89 [2] : vector<2x8x8xf32> to vector<2x8xf32>
    %239 = vector.shape_cast %238 : vector<2x8xf32> to vector<2x8x1xf32>
    %240 = tpu.reciprocal %239 {approx = true} : vector<2x8x1xf32> -> vector<2x8x1xf32>
    %241 = vector.extract_strided_slice %226 {offsets = [0, 0, 0], sizes = [2, 8, 8], strides = [1, 1, 1]} : vector<2x8x32xf32> to vector<2x8x8xf32>
    "tpu.trace_start"() <{level = 10 : i32, message = "bqk,bkd->bqd"}> : () -> ()
    %cst_90 = arith.constant dense<0.000000e+00> : vector<2x8x8xf32>
    %242 = tpu.matmul %237, %241, %cst_90 {dimension_numbers = #tpu.dot_dimension_numbers<[2], [1], [1], [2], [0, 0, 0, 1, 1, 2], [0], [0]>} : vector<2x8x8xf32>, vector<2x8x8xf32>, vector<2x8x8xf32> -> vector<2x8x8xf32>
    "tpu.trace_stop"() : () -> ()
    %243 = vector.broadcast %240 : vector<2x8x1xf32> to vector<2x8x8xf32>
    %244 = arith.mulf %242, %243 : vector<2x8x8xf32>
    %245 = vector.extract_strided_slice %218 {offsets = [0, 0, 8], sizes = [2, 8, 8], strides = [1, 1, 1]} : vector<2x8x32xf32> to vector<2x8x8xf32>
    %246 = vector.extract_strided_slice %222 {offsets = [0, 0, 8], sizes = [2, 8, 8], strides = [1, 1, 1]} : vector<2x8x32xf32> to vector<2x8x8xf32>
    "tpu.trace_start"() <{level = 10 : i32, message = "bqd,bkd->bqk"}> : () -> ()
    %cst_91 = arith.constant dense<0.000000e+00> : vector<2x8x8xf32>
    %247 = tpu.matmul %245, %246, %cst_91 {dimension_numbers = #tpu.dot_dimension_numbers<[2], [2], [1], [1], [0, 0, 0, 1, 1, 1], [0], [0]>} : vector<2x8x8xf32>, vector<2x8x8xf32>, vector<2x8x8xf32> -> vector<2x8x8xf32>
    "tpu.trace_stop"() : () -> ()
    %cst_92 = arith.constant 0.353553385 : f32
    %248 = vector.broadcast %cst_92 : f32 to vector<2x8x8xf32>
    %249 = arith.mulf %247, %248 : vector<2x8x8xf32>
    %250 = arith.addf %249, %201 : vector<2x8x8xf32>
    %cst_93 = arith.constant dense<0xFF800000> : vector<2x8xf32>
    %251 = vector.multi_reduction <maximumf>, %250, %cst_93 [2] : vector<2x8x8xf32> to vector<2x8xf32>
    %252 = vector.shape_cast %251 : vector<2x8xf32> to vector<2x8x1xf32>
    %253 = vector.broadcast %252 : vector<2x8x1xf32> to vector<2x8x8xf32>
    %254 = arith.subf %250, %253 : vector<2x8x8xf32>
    %255 = math.exp %254 : vector<2x8x8xf32>
    %cst_94 = arith.constant dense<0.000000e+00> : vector<2x8xf32>
    %256 = vector.multi_reduction <add>, %255, %cst_94 [2] : vector<2x8x8xf32> to vector<2x8xf32>
    %257 = vector.shape_cast %256 : vector<2x8xf32> to vector<2x8x1xf32>
    %258 = tpu.reciprocal %257 {approx = true} : vector<2x8x1xf32> -> vector<2x8x1xf32>
    %259 = vector.extract_strided_slice %226 {offsets = [0, 0, 8], sizes = [2, 8, 8], strides = [1, 1, 1]} : vector<2x8x32xf32> to vector<2x8x8xf32>
    "tpu.trace_start"() <{level = 10 : i32, message = "bqk,bkd->bqd"}> : () -> ()
    %cst_95 = arith.constant dense<0.000000e+00> : vector<2x8x8xf32>
    %260 = tpu.matmul %255, %259, %cst_95 {dimension_numbers = #tpu.dot_dimension_numbers<[2], [1], [1], [2], [0, 0, 0, 1, 1, 2], [0], [0]>} : vector<2x8x8xf32>, vector<2x8x8xf32>, vector<2x8x8xf32> -> vector<2x8x8xf32>
    "tpu.trace_stop"() : () -> ()
    %261 = vector.broadcast %258 : vector<2x8x1xf32> to vector<2x8x8xf32>
    %262 = arith.mulf %260, %261 : vector<2x8x8xf32>
    %263 = vector.extract_strided_slice %218 {offsets = [0, 0, 16], sizes = [2, 8, 8], strides = [1, 1, 1]} : vector<2x8x32xf32> to vector<2x8x8xf32>
    %264 = vector.extract_strided_slice %222 {offsets = [0, 0, 16], sizes = [2, 8, 8], strides = [1, 1, 1]} : vector<2x8x32xf32> to vector<2x8x8xf32>
    "tpu.trace_start"() <{level = 10 : i32, message = "bqd,bkd->bqk"}> : () -> ()
    %cst_96 = arith.constant dense<0.000000e+00> : vector<2x8x8xf32>
    %265 = tpu.matmul %263, %264, %cst_96 {dimension_numbers = #tpu.dot_dimension_numbers<[2], [2], [1], [1], [0, 0, 0, 1, 1, 1], [0], [0]>} : vector<2x8x8xf32>, vector<2x8x8xf32>, vector<2x8x8xf32> -> vector<2x8x8xf32>
    "tpu.trace_stop"() : () -> ()
    %cst_97 = arith.constant 0.353553385 : f32
    %266 = vector.broadcast %cst_97 : f32 to vector<2x8x8xf32>
    %267 = arith.mulf %265, %266 : vector<2x8x8xf32>
    %268 = arith.addf %267, %201 : vector<2x8x8xf32>
    %cst_98 = arith.constant dense<0xFF800000> : vector<2x8xf32>
    %269 = vector.multi_reduction <maximumf>, %268, %cst_98 [2] : vector<2x8x8xf32> to vector<2x8xf32>
    %270 = vector.shape_cast %269 : vector<2x8xf32> to vector<2x8x1xf32>
    %271 = vector.broadcast %270 : vector<2x8x1xf32> to vector<2x8x8xf32>
    %272 = arith.subf %268, %271 : vector<2x8x8xf32>
    %273 = math.exp %272 : vector<2x8x8xf32>
    %cst_99 = arith.constant dense<0.000000e+00> : vector<2x8xf32>
    %274 = vector.multi_reduction <add>, %273, %cst_99 [2] : vector<2x8x8xf32> to vector<2x8xf32>
    %275 = vector.shape_cast %274 : vector<2x8xf32> to vector<2x8x1xf32>
    %276 = tpu.reciprocal %275 {approx = true} : vector<2x8x1xf32> -> vector<2x8x1xf32>
    %277 = vector.extract_strided_slice %226 {offsets = [0, 0, 16], sizes = [2, 8, 8], strides = [1, 1, 1]} : vector<2x8x32xf32> to vector<2x8x8xf32>
    "tpu.trace_start"() <{level = 10 : i32, message = "bqk,bkd->bqd"}> : () -> ()
    %cst_100 = arith.constant dense<0.000000e+00> : vector<2x8x8xf32>
    %278 = tpu.matmul %273, %277, %cst_100 {dimension_numbers = #tpu.dot_dimension_numbers<[2], [1], [1], [2], [0, 0, 0, 1, 1, 2], [0], [0]>} : vector<2x8x8xf32>, vector<2x8x8xf32>, vector<2x8x8xf32> -> vector<2x8x8xf32>
    "tpu.trace_stop"() : () -> ()
    %279 = vector.broadcast %276 : vector<2x8x1xf32> to vector<2x8x8xf32>
    %280 = arith.mulf %278, %279 : vector<2x8x8xf32>
    %281 = vector.extract_strided_slice %218 {offsets = [0, 0, 24], sizes = [2, 8, 8], strides = [1, 1, 1]} : vector<2x8x32xf32> to vector<2x8x8xf32>
    %282 = vector.extract_strided_slice %222 {offsets = [0, 0, 24], sizes = [2, 8, 8], strides = [1, 1, 1]} : vector<2x8x32xf32> to vector<2x8x8xf32>
    "tpu.trace_start"() <{level = 10 : i32, message = "bqd,bkd->bqk"}> : () -> ()
    %cst_101 = arith.constant dense<0.000000e+00> : vector<2x8x8xf32>
    %283 = tpu.matmul %281, %282, %cst_101 {dimension_numbers = #tpu.dot_dimension_numbers<[2], [2], [1], [1], [0, 0, 0, 1, 1, 1], [0], [0]>} : vector<2x8x8xf32>, vector<2x8x8xf32>, vector<2x8x8xf32> -> vector<2x8x8xf32>
    "tpu.trace_stop"() : () -> ()
    %cst_102 = arith.constant 0.353553385 : f32
    %284 = vector.broadcast %cst_102 : f32 to vector<2x8x8xf32>
    %285 = arith.mulf %283, %284 : vector<2x8x8xf32>
    %286 = arith.addf %285, %201 : vector<2x8x8xf32>
    %cst_103 = arith.constant dense<0xFF800000> : vector<2x8xf32>
    %287 = vector.multi_reduction <maximumf>, %286, %cst_103 [2] : vector<2x8x8xf32> to vector<2x8xf32>
    %288 = vector.shape_cast %287 : vector<2x8xf32> to vector<2x8x1xf32>
    %289 = vector.broadcast %288 : vector<2x8x1xf32> to vector<2x8x8xf32>
    %290 = arith.subf %286, %289 : vector<2x8x8xf32>
    %291 = math.exp %290 : vector<2x8x8xf32>
    %cst_104 = arith.constant dense<0.000000e+00> : vector<2x8xf32>
    %292 = vector.multi_reduction <add>, %291, %cst_104 [2] : vector<2x8x8xf32> to vector<2x8xf32>
    %293 = vector.shape_cast %292 : vector<2x8xf32> to vector<2x8x1xf32>
    %294 = tpu.reciprocal %293 {approx = true} : vector<2x8x1xf32> -> vector<2x8x1xf32>
    %295 = vector.extract_strided_slice %226 {offsets = [0, 0, 24], sizes = [2, 8, 8], strides = [1, 1, 1]} : vector<2x8x32xf32> to vector<2x8x8xf32>
    "tpu.trace_start"() <{level = 10 : i32, message = "bqk,bkd->bqd"}> : () -> ()
    %cst_105 = arith.constant dense<0.000000e+00> : vector<2x8x8xf32>
    %296 = tpu.matmul %291, %295, %cst_105 {dimension_numbers = #tpu.dot_dimension_numbers<[2], [1], [1], [2], [0, 0, 0, 1, 1, 2], [0], [0]>} : vector<2x8x8xf32>, vector<2x8x8xf32>, vector<2x8x8xf32> -> vector<2x8x8xf32>
    "tpu.trace_stop"() : () -> ()
    %297 = vector.broadcast %294 : vector<2x8x1xf32> to vector<2x8x8xf32>
    %298 = arith.mulf %296, %297 : vector<2x8x8xf32>
    %299 = tpu.concatenate %244, %262, %280, %298 in 2 : vector<2x8x8xf32>, vector<2x8x8xf32>, vector<2x8x8xf32>, vector<2x8x8xf32> -> vector<2x8x32xf32>
    %300 = vector.shape_cast %299 : vector<2x8x32xf32> to vector<16x32xf32>
    %cst_106 = arith.constant dense<0.000000e+00> : vector<16x32xf32>
    %301 = tpu.matmul %300, %209, %cst_106 {dimension_numbers = #tpu.dot_dimension_numbers<[1], [0], [0], [1], [0, 0, 1, 1], [], []>} : vector<16x32xf32>, vector<32x32xf32>, vector<16x32xf32> -> vector<16x32xf32>
    %302 = vector.broadcast %213 : vector<1x32xf32> to vector<16x32xf32>
    %303 = arith.addf %301, %302 : vector<16x32xf32>
    %304 = vector.shape_cast %190 : vector<2x8x32xf32> to vector<16x32xf32>
    %305 = vector.extract_strided_slice %0 {offsets = [18, 0], sizes = [1, 32], strides = [1, 1]} : vector<29x128xf32> to vector<1x32xf32>
    %306 = vector.extract_strided_slice %0 {offsets = [19, 0], sizes = [1, 32], strides = [1, 1]} : vector<29x128xf32> to vector<1x32xf32>
    %307 = arith.addf %304, %303 : vector<16x32xf32>
    %cst_107 = arith.constant dense<0.000000e+00> : vector<16xf32>
    %308 = vector.multi_reduction <add>, %307, %cst_107 [1] : vector<16x32xf32> to vector<16xf32>
    %309 = vector.shape_cast %308 : vector<16xf32> to vector<16x1xf32>
    %cst_108 = arith.constant 3.200000e+01 : f32
    %310 = vector.broadcast %cst_108 : f32 to vector<16x1xf32>
    %311 = arith.divf %309, %310 : vector<16x1xf32>
    %312 = vector.broadcast %311 : vector<16x1xf32> to vector<16x32xf32>
    %313 = arith.subf %307, %312 : vector<16x32xf32>
    %314 = arith.mulf %313, %313 : vector<16x32xf32>
    %cst_109 = arith.constant dense<0.000000e+00> : vector<16xf32>
    %315 = vector.multi_reduction <add>, %314, %cst_109 [1] : vector<16x32xf32> to vector<16xf32>
    %316 = vector.shape_cast %315 : vector<16xf32> to vector<16x1xf32>
    %cst_110 = arith.constant 3.200000e+01 : f32
    %317 = vector.broadcast %cst_110 : f32 to vector<16x1xf32>
    %318 = arith.divf %316, %317 : vector<16x1xf32>
    %319 = vector.broadcast %311 : vector<16x1xf32> to vector<16x32xf32>
    %320 = arith.subf %307, %319 : vector<16x32xf32>
    %cst_111 = arith.constant 9.99999974E-6 : f32
    %321 = vector.broadcast %cst_111 : f32 to vector<16x1xf32>
    %322 = arith.addf %318, %321 : vector<16x1xf32>
    %323 = math.rsqrt %322 : vector<16x1xf32>
    %324 = vector.broadcast %323 : vector<16x1xf32> to vector<16x32xf32>
    %325 = arith.mulf %320, %324 : vector<16x32xf32>
    %326 = vector.broadcast %305 : vector<1x32xf32> to vector<16x32xf32>
    %327 = arith.mulf %325, %326 : vector<16x32xf32>
    %328 = vector.broadcast %306 : vector<1x32xf32> to vector<16x32xf32>
    %329 = arith.addf %327, %328 : vector<16x32xf32>
    %330 = vector.shape_cast %329 : vector<16x32xf32> to vector<2x8x32xf32>
    %c8 = arith.constant 8 : index
    %c0_112 = arith.constant 0 : index
    %c0_113 = arith.constant 0 : index
    %331 = vector.load %arg6[%c8, %c0_112, %c0_113] : memref<14x32x32xf32, #tpu.memory_space<vmem>>, vector<1x32x32xf32>
    %332 = vector.shape_cast %331 : vector<1x32x32xf32> to vector<32x32xf32>
    %c9 = arith.constant 9 : index
    %c0_114 = arith.constant 0 : index
    %c0_115 = arith.constant 0 : index
    %333 = vector.load %arg6[%c9, %c0_114, %c0_115] : memref<14x32x32xf32, #tpu.memory_space<vmem>>, vector<1x32x32xf32>
    %334 = vector.shape_cast %333 : vector<1x32x32xf32> to vector<32x32xf32>
    %c10 = arith.constant 10 : index
    %c0_116 = arith.constant 0 : index
    %c0_117 = arith.constant 0 : index
    %335 = vector.load %arg6[%c10, %c0_116, %c0_117] : memref<14x32x32xf32, #tpu.memory_space<vmem>>, vector<1x32x32xf32>
    %336 = vector.shape_cast %335 : vector<1x32x32xf32> to vector<32x32xf32>
    %c11 = arith.constant 11 : index
    %c0_118 = arith.constant 0 : index
    %c0_119 = arith.constant 0 : index
    %337 = vector.load %arg6[%c11, %c0_118, %c0_119] : memref<14x32x32xf32, #tpu.memory_space<vmem>>, vector<1x32x32xf32>
    %338 = vector.shape_cast %337 : vector<1x32x32xf32> to vector<32x32xf32>
    %339 = vector.extract_strided_slice %0 {offsets = [8, 0], sizes = [1, 32], strides = [1, 1]} : vector<29x128xf32> to vector<1x32xf32>
    %340 = vector.extract_strided_slice %0 {offsets = [9, 0], sizes = [1, 32], strides = [1, 1]} : vector<29x128xf32> to vector<1x32xf32>
    %341 = vector.extract_strided_slice %0 {offsets = [10, 0], sizes = [1, 32], strides = [1, 1]} : vector<29x128xf32> to vector<1x32xf32>
    %342 = vector.extract_strided_slice %0 {offsets = [11, 0], sizes = [1, 32], strides = [1, 1]} : vector<29x128xf32> to vector<1x32xf32>
    %343 = vector.shape_cast %330 : vector<2x8x32xf32> to vector<16x32xf32>
    %cst_120 = arith.constant dense<0.000000e+00> : vector<16x32xf32>
    %344 = tpu.matmul %343, %332, %cst_120 {dimension_numbers = #tpu.dot_dimension_numbers<[1], [0], [0], [1], [0, 0, 1, 1], [], []>} : vector<16x32xf32>, vector<32x32xf32>, vector<16x32xf32> -> vector<16x32xf32>
    %345 = vector.broadcast %339 : vector<1x32xf32> to vector<16x32xf32>
    %346 = arith.addf %344, %345 : vector<16x32xf32>
    %347 = vector.shape_cast %346 : vector<16x32xf32> to vector<2x8x32xf32>
    %348 = vector.shape_cast %174 : vector<2x8x32xf32> to vector<16x32xf32>
    %cst_121 = arith.constant dense<0.000000e+00> : vector<16x32xf32>
    %349 = tpu.matmul %348, %334, %cst_121 {dimension_numbers = #tpu.dot_dimension_numbers<[1], [0], [0], [1], [0, 0, 1, 1], [], []>} : vector<16x32xf32>, vector<32x32xf32>, vector<16x32xf32> -> vector<16x32xf32>
    %350 = vector.broadcast %340 : vector<1x32xf32> to vector<16x32xf32>
    %351 = arith.addf %349, %350 : vector<16x32xf32>
    %352 = vector.shape_cast %351 : vector<16x32xf32> to vector<2x8x32xf32>
    %353 = vector.shape_cast %174 : vector<2x8x32xf32> to vector<16x32xf32>
    %cst_122 = arith.constant dense<0.000000e+00> : vector<16x32xf32>
    %354 = tpu.matmul %353, %336, %cst_122 {dimension_numbers = #tpu.dot_dimension_numbers<[1], [0], [0], [1], [0, 0, 1, 1], [], []>} : vector<16x32xf32>, vector<32x32xf32>, vector<16x32xf32> -> vector<16x32xf32>
    %355 = vector.broadcast %341 : vector<1x32xf32> to vector<16x32xf32>
    %356 = arith.addf %354, %355 : vector<16x32xf32>
    %357 = vector.shape_cast %356 : vector<16x32xf32> to vector<2x8x32xf32>
    %cst_123 = arith.constant dense<0.000000e+00> : vector<2x32xf32>
    %358 = tpu.matmul %189, %334, %cst_123 {dimension_numbers = #tpu.dot_dimension_numbers<[1], [0], [0], [1], [0, 0, 1, 1], [], []>} : vector<2x32xf32>, vector<32x32xf32>, vector<2x32xf32> -> vector<2x32xf32>
    %359 = vector.broadcast %340 : vector<1x32xf32> to vector<2x32xf32>
    %360 = arith.addf %358, %359 : vector<2x32xf32>
    %cst_124 = arith.constant dense<0.000000e+00> : vector<2x32xf32>
    %361 = tpu.matmul %189, %336, %cst_124 {dimension_numbers = #tpu.dot_dimension_numbers<[1], [0], [0], [1], [0, 0, 1, 1], [], []>} : vector<2x32xf32>, vector<32x32xf32>, vector<2x32xf32> -> vector<2x32xf32>
    %362 = vector.broadcast %341 : vector<1x32xf32> to vector<2x32xf32>
    %363 = arith.addf %361, %362 : vector<2x32xf32>
    %364 = vector.extract_strided_slice %347 {offsets = [0, 0, 0], sizes = [2, 8, 8], strides = [1, 1, 1]} : vector<2x8x32xf32> to vector<2x8x8xf32>
    %365 = vector.extract_strided_slice %352 {offsets = [0, 0, 0], sizes = [2, 8, 8], strides = [1, 1, 1]} : vector<2x8x32xf32> to vector<2x8x8xf32>
    "tpu.trace_start"() <{level = 10 : i32, message = "bqd,bkd->bqk"}> : () -> ()
    %cst_125 = arith.constant dense<0.000000e+00> : vector<2x8x8xf32>
    %366 = tpu.matmul %364, %365, %cst_125 {dimension_numbers = #tpu.dot_dimension_numbers<[2], [2], [1], [1], [0, 0, 0, 1, 1, 1], [0], [0]>} : vector<2x8x8xf32>, vector<2x8x8xf32>, vector<2x8x8xf32> -> vector<2x8x8xf32>
    "tpu.trace_stop"() : () -> ()
    %cst_126 = arith.constant 0.353553385 : f32
    %367 = vector.broadcast %cst_126 : f32 to vector<2x8x8xf32>
    %368 = arith.mulf %366, %367 : vector<2x8x8xf32>
    %369 = vector.broadcast %2 : vector<2x1x8xf32> to vector<2x8x8xf32>
    %370 = arith.addf %368, %369 : vector<2x8x8xf32>
    %371 = vector.extract_strided_slice %360 {offsets = [0, 0], sizes = [2, 8], strides = [1, 1]} : vector<2x32xf32> to vector<2x8xf32>
    %372 = vector.shape_cast %371 : vector<2x8xf32> to vector<2x1x8xf32>
    %373 = vector.broadcast %372 : vector<2x1x8xf32> to vector<2x8x8xf32>
    %374 = arith.mulf %364, %373 : vector<2x8x8xf32>
    %cst_127 = arith.constant dense<0.000000e+00> : vector<2x8xf32>
    %375 = vector.multi_reduction <add>, %374, %cst_127 [2] : vector<2x8x8xf32> to vector<2x8xf32>
    %376 = vector.shape_cast %375 : vector<2x8xf32> to vector<2x8x1xf32>
    %cst_128 = arith.constant 0.353553385 : f32
    %377 = vector.broadcast %cst_128 : f32 to vector<2x8x1xf32>
    %378 = arith.mulf %376, %377 : vector<2x8x1xf32>
    %cst_129 = arith.constant dense<0xFF800000> : vector<2x8xf32>
    %379 = vector.multi_reduction <maximumf>, %370, %cst_129 [2] : vector<2x8x8xf32> to vector<2x8xf32>
    %380 = vector.shape_cast %379 : vector<2x8xf32> to vector<2x8x1xf32>
    %381 = arith.maximumf %380, %378 : vector<2x8x1xf32>
    %382 = vector.broadcast %381 : vector<2x8x1xf32> to vector<2x8x8xf32>
    %383 = arith.subf %370, %382 : vector<2x8x8xf32>
    %384 = math.exp %383 : vector<2x8x8xf32>
    %385 = arith.subf %378, %381 : vector<2x8x1xf32>
    %386 = math.exp %385 : vector<2x8x1xf32>
    %cst_130 = arith.constant dense<0.000000e+00> : vector<2x8xf32>
    %387 = vector.multi_reduction <add>, %384, %cst_130 [2] : vector<2x8x8xf32> to vector<2x8xf32>
    %388 = vector.shape_cast %387 : vector<2x8xf32> to vector<2x8x1xf32>
    %389 = arith.addf %388, %386 : vector<2x8x1xf32>
    %390 = tpu.reciprocal %389 {approx = true} : vector<2x8x1xf32> -> vector<2x8x1xf32>
    %391 = vector.extract_strided_slice %357 {offsets = [0, 0, 0], sizes = [2, 8, 8], strides = [1, 1, 1]} : vector<2x8x32xf32> to vector<2x8x8xf32>
    "tpu.trace_start"() <{level = 10 : i32, message = "bqk,bkd->bqd"}> : () -> ()
    %cst_131 = arith.constant dense<0.000000e+00> : vector<2x8x8xf32>
    %392 = tpu.matmul %384, %391, %cst_131 {dimension_numbers = #tpu.dot_dimension_numbers<[2], [1], [1], [2], [0, 0, 0, 1, 1, 2], [0], [0]>} : vector<2x8x8xf32>, vector<2x8x8xf32>, vector<2x8x8xf32> -> vector<2x8x8xf32>
    "tpu.trace_stop"() : () -> ()
    %393 = vector.extract_strided_slice %363 {offsets = [0, 0], sizes = [2, 8], strides = [1, 1]} : vector<2x32xf32> to vector<2x8xf32>
    %394 = vector.shape_cast %393 : vector<2x8xf32> to vector<2x1x8xf32>
    %395 = vector.broadcast %386 : vector<2x8x1xf32> to vector<2x8x8xf32>
    %396 = vector.broadcast %394 : vector<2x1x8xf32> to vector<2x8x8xf32>
    %397 = arith.mulf %395, %396 : vector<2x8x8xf32>
    %398 = arith.addf %392, %397 : vector<2x8x8xf32>
    %399 = vector.broadcast %390 : vector<2x8x1xf32> to vector<2x8x8xf32>
    %400 = arith.mulf %398, %399 : vector<2x8x8xf32>
    %401 = vector.extract_strided_slice %347 {offsets = [0, 0, 8], sizes = [2, 8, 8], strides = [1, 1, 1]} : vector<2x8x32xf32> to vector<2x8x8xf32>
    %402 = vector.extract_strided_slice %352 {offsets = [0, 0, 8], sizes = [2, 8, 8], strides = [1, 1, 1]} : vector<2x8x32xf32> to vector<2x8x8xf32>
    "tpu.trace_start"() <{level = 10 : i32, message = "bqd,bkd->bqk"}> : () -> ()
    %cst_132 = arith.constant dense<0.000000e+00> : vector<2x8x8xf32>
    %403 = tpu.matmul %401, %402, %cst_132 {dimension_numbers = #tpu.dot_dimension_numbers<[2], [2], [1], [1], [0, 0, 0, 1, 1, 1], [0], [0]>} : vector<2x8x8xf32>, vector<2x8x8xf32>, vector<2x8x8xf32> -> vector<2x8x8xf32>
    "tpu.trace_stop"() : () -> ()
    %cst_133 = arith.constant 0.353553385 : f32
    %404 = vector.broadcast %cst_133 : f32 to vector<2x8x8xf32>
    %405 = arith.mulf %403, %404 : vector<2x8x8xf32>
    %406 = vector.broadcast %2 : vector<2x1x8xf32> to vector<2x8x8xf32>
    %407 = arith.addf %405, %406 : vector<2x8x8xf32>
    %408 = vector.extract_strided_slice %360 {offsets = [0, 8], sizes = [2, 8], strides = [1, 1]} : vector<2x32xf32> to vector<2x8xf32>
    %409 = vector.shape_cast %408 : vector<2x8xf32> to vector<2x1x8xf32>
    %410 = vector.broadcast %409 : vector<2x1x8xf32> to vector<2x8x8xf32>
    %411 = arith.mulf %401, %410 : vector<2x8x8xf32>
    %cst_134 = arith.constant dense<0.000000e+00> : vector<2x8xf32>
    %412 = vector.multi_reduction <add>, %411, %cst_134 [2] : vector<2x8x8xf32> to vector<2x8xf32>
    %413 = vector.shape_cast %412 : vector<2x8xf32> to vector<2x8x1xf32>
    %cst_135 = arith.constant 0.353553385 : f32
    %414 = vector.broadcast %cst_135 : f32 to vector<2x8x1xf32>
    %415 = arith.mulf %413, %414 : vector<2x8x1xf32>
    %cst_136 = arith.constant dense<0xFF800000> : vector<2x8xf32>
    %416 = vector.multi_reduction <maximumf>, %407, %cst_136 [2] : vector<2x8x8xf32> to vector<2x8xf32>
    %417 = vector.shape_cast %416 : vector<2x8xf32> to vector<2x8x1xf32>
    %418 = arith.maximumf %417, %415 : vector<2x8x1xf32>
    %419 = vector.broadcast %418 : vector<2x8x1xf32> to vector<2x8x8xf32>
    %420 = arith.subf %407, %419 : vector<2x8x8xf32>
    %421 = math.exp %420 : vector<2x8x8xf32>
    %422 = arith.subf %415, %418 : vector<2x8x1xf32>
    %423 = math.exp %422 : vector<2x8x1xf32>
    %cst_137 = arith.constant dense<0.000000e+00> : vector<2x8xf32>
    %424 = vector.multi_reduction <add>, %421, %cst_137 [2] : vector<2x8x8xf32> to vector<2x8xf32>
    %425 = vector.shape_cast %424 : vector<2x8xf32> to vector<2x8x1xf32>
    %426 = arith.addf %425, %423 : vector<2x8x1xf32>
    %427 = tpu.reciprocal %426 {approx = true} : vector<2x8x1xf32> -> vector<2x8x1xf32>
    %428 = vector.extract_strided_slice %357 {offsets = [0, 0, 8], sizes = [2, 8, 8], strides = [1, 1, 1]} : vector<2x8x32xf32> to vector<2x8x8xf32>
    "tpu.trace_start"() <{level = 10 : i32, message = "bqk,bkd->bqd"}> : () -> ()
    %cst_138 = arith.constant dense<0.000000e+00> : vector<2x8x8xf32>
    %429 = tpu.matmul %421, %428, %cst_138 {dimension_numbers = #tpu.dot_dimension_numbers<[2], [1], [1], [2], [0, 0, 0, 1, 1, 2], [0], [0]>} : vector<2x8x8xf32>, vector<2x8x8xf32>, vector<2x8x8xf32> -> vector<2x8x8xf32>
    "tpu.trace_stop"() : () -> ()
    %430 = vector.extract_strided_slice %363 {offsets = [0, 8], sizes = [2, 8], strides = [1, 1]} : vector<2x32xf32> to vector<2x8xf32>
    %431 = vector.shape_cast %430 : vector<2x8xf32> to vector<2x1x8xf32>
    %432 = vector.broadcast %423 : vector<2x8x1xf32> to vector<2x8x8xf32>
    %433 = vector.broadcast %431 : vector<2x1x8xf32> to vector<2x8x8xf32>
    %434 = arith.mulf %432, %433 : vector<2x8x8xf32>
    %435 = arith.addf %429, %434 : vector<2x8x8xf32>
    %436 = vector.broadcast %427 : vector<2x8x1xf32> to vector<2x8x8xf32>
    %437 = arith.mulf %435, %436 : vector<2x8x8xf32>
    %438 = vector.extract_strided_slice %347 {offsets = [0, 0, 16], sizes = [2, 8, 8], strides = [1, 1, 1]} : vector<2x8x32xf32> to vector<2x8x8xf32>
    %439 = vector.extract_strided_slice %352 {offsets = [0, 0, 16], sizes = [2, 8, 8], strides = [1, 1, 1]} : vector<2x8x32xf32> to vector<2x8x8xf32>
    "tpu.trace_start"() <{level = 10 : i32, message = "bqd,bkd->bqk"}> : () -> ()
    %cst_139 = arith.constant dense<0.000000e+00> : vector<2x8x8xf32>
    %440 = tpu.matmul %438, %439, %cst_139 {dimension_numbers = #tpu.dot_dimension_numbers<[2], [2], [1], [1], [0, 0, 0, 1, 1, 1], [0], [0]>} : vector<2x8x8xf32>, vector<2x8x8xf32>, vector<2x8x8xf32> -> vector<2x8x8xf32>
    "tpu.trace_stop"() : () -> ()
    %cst_140 = arith.constant 0.353553385 : f32
    %441 = vector.broadcast %cst_140 : f32 to vector<2x8x8xf32>
    %442 = arith.mulf %440, %441 : vector<2x8x8xf32>
    %443 = vector.broadcast %2 : vector<2x1x8xf32> to vector<2x8x8xf32>
    %444 = arith.addf %442, %443 : vector<2x8x8xf32>
    %445 = vector.extract_strided_slice %360 {offsets = [0, 16], sizes = [2, 8], strides = [1, 1]} : vector<2x32xf32> to vector<2x8xf32>
    %446 = vector.shape_cast %445 : vector<2x8xf32> to vector<2x1x8xf32>
    %447 = vector.broadcast %446 : vector<2x1x8xf32> to vector<2x8x8xf32>
    %448 = arith.mulf %438, %447 : vector<2x8x8xf32>
    %cst_141 = arith.constant dense<0.000000e+00> : vector<2x8xf32>
    %449 = vector.multi_reduction <add>, %448, %cst_141 [2] : vector<2x8x8xf32> to vector<2x8xf32>
    %450 = vector.shape_cast %449 : vector<2x8xf32> to vector<2x8x1xf32>
    %cst_142 = arith.constant 0.353553385 : f32
    %451 = vector.broadcast %cst_142 : f32 to vector<2x8x1xf32>
    %452 = arith.mulf %450, %451 : vector<2x8x1xf32>
    %cst_143 = arith.constant dense<0xFF800000> : vector<2x8xf32>
    %453 = vector.multi_reduction <maximumf>, %444, %cst_143 [2] : vector<2x8x8xf32> to vector<2x8xf32>
    %454 = vector.shape_cast %453 : vector<2x8xf32> to vector<2x8x1xf32>
    %455 = arith.maximumf %454, %452 : vector<2x8x1xf32>
    %456 = vector.broadcast %455 : vector<2x8x1xf32> to vector<2x8x8xf32>
    %457 = arith.subf %444, %456 : vector<2x8x8xf32>
    %458 = math.exp %457 : vector<2x8x8xf32>
    %459 = arith.subf %452, %455 : vector<2x8x1xf32>
    %460 = math.exp %459 : vector<2x8x1xf32>
    %cst_144 = arith.constant dense<0.000000e+00> : vector<2x8xf32>
    %461 = vector.multi_reduction <add>, %458, %cst_144 [2] : vector<2x8x8xf32> to vector<2x8xf32>
    %462 = vector.shape_cast %461 : vector<2x8xf32> to vector<2x8x1xf32>
    %463 = arith.addf %462, %460 : vector<2x8x1xf32>
    %464 = tpu.reciprocal %463 {approx = true} : vector<2x8x1xf32> -> vector<2x8x1xf32>
    %465 = vector.extract_strided_slice %357 {offsets = [0, 0, 16], sizes = [2, 8, 8], strides = [1, 1, 1]} : vector<2x8x32xf32> to vector<2x8x8xf32>
    "tpu.trace_start"() <{level = 10 : i32, message = "bqk,bkd->bqd"}> : () -> ()
    %cst_145 = arith.constant dense<0.000000e+00> : vector<2x8x8xf32>
    %466 = tpu.matmul %458, %465, %cst_145 {dimension_numbers = #tpu.dot_dimension_numbers<[2], [1], [1], [2], [0, 0, 0, 1, 1, 2], [0], [0]>} : vector<2x8x8xf32>, vector<2x8x8xf32>, vector<2x8x8xf32> -> vector<2x8x8xf32>
    "tpu.trace_stop"() : () -> ()
    %467 = vector.extract_strided_slice %363 {offsets = [0, 16], sizes = [2, 8], strides = [1, 1]} : vector<2x32xf32> to vector<2x8xf32>
    %468 = vector.shape_cast %467 : vector<2x8xf32> to vector<2x1x8xf32>
    %469 = vector.broadcast %460 : vector<2x8x1xf32> to vector<2x8x8xf32>
    %470 = vector.broadcast %468 : vector<2x1x8xf32> to vector<2x8x8xf32>
    %471 = arith.mulf %469, %470 : vector<2x8x8xf32>
    %472 = arith.addf %466, %471 : vector<2x8x8xf32>
    %473 = vector.broadcast %464 : vector<2x8x1xf32> to vector<2x8x8xf32>
    %474 = arith.mulf %472, %473 : vector<2x8x8xf32>
    %475 = vector.extract_strided_slice %347 {offsets = [0, 0, 24], sizes = [2, 8, 8], strides = [1, 1, 1]} : vector<2x8x32xf32> to vector<2x8x8xf32>
    %476 = vector.extract_strided_slice %352 {offsets = [0, 0, 24], sizes = [2, 8, 8], strides = [1, 1, 1]} : vector<2x8x32xf32> to vector<2x8x8xf32>
    "tpu.trace_start"() <{level = 10 : i32, message = "bqd,bkd->bqk"}> : () -> ()
    %cst_146 = arith.constant dense<0.000000e+00> : vector<2x8x8xf32>
    %477 = tpu.matmul %475, %476, %cst_146 {dimension_numbers = #tpu.dot_dimension_numbers<[2], [2], [1], [1], [0, 0, 0, 1, 1, 1], [0], [0]>} : vector<2x8x8xf32>, vector<2x8x8xf32>, vector<2x8x8xf32> -> vector<2x8x8xf32>
    "tpu.trace_stop"() : () -> ()
    %cst_147 = arith.constant 0.353553385 : f32
    %478 = vector.broadcast %cst_147 : f32 to vector<2x8x8xf32>
    %479 = arith.mulf %477, %478 : vector<2x8x8xf32>
    %480 = vector.broadcast %2 : vector<2x1x8xf32> to vector<2x8x8xf32>
    %481 = arith.addf %479, %480 : vector<2x8x8xf32>
    %482 = vector.extract_strided_slice %360 {offsets = [0, 24], sizes = [2, 8], strides = [1, 1]} : vector<2x32xf32> to vector<2x8xf32>
    %483 = vector.shape_cast %482 : vector<2x8xf32> to vector<2x1x8xf32>
    %484 = vector.broadcast %483 : vector<2x1x8xf32> to vector<2x8x8xf32>
    %485 = arith.mulf %475, %484 : vector<2x8x8xf32>
    %cst_148 = arith.constant dense<0.000000e+00> : vector<2x8xf32>
    %486 = vector.multi_reduction <add>, %485, %cst_148 [2] : vector<2x8x8xf32> to vector<2x8xf32>
    %487 = vector.shape_cast %486 : vector<2x8xf32> to vector<2x8x1xf32>
    %cst_149 = arith.constant 0.353553385 : f32
    %488 = vector.broadcast %cst_149 : f32 to vector<2x8x1xf32>
    %489 = arith.mulf %487, %488 : vector<2x8x1xf32>
    %cst_150 = arith.constant dense<0xFF800000> : vector<2x8xf32>
    %490 = vector.multi_reduction <maximumf>, %481, %cst_150 [2] : vector<2x8x8xf32> to vector<2x8xf32>
    %491 = vector.shape_cast %490 : vector<2x8xf32> to vector<2x8x1xf32>
    %492 = arith.maximumf %491, %489 : vector<2x8x1xf32>
    %493 = vector.broadcast %492 : vector<2x8x1xf32> to vector<2x8x8xf32>
    %494 = arith.subf %481, %493 : vector<2x8x8xf32>
    %495 = math.exp %494 : vector<2x8x8xf32>
    %496 = arith.subf %489, %492 : vector<2x8x1xf32>
    %497 = math.exp %496 : vector<2x8x1xf32>
    %cst_151 = arith.constant dense<0.000000e+00> : vector<2x8xf32>
    %498 = vector.multi_reduction <add>, %495, %cst_151 [2] : vector<2x8x8xf32> to vector<2x8xf32>
    %499 = vector.shape_cast %498 : vector<2x8xf32> to vector<2x8x1xf32>
    %500 = arith.addf %499, %497 : vector<2x8x1xf32>
    %501 = tpu.reciprocal %500 {approx = true} : vector<2x8x1xf32> -> vector<2x8x1xf32>
    %502 = vector.extract_strided_slice %357 {offsets = [0, 0, 24], sizes = [2, 8, 8], strides = [1, 1, 1]} : vector<2x8x32xf32> to vector<2x8x8xf32>
    "tpu.trace_start"() <{level = 10 : i32, message = "bqk,bkd->bqd"}> : () -> ()
    %cst_152 = arith.constant dense<0.000000e+00> : vector<2x8x8xf32>
    %503 = tpu.matmul %495, %502, %cst_152 {dimension_numbers = #tpu.dot_dimension_numbers<[2], [1], [1], [2], [0, 0, 0, 1, 1, 2], [0], [0]>} : vector<2x8x8xf32>, vector<2x8x8xf32>, vector<2x8x8xf32> -> vector<2x8x8xf32>
    "tpu.trace_stop"() : () -> ()
    %504 = vector.extract_strided_slice %363 {offsets = [0, 24], sizes = [2, 8], strides = [1, 1]} : vector<2x32xf32> to vector<2x8xf32>
    %505 = vector.shape_cast %504 : vector<2x8xf32> to vector<2x1x8xf32>
    %506 = vector.broadcast %497 : vector<2x8x1xf32> to vector<2x8x8xf32>
    %507 = vector.broadcast %505 : vector<2x1x8xf32> to vector<2x8x8xf32>
    %508 = arith.mulf %506, %507 : vector<2x8x8xf32>
    %509 = arith.addf %503, %508 : vector<2x8x8xf32>
    %510 = vector.broadcast %501 : vector<2x8x1xf32> to vector<2x8x8xf32>
    %511 = arith.mulf %509, %510 : vector<2x8x8xf32>
    %512 = tpu.concatenate %400, %437, %474, %511 in 2 : vector<2x8x8xf32>, vector<2x8x8xf32>, vector<2x8x8xf32>, vector<2x8x8xf32> -> vector<2x8x32xf32>
    %513 = vector.shape_cast %512 : vector<2x8x32xf32> to vector<16x32xf32>
    %cst_153 = arith.constant dense<0.000000e+00> : vector<16x32xf32>
    %514 = tpu.matmul %513, %338, %cst_153 {dimension_numbers = #tpu.dot_dimension_numbers<[1], [0], [0], [1], [0, 0, 1, 1], [], []>} : vector<16x32xf32>, vector<32x32xf32>, vector<16x32xf32> -> vector<16x32xf32>
    %515 = vector.broadcast %342 : vector<1x32xf32> to vector<16x32xf32>
    %516 = arith.addf %514, %515 : vector<16x32xf32>
    %517 = vector.extract_strided_slice %0 {offsets = [20, 0], sizes = [1, 32], strides = [1, 1]} : vector<29x128xf32> to vector<1x32xf32>
    %518 = vector.extract_strided_slice %0 {offsets = [21, 0], sizes = [1, 32], strides = [1, 1]} : vector<29x128xf32> to vector<1x32xf32>
    %519 = arith.addf %329, %516 : vector<16x32xf32>
    %cst_154 = arith.constant dense<0.000000e+00> : vector<16xf32>
    %520 = vector.multi_reduction <add>, %519, %cst_154 [1] : vector<16x32xf32> to vector<16xf32>
    %521 = vector.shape_cast %520 : vector<16xf32> to vector<16x1xf32>
    %cst_155 = arith.constant 3.200000e+01 : f32
    %522 = vector.broadcast %cst_155 : f32 to vector<16x1xf32>
    %523 = arith.divf %521, %522 : vector<16x1xf32>
    %524 = vector.broadcast %523 : vector<16x1xf32> to vector<16x32xf32>
    %525 = arith.subf %519, %524 : vector<16x32xf32>
    %526 = arith.mulf %525, %525 : vector<16x32xf32>
    %cst_156 = arith.constant dense<0.000000e+00> : vector<16xf32>
    %527 = vector.multi_reduction <add>, %526, %cst_156 [1] : vector<16x32xf32> to vector<16xf32>
    %528 = vector.shape_cast %527 : vector<16xf32> to vector<16x1xf32>
    %cst_157 = arith.constant 3.200000e+01 : f32
    %529 = vector.broadcast %cst_157 : f32 to vector<16x1xf32>
    %530 = arith.divf %528, %529 : vector<16x1xf32>
    %531 = vector.broadcast %523 : vector<16x1xf32> to vector<16x32xf32>
    %532 = arith.subf %519, %531 : vector<16x32xf32>
    %cst_158 = arith.constant 9.99999974E-6 : f32
    %533 = vector.broadcast %cst_158 : f32 to vector<16x1xf32>
    %534 = arith.addf %530, %533 : vector<16x1xf32>
    %535 = math.rsqrt %534 : vector<16x1xf32>
    %536 = vector.broadcast %535 : vector<16x1xf32> to vector<16x32xf32>
    %537 = arith.mulf %532, %536 : vector<16x32xf32>
    %538 = vector.broadcast %517 : vector<1x32xf32> to vector<16x32xf32>
    %539 = arith.mulf %537, %538 : vector<16x32xf32>
    %540 = vector.broadcast %518 : vector<1x32xf32> to vector<16x32xf32>
    %541 = arith.addf %539, %540 : vector<16x32xf32>
    %c1_159 = arith.constant 1 : index
    %c0_160 = arith.constant 0 : index
    %c0_161 = arith.constant 0 : index
    %542 = vector.load %arg7[%c1_159, %c0_160, %c0_161] : memref<2x32x64xf32, #tpu.memory_space<vmem>>, vector<1x32x64xf32>
    %543 = vector.shape_cast %542 : vector<1x32x64xf32> to vector<32x64xf32>
    %544 = vector.extract_strided_slice %0 {offsets = [27, 0], sizes = [1, 64], strides = [1, 1]} : vector<29x128xf32> to vector<1x64xf32>
    %c1_162 = arith.constant 1 : index
    %c0_163 = arith.constant 0 : index
    %c0_164 = arith.constant 0 : index
    %545 = vector.load %arg8[%c1_162, %c0_163, %c0_164] : memref<2x64x32xf32, #tpu.memory_space<vmem>>, vector<1x64x32xf32>
    %546 = vector.shape_cast %545 : vector<1x64x32xf32> to vector<64x32xf32>
    %547 = vector.extract_strided_slice %0 {offsets = [13, 0], sizes = [1, 32], strides = [1, 1]} : vector<29x128xf32> to vector<1x32xf32>
    %cst_165 = arith.constant dense<0.000000e+00> : vector<16x64xf32>
    %548 = tpu.matmul %541, %543, %cst_165 {dimension_numbers = #tpu.dot_dimension_numbers<[1], [0], [0], [1], [0, 0, 1, 1], [], []>} : vector<16x32xf32>, vector<32x64xf32>, vector<16x64xf32> -> vector<16x64xf32>
    %549 = vector.broadcast %544 : vector<1x64xf32> to vector<16x64xf32>
    %550 = arith.addf %548, %549 : vector<16x64xf32>
    %cst_166 = arith.constant 0.000000e+00 : f32
    %551 = vector.broadcast %cst_166 : f32 to vector<16x64xf32>
    %552 = arith.maximumf %550, %551 : vector<16x64xf32>
    %cst_167 = arith.constant dense<0.000000e+00> : vector<16x32xf32>
    %553 = tpu.matmul %552, %546, %cst_167 {dimension_numbers = #tpu.dot_dimension_numbers<[1], [0], [0], [1], [0, 0, 1, 1], [], []>} : vector<16x64xf32>, vector<64x32xf32>, vector<16x32xf32> -> vector<16x32xf32>
    %554 = vector.broadcast %547 : vector<1x32xf32> to vector<16x32xf32>
    %555 = arith.addf %553, %554 : vector<16x32xf32>
    %556 = vector.extract_strided_slice %0 {offsets = [22, 0], sizes = [1, 32], strides = [1, 1]} : vector<29x128xf32> to vector<1x32xf32>
    %557 = vector.extract_strided_slice %0 {offsets = [23, 0], sizes = [1, 32], strides = [1, 1]} : vector<29x128xf32> to vector<1x32xf32>
    %558 = arith.addf %541, %555 : vector<16x32xf32>
    %cst_168 = arith.constant dense<0.000000e+00> : vector<16xf32>
    %559 = vector.multi_reduction <add>, %558, %cst_168 [1] : vector<16x32xf32> to vector<16xf32>
    %560 = vector.shape_cast %559 : vector<16xf32> to vector<16x1xf32>
    %cst_169 = arith.constant 3.200000e+01 : f32
    %561 = vector.broadcast %cst_169 : f32 to vector<16x1xf32>
    %562 = arith.divf %560, %561 : vector<16x1xf32>
    %563 = vector.broadcast %562 : vector<16x1xf32> to vector<16x32xf32>
    %564 = arith.subf %558, %563 : vector<16x32xf32>
    %565 = arith.mulf %564, %564 : vector<16x32xf32>
    %cst_170 = arith.constant dense<0.000000e+00> : vector<16xf32>
    %566 = vector.multi_reduction <add>, %565, %cst_170 [1] : vector<16x32xf32> to vector<16xf32>
    %567 = vector.shape_cast %566 : vector<16xf32> to vector<16x1xf32>
    %cst_171 = arith.constant 3.200000e+01 : f32
    %568 = vector.broadcast %cst_171 : f32 to vector<16x1xf32>
    %569 = arith.divf %567, %568 : vector<16x1xf32>
    %570 = vector.broadcast %562 : vector<16x1xf32> to vector<16x32xf32>
    %571 = arith.subf %558, %570 : vector<16x32xf32>
    %cst_172 = arith.constant 9.99999974E-6 : f32
    %572 = vector.broadcast %cst_172 : f32 to vector<16x1xf32>
    %573 = arith.addf %569, %572 : vector<16x1xf32>
    %574 = math.rsqrt %573 : vector<16x1xf32>
    %575 = vector.broadcast %574 : vector<16x1xf32> to vector<16x32xf32>
    %576 = arith.mulf %571, %575 : vector<16x32xf32>
    %577 = vector.broadcast %556 : vector<1x32xf32> to vector<16x32xf32>
    %578 = arith.mulf %576, %577 : vector<16x32xf32>
    %579 = vector.broadcast %557 : vector<1x32xf32> to vector<16x32xf32>
    %580 = arith.addf %578, %579 : vector<16x32xf32>
    %c0_173 = arith.constant 0 : index
    %c0_174 = arith.constant 0 : index
    %581 = vector.load %arg10[%c0_173, %c0_174] : memref<32x128xf32, #tpu.memory_space<vmem>>, vector<32x128xf32>
    %cst_175 = arith.constant dense<0.000000e+00> : vector<16x128xf32>
    %582 = tpu.matmul %580, %581, %cst_175 {dimension_numbers = #tpu.dot_dimension_numbers<[1], [0], [0], [1], [0, 0, 1, 1], [], []>} : vector<16x32xf32>, vector<32x128xf32>, vector<16x128xf32> -> vector<16x128xf32>
    %583 = vector.extract_strided_slice %0 {offsets = [28, 0], sizes = [1, 128], strides = [1, 1]} : vector<29x128xf32> to vector<1x128xf32>
    %584 = vector.broadcast %583 : vector<1x128xf32> to vector<16x128xf32>
    %585 = arith.addf %582, %584 : vector<16x128xf32>
    %586 = vector.shape_cast %585 : vector<16x128xf32> to vector<2x8x128xf32>
    %c0_176 = arith.constant 0 : index
    %c0_177 = arith.constant 0 : index
    %c0_178 = arith.constant 0 : index
    %587 = vector.load %arg11[%c0_176, %c0_177, %c0_178] : memref<2x8x128xf32, #tpu.memory_space<vmem>>, vector<2x8x128xf32>
    tpu.vector_store %arg11[%c0_176, %c0_177, %c0_178], %586 {strides = array<i32>} : memref<2x8x128xf32, #tpu.memory_space<vmem>>, vector<2x8x128xf32>,
    return
  }
  func.func @transform_0(%arg0: i32) -> (i32, i32, i32) {
    %c0_i32 = arith.constant 0 : i32
    %c0_i32_0 = arith.constant 0 : i32
    %c0_i32_1 = arith.constant 0 : i32
    return %arg0, %c0_i32, %c0_i32_0 : i32, i32, i32
  }
  func.func @transform_1(%arg0: i32) -> (i32, i32, i32) {
    %c0_i32 = arith.constant 0 : i32
    %c0_i32_0 = arith.constant 0 : i32
    %c0_i32_1 = arith.constant 0 : i32
    return %arg0, %c0_i32, %c0_i32_0 : i32, i32, i32
  }
  func.func @transform_2(%arg0: i32) -> (i32, i32, i32) {
    %c0_i32 = arith.constant 0 : i32
    %c0_i32_0 = arith.constant 0 : i32
    %c0_i32_1 = arith.constant 0 : i32
    return %arg0, %c0_i32, %c0_i32_0 : i32, i32, i32
  }
  func.func @transform_3(%arg0: i32) -> (i32, i32, i32) {
    %c0_i32 = arith.constant 0 : i32
    %c0_i32_0 = arith.constant 0 : i32
    %c0_i32_1 = arith.constant 0 : i32
    return %arg0, %c0_i32, %c0_i32_0 : i32, i32, i32
  }
  func.func @transform_4(%arg0: i32) -> (i32, i32) {
    %c0_i32 = arith.constant 0 : i32
    %c0_i32_0 = arith.constant 0 : i32
    return %arg0, %c0_i32 : i32, i32
  }
  func.func @transform_5(%arg0: i32) -> (i32, i32, i32) {
    %c0_i32 = arith.constant 0 : i32
    %c0_i32_0 = arith.constant 0 : i32
    %c0_i32_1 = arith.constant 0 : i32
    %c0_i32_2 = arith.constant 0 : i32
    return %c0_i32, %c0_i32_0, %c0_i32_1 : i32, i32, i32
  }
  func.func @transform_6(%arg0: i32) -> (i32, i32, i32) {
    %c0_i32 = arith.constant 0 : i32
    %c0_i32_0 = arith.constant 0 : i32
    %c0_i32_1 = arith.constant 0 : i32
    %c0_i32_2 = arith.constant 0 : i32
    return %c0_i32, %c0_i32_0, %c0_i32_1 : i32, i32, i32
  }
  func.func @transform_7(%arg0: i32) -> (i32, i32, i32) {
    %c0_i32 = arith.constant 0 : i32
    %c0_i32_0 = arith.constant 0 : i32
    %c0_i32_1 = arith.constant 0 : i32
    %c0_i32_2 = arith.constant 0 : i32
    return %c0_i32, %c0_i32_0, %c0_i32_1 : i32, i32, i32
  }
  func.func @transform_8(%arg0: i32) -> (i32, i32) {
    %c0_i32 = arith.constant 0 : i32
    %c0_i32_0 = arith.constant 0 : i32
    %c0_i32_1 = arith.constant 0 : i32
    return %c0_i32, %c0_i32_0 : i32, i32
  }
  func.func @transform_9(%arg0: i32) -> (i32, i32) {
    %c0_i32 = arith.constant 0 : i32
    %c0_i32_0 = arith.constant 0 : i32
    %c0_i32_1 = arith.constant 0 : i32
    return %c0_i32, %c0_i32_0 : i32, i32
  }
  func.func @transform_10(%arg0: i32) -> (i32, i32, i32) {
    %c0_i32 = arith.constant 0 : i32
    %c0_i32_0 = arith.constant 0 : i32
    %c0_i32_1 = arith.constant 0 : i32
    return %arg0, %c0_i32, %c0_i32_0 : i32, i32, i32
  }
}

</mosaic_0001>

<bundles_post_ra>
// kernel: cfom_dock_forward.1
= control target key start
LH: loop header
LB: loop body
LE: loop exit
PB: predicated region body
PF: predicated region fallthrough
CT: control target
= control target key end

     0   :  { %15 = vsyncpa [#allocation3], 0  ;;  %s4043_s0 = inlined_call_operand.vmem [shape: f32[2,8,32], index: 0, kind: input, shape index: {}]   ;;  %s4044_s1 = inlined_call_operand.vmem [shape: f32[2,1,8], index: 1, kind: input, shape index: {}]   ;;  %s4045_s2 = inlined_call_operand.vmem [shape: f32[2,8,32], index: 2, kind: input, shape index: {}]   ;;  %s4046_s3 = inlined_call_operand.vmem [shape: f32[2,1,8], index: 3, kind: input, shape index: {}]   ;;  %s4047_s4 = inlined_call_operand.vmem [shape: f32[2,32], index: 4, kind: input, shape index: {}]   ;;  %s4048_s5 = inlined_call_operand.hbm [shape: f32[14,32,32], index: 5, kind: input, shape index: {}]   ;;  %s4049_s6 = inlined_call_operand.vmem [shape: f32[2,32,64], index: 6, kind: input, shape index: {}]   ;;  %s4050_s7 = inlined_call_operand.vmem [shape: f32[2,64,32], index: 7, kind: input, shape index: {}]   ;;  %s4051_s8 = inlined_call_operand.vmem [shape: f32[29,128], index: 8, kind: input, shape index: {}]   ;;  %s4052_s9 = inlined_call_operand.vmem [shape: f32[32,128], index: 9, kind: input, shape index: {}]   ;;  %s4053_s10 = inlined_call_operand.hbm [shape: f32[2,8,128], index: 10, kind: output, shape index: {}]  }
   0x1   :  { %16 = vsyncpa [#allocation4], 0  ;;  %s31_s15 = sshll.u32 %s4048_s5, 4  ;;  %s3223_s16 = smov [#allocation2]   ;;  %s32_s15 = int_to_ptr.hbm [resolvable:$true] %s31_s15 }
   0x2   :  { %s33_s17 = sshll.u32 %s3223_s16, 4  ;;  %s3224_s18 = smov 128   ;;  %s34_s17 = int_to_ptr.vmem [resolvable:$true] %s33_s17 }
   0x3   :  { %s3225_s19 = smov 8  }
   0x4   :  { %39 = dma.hbm_to_vmem [thread:$0]  %s32_s15, 7168, %s34_s17, [#allocation3], %s3224_s18, %s3224_s18, %s3225_s19  }
   0x5   :  { %3219 = dma.done.wait [#allocation3], 7168  }
   0x6   :  { %3220 = vsyncadd [#allocation3], 4294960128  ;;  %v68_v0 = vld [vmem:[#allocation2 + $0x38] sm:$0xff]  ;;  %v67_v1 = vld [vmem:[#allocation2 + $0x30] sm:$0xff]  ;;  %vm80_vm0 = vcmask 261120   ;;  %vm158_vm1 = vcmask 64512  }
   0x7   :  { %v63_v2 = vld [vmem:[#allocation2 + $0x18] sm:$0xff]  ;;  %123 = vmatpush.msra.mxu1 %v68_v0  ;;  %v62_v3 = vld [vmem:[#allocation2 + $0x10] sm:$0xff]  ;;  %v66_v4 = vld [vmem:[#allocation2 + $0x28] sm:$0xff]  ;;  %s3226_s24 = smov 112   ;;  %s3227_s25 = smov 120   ;;  %vm719_vm2 = vcmask 130048  }
   0x8   :  { %99 = vmatpush.msra.mxu0 %v63_v2  ;;  %2987 = vmatpush.msra.mxu2 %v63_v2  ;;  %v61_v5 = vld [vmem:[#allocation2 + $0x8] sm:$0xff]  ;;  %v65_v6 = vld [vmem:[#allocation2 + $0x20] sm:$0xff]  ;;  %v73_v10 = vld [vmem:[#allocation2 + $0x58] sm:$0xff]  ;;  %s3228_s26 = smov 104   ;;  %s3229_s11 = smov 16   ;;  %vm722_vm3 = vcmask 195584  }
   0x9   :  { %124 = vmatpush.msra.mxu1 %v67_v1  ;;  %v60_v7 = vld [vmem:[#allocation2] sm:$0xff]  ;;  %v3303_v9 = vld [vmem:[%s4043_s0 + $0x8] sm:$0xff]  ;;  %v72_v11 = vld [vmem:[#allocation2 + $0x50] sm:$0xff]  ;;  %s3230_s12 = smov 24   ;;  %vm859_vm11 = vcmask 523264   ;;  %s2852_s16 = sshll.u32 %s4053_s10, 4  ;;  %s2853_s16 = int_to_ptr.hbm [resolvable:$true] %s2852_s16 }
   0xa   :  { %100 = vmatpush.msra.mxu0 %v62_v3  ;;  %2988 = vmatpush.msra.mxu2 %v62_v3  ;;  %v3298_v8 = vld [vmem:[%s4043_s0] sm:$0xff]  ;;  %v71_v12 = vld [vmem:[#allocation2 + $0x48] sm:$0xff] }
   0xb   :  { %125 = vmatpush.msra.mxu1 %v66_v4  ;;  %v70_v13 = vld [vmem:[#allocation2 + $0x40] sm:$0xff] }
   0xc   :  { %101 = vmatpush.msra.mxu0 %v61_v5  ;;  %2989 = vmatpush.msra.mxu2 %v61_v5  ;;  %v3320_v14 = vld [vmem:[%s4051_s8] sm:$0xff] }
   0xd   :  { %126 = vmatpush.msra.mxu1 %v65_v6  ;;  %v110_v15 = vperm.slane %v3320_v14, 1  ;;  %v79_v16 = vperm.slane %v3320_v14, 0  ;;  %v134_v25 = vperm.slane %v3320_v14, 2  ;;  %v3027_v40 = vld [vmem:[%s4044_s1] ss:$0 sm:$0xff] }
   0xe   :  { %102 = vmatpush.msra.mxu0 %v60_v7  ;;  %2867 = vmatmul.msk.f32.vlgmr.msra.gmra.mxu1 %vm80_vm0, %v3298_v8  ;;  %v3028_v48 = vld [vmem:[%s4044_s1 + $0x1] ss:$0 sm:$0xff] }
   0xf   :  { %2865 = vmatmul.msk.f32.vlgmr.msra.gmra.mxu0 %vm80_vm0, %v3298_v8  ;;  %2990 = vmatpush.msra.mxu2 %v60_v7 }
  0x10   :  { %2866 = vmatmul.msk.f32.vlgmr.msra.gmra.mxu2 %vm80_vm0, %v3303_v9 }
  0x11   :  { %147 = vmatpush.msrb.mxu2 %v73_v10 }
  0x13   :  { %148 = vmatpush.msrb.mxu2 %v72_v11 }
  0x15   :  { %149 = vmatpush.msrb.mxu2 %v71_v12 }
  0x16   :  { %2868 = vmatmul.msk.f32.gmra.mxu1 %vm80_vm0, %v3303_v9 }
  0x17   :  { %150 = vmatpush.msrb.mxu2 %v70_v13 }
  0x18   :  { %2869 = vmatmul.msk.f32.vlgmr.msrb.gmra.mxu2 %vm80_vm0, %v3298_v8 }
  0x20   :  { %2870 = vmatmul.msk.f32.gmra.mxu2 %vm80_vm0, %v3303_v9 }
  0x8b   :  { %v128_v17 = vpop.f32.mrf.mxu1 }
  0x8c   :  { %v104_v18 = vpop.f32.mrf.mxu0  ;;  %v129_v19 = vadd.f32 %v128_v17, %v110_v15 }
  0x8d   :  { %v105_v20 = vadd.f32 %v104_v18, %v79_v16 }
  0x8e   :  { %427 = vrot.lane.b32.xlu1 %v129_v19, %s3226_s24  ;;  %291 = vrot.lane.b32.xlu0 %v129_v19, %s3227_s25 }
  0x8f   :  { %2871 = vmatpush.xpose.msk.msra.mxu3 %vm158_vm1, %v129_v19  ;;  %425 = vrot.lane.b32.xlu2 %v105_v20, %s3226_s24 }
  0x92   :  { %2872 = vmatmul.msk.f32.vlgmr.msra.gmra.mxu3 %vm158_vm1, %v105_v20 }
  0x93   :  { %v131_v21 = vpop.f32.mrf.mxu1  ;;  %v107_v22 = vpop.f32.mrf.mxu2 }
  0x94   :  { %v132_v23 = vadd.f32 %v131_v21, %v110_v15  ;;  %v108_v24 = vadd.f32 %v107_v22, %v79_v16 }
  0x96   :  { %319 = vrot.lane.b32.xlu1 %v132_v23, %s3227_s25  ;;  %2873 = vmatpush.xpose.msk.msrb.mxu3 %vm158_vm1, %v132_v23 }
  0x97   :  { %289 = vrot.lane.b32.xlu0 %v105_v20, %s3227_s25  ;;  %317 = vrot.lane.b32.xlu2 %v108_v24, %s3227_s25 }
  0x9a   :  { %2874 = vmatmul.msk.f32.vlgmr.msrb.gmra.mxu3 %vm158_vm1, %v108_v24 }
  0x9b   :  { %v152_v26 = vpop.f32.mrf.mxu2 }
  0x9c   :  { %v3335_v27 = vadd.f32 %v152_v26, %v134_v25 }
  0x9e   :  { %561 = vrot.lane.b32.xlu1 %v129_v19, %s3228_s26  ;;  %259 = vmatpush.msra.mxu3 %v3335_v27 }
  0x9f   :  { %455 = vrot.lane.b32.xlu0 %v132_v23, %s3226_s24  ;;  %453 = vrot.lane.b32.xlu2 %v108_v24, %s3226_s24 }
  0xa3   :  { %v155_v28 = vpop.f32.mrf.mxu2 }
  0xa4   :  { %v3341_v29 = vadd.f32 %v155_v28, %v134_v25 }
  0xa6   :  { %589 = vrot.lane.b32.xlu1 %v132_v23, %s3228_s26  ;;  %282 = vmatpush.msrb.mxu0 %v3341_v29  ;;  %v3002_v30 = vpack.i.bf16 %v3341_v29, %v3335_v27 }
  0xa7   :  { %559 = vrot.lane.b32.xlu0 %v105_v20, %s3228_s26  ;;  %587 = vrot.lane.b32.xlu2 %v108_v24, %s3228_s26 }
  0xaf   :  { %3003 = vrot.lane.b32.xlu0 %v3002_v30, %s3227_s25 }
  0xe9   :  { %v426_v31 = vpop.permute.xlu2 %425 }
  0xf1   :  { %v318_v34 = vpop.permute.xlu2 %317 }
  0xf9   :  { %v454_v39 = vpop.permute.xlu2 %453 }
 0x100   :  { %v428_v32 = vpop.permute.xlu1 %427  ;;  %v292_v33 = vpop.permute.xlu0 %291 }
 0x101   :  { %2877 = vmatpush.xpose.msk.msrb.mxu1 %vm158_vm1, %v292_v33  ;;  %v588_v47 = vpop.permute.xlu2 %587 }
 0x105   :  { %2883 = vmatpush.xpose.msk.msra.mxu1 %vm158_vm1, %v428_v32 }
 0x108   :  { %v320_v35 = vpop.permute.xlu1 %319 }
 0x109   :  { %v290_v36 = vpop.permute.xlu0 %289  ;;  %2879 = vmatpush.xpose.msk.msra.mxu2 %vm158_vm1, %v320_v35 }
 0x10a   :  { %2878 = vmatmul.msk.f32.vlgmr.msrb.gmra.mxu1 %vm158_vm1, %v290_v36 }
 0x10c   :  { %2880 = vmatmul.msk.f32.vlgmr.msra.gmra.mxu2 %vm158_vm1, %v318_v34 }
 0x110   :  { %v562_v37 = vpop.permute.xlu1 %561 }
 0x111   :  { %v456_v38 = vpop.permute.xlu0 %455  ;;  %2889 = vmatpush.xpose.msk.msrb.mxu1 %vm158_vm1, %v562_v37 }
 0x112   :  { %2884 = vmatmul.msk.f32.vlgmr.msra.gmra.mxu1 %vm158_vm1, %v426_v31  ;;  %2885 = vmatpush.xpose.msk.msrb.mxu2 %vm158_vm1, %v456_v38 }
 0x115   :  { %v182_v41 = vpop.f32.mrf.mxu3  ;;  %2886 = vmatmul.msk.f32.vlgmr.msrb.gmra.mxu2 %vm158_vm1, %v454_v39 }
 0x116   :  { %v211_v42 = vmul.f32 0.35355338, %v182_v41 }
 0x118   :  { %v590_v43 = vpop.permute.xlu1 %589  ;;  %v219_v44 = vadd.f32 %v3027_v40, %v211_v42 }
 0x119   :  { %v560_v45 = vpop.permute.xlu0 %559  ;;  %2891 = vmatpush.xpose.msk.msra.mxu2 %vm158_vm1, %v590_v43 }
 0x11a   :  { %2890 = vmatmul.msk.f32.vlgmr.msrb.gmra.mxu1 %vm158_vm1, %v560_v45  ;;  %v221_v46 = vsel %vm158_vm1, %v219_v44, -inf }
 0x11b   :  { %222 = vmax.xlane.f32.xlu0 %v221_v46 }
 0x11d   :  { %v208_v49 = vpop.f32.mrf.mxu3  ;;  %2892 = vmatmul.msk.f32.vlgmr.msra.gmra.mxu2 %vm158_vm1, %v588_v47 }
 0x11e   :  { %v212_v50 = vmul.f32 0.35355338, %v208_v49 }
 0x120   :  { %v220_v51 = vadd.f32 %v3028_v48, %v212_v50 }
 0x121   :  { %v3004_v52 = vpop.permute.xlu0 %3003 }
 0x122   :  { %v224_v53 = vsel %vm158_vm1, %v220_v51, -inf  ;;  %v3006_v54 = vunpack.i.h.bf16 %v3004_v52  ;;  %v3005_v55 = vunpack.i.l.bf16 %v3004_v52 }
 0x123   :  { %225 = vmax.xlane.f32.xlu2 %v224_v53 }
 0x124   :  { %391 = vmatpush.msrb.mxu3 %v3005_v55  ;;  %418 = vmatpush.msra.mxu0 %v3006_v54 }
 0x12f   :  { %639 = vrot.lane.b32.xlu0 %v3335_v27, %s3228_s26 }
 0x137   :  { %531 = vrot.lane.b32.xlu0 %v3341_v29, %s3226_s24 }
 0x187   :  { %v314_v56 = vpop.f32.mrf.mxu1 }
 0x188   :  { %v345_v57 = vmul.f32 0.35355338, %v314_v56 }
 0x18a   :  { %v347_v58 = vadd.f32 %v3027_v40, %v345_v57 }
 0x18c   :  { %v349_v59 = vsel %vm158_vm1, %v347_v58, -inf }
 0x18d   :  { %350 = vmax.xlane.f32.xlu1 %v349_v59 }
 0x18e   :  { %v223_v60 = vpop.xlane.xlu0 %222 }
 0x18f   :  { %v227_v61 = vsub.f32 %v219_v44, %v223_v60  ;;  %v450_v62 = vpop.f32.mrf.mxu1  ;;  %v342_v63 = vpop.f32.mrf.mxu2 }
 0x190   :  { %v481_v0 = vmul.f32 0.35355338, %v450_v62  ;;  %v346_v1 = vmul.f32 0.35355338, %v342_v63 }
 0x191   :  { %v229_v2 = vmul.f32 1.442695, %v227_v61 }
 0x192   :  { %v483_v3 = vadd.f32 %v3027_v40, %v481_v0  ;;  %v348_v4 = vadd.f32 %v3028_v48, %v346_v1 }
 0x193   :  { %3031 = vpow2.f32 %v229_v2 }
 0x194   :  { %v485_v5 = vsel %vm158_vm1, %v483_v3, -inf  ;;  %v352_v6 = vsel %vm158_vm1, %v348_v4, -inf }
 0x195   :  { %486 = vmax.xlane.f32.xlu2 %v485_v5  ;;  %353 = vmax.xlane.f32.xlu1 %v352_v6 }
 0x196   :  { %v226_v7 = vpop.xlane.xlu2 %225 }
 0x197   :  { %v228_v10 = vsub.f32 %v220_v51, %v226_v7  ;;  %v584_v11 = vpop.f32.mrf.mxu1 }
 0x198   :  { %v615_v12 = vmul.f32 0.35355338, %v584_v11  ;;  %v478_v13 = vpop.f32.mrf.mxu2 }
 0x199   :  { %v3032_v15 = vpop.eup %3031  ;;  %v231_v16 = vmul.f32 1.442695, %v228_v10  ;;  %v482_v18 = vmul.f32 0.35355338, %v478_v13 }
 0x19a   :  { %2875 = vmatmul.msk.f32.vlgmr.msra.gmra.mxu3 %vm158_vm1, %v3032_v15  ;;  %v617_v17 = vadd.f32 %v3027_v40, %v615_v12  ;;  %v233_v51 = vsel %vm158_vm1, %v3032_v15, 0.0 }
 0x19b   :  { %3033 = vpow2.f32 %v231_v16  ;;  %v484_v20 = vadd.f32 %v3028_v48, %v482_v18 }
 0x19c   :  { %v619_v19 = vsel %vm158_vm1, %v617_v17, -inf }
 0x19d   :  { %620 = vmax.xlane.f32.xlu2 %v619_v19  ;;  %v488_v24 = vsel %vm158_vm1, %v484_v20, -inf }
 0x1a0   :  { %v612_v22 = vpop.f32.mrf.mxu2 }
 0x1a1   :  { %v3034_v21 = vpop.eup %3033  ;;  %v616_v23 = vmul.f32 0.35355338, %v612_v22  ;;  %v640_v25 = vpop.permute.xlu0 %639 }
 0x1a2   :  { %2876 = vmatmul.msk.f32.vlgmr.msrb.gmra.mxu0 %vm158_vm1, %v3034_v21  ;;  %v236_v53 = vsel %vm158_vm1, %v3034_v21, 0.0 }
 0x1a3   :  { %v618_v26 = vadd.f32 %v3028_v48, %v616_v23 }
 0x1a5   :  { %489 = vmax.xlane.f32.xlu2 %v488_v24  ;;  %v622_v28 = vsel %vm158_vm1, %v618_v26, -inf }
 0x1a9   :  { %v532_v30 = vpop.permute.xlu0 %531 }
 0x1aa   :  { %552 = vmatpush.msrb.mxu0 %v532_v30 }
 0x1ad   :  { %623 = vmax.xlane.f32.xlu2 %v622_v28 }
 0x1ae   :  { %505 = vrot.lane.b32.xlu1 %v3335_v27, %s3226_s24 }
 0x1c5   :  { %665 = vrot.lane.b32.xlu2 %v3341_v29, %s3228_s26 }
 0x200   :  { %v351_v31 = vpop.xlane.xlu1 %350 }
 0x201   :  { %v355_v32 = vsub.f32 %v347_v58, %v351_v31 }
 0x203   :  { %v357_v33 = vmul.f32 1.442695, %v355_v32 }
 0x205   :  { %3035 = vpow2.f32 %v357_v33 }
 0x208   :  { %v487_v34 = vpop.xlane.xlu2 %486  ;;  %v354_v35 = vpop.xlane.xlu1 %353 }
 0x209   :  { %v491_v36 = vsub.f32 %v483_v3, %v487_v34  ;;  %v356_v37 = vsub.f32 %v348_v4, %v354_v35 }
 0x20b   :  { %v3036_v38 = vpop.eup %3035  ;;  %v493_v39 = vmul.f32 1.442695, %v491_v36  ;;  %v359_v40 = vmul.f32 1.442695, %v356_v37  ;;  %v78_v36 = vld [vmem:[#allocation2 + $0x78] sm:$0xff]  ;;  %v77_v37 = vld [vmem:[#allocation2 + $0x70] sm:$0xff] }
 0x20c   :  { %2881 = vmatmul.msk.f32.vlgmr.msrb.gmra.mxu3 %vm158_vm1, %v3036_v38  ;;  %v361_v41 = vsel %vm158_vm1, %v3036_v38, 0.0  ;;  %744 = vmatpush.msra.mxu1 %v78_v36  ;;  %v76_v38 = vld [vmem:[#allocation2 + $0x68] sm:$0xff] }
 0x20d   :  { %3037 = vpow2.f32 %v493_v39  ;;  %362 = vadd.xlane.f32.xlu1 %v361_v41  ;;  %v75_v39 = vld [vmem:[#allocation2 + $0x60] sm:$0xff]  ;;  %v3457_v36 = vld [vmem:[%s4045_s2 + $0x8] sm:$0xff] }
 0x20e   :  { %3039 = vpow2.f32 %v359_v40  ;;  %745 = vmatpush.msra.mxu1 %v77_v37 }
 0x210   :  { %v621_v27 = vpop.xlane.xlu2 %620  ;;  %746 = vmatpush.msra.mxu1 %v76_v38 }
 0x211   :  { %v625_v29 = vsub.f32 %v617_v17, %v621_v27 }
 0x212   :  { %747 = vmatpush.msra.mxu1 %v75_v39  ;;  %v3464_v39 = vld [vmem:[%s4051_s8 + $0x8] sm:$0xff] }
 0x213   :  { %v3038_v42 = vpop.eup %3037  ;;  %v627_v43 = vmul.f32 1.442695, %v625_v29 }
 0x214   :  { %v3040_v44 = vpop.eup %3039  ;;  %v497_v45 = vsel %vm158_vm1, %v3038_v42, 0.0 }
 0x215   :  { %3041 = vpow2.f32 %v627_v43  ;;  %2882 = vmatmul.msk.f32.vlgmr.msra.gmra.mxu0 %vm158_vm1, %v3040_v44  ;;  %498 = vadd.xlane.f32.xlu0 %v497_v45  ;;  %v364_v46 = vsel %vm158_vm1, %v3040_v44, 0.0 }
 0x216   :  { %365 = vadd.xlane.f32.xlu1 %v364_v46 }
 0x218   :  { %v490_v47 = vpop.xlane.xlu2 %489 }
 0x219   :  { %v492_v48 = vsub.f32 %v484_v20, %v490_v47 }
 0x21b   :  { %v3042_v49 = vpop.eup %3041  ;;  %v495_v50 = vmul.f32 1.442695, %v492_v48 }
 0x21c   :  { %v631_v52 = vsel %vm158_vm1, %v3042_v49, 0.0 }
 0x21d   :  { %3043 = vpow2.f32 %v495_v50  ;;  %234 = vadd.xlane.f32.xlu0 %v233_v51  ;;  %632 = vadd.xlane.f32.xlu2 %v631_v52  ;;  %v261_v0 = vpop.f32.mrf.mxu3  ;;  %v725_v50 = vperm.slane %v3320_v14, 3 }
 0x21e   :  { %237 = vadd.xlane.f32.xlu1 %v236_v53 }
 0x21f   :  { %v284_v3 = vpop.f32.mrf.mxu0 }
 0x220   :  { %v624_v54 = vpop.xlane.xlu2 %623  ;;  %v506_v55 = vpop.permute.xlu1 %505 }
 0x221   :  { %v626_v56 = vsub.f32 %v618_v26, %v624_v54  ;;  %526 = vmatpush.msra.mxu3 %v506_v55 }
 0x222   :  { %2887 = vmatmul.msk.f32.vlgmr.msra.gmra.mxu3 %vm158_vm1, %v3038_v42 }
 0x223   :  { %v3044_v57 = vpop.eup %3043  ;;  %v629_v58 = vmul.f32 1.442695, %v626_v56  ;;  %660 = vmatpush.msrb.mxu3 %v640_v25 }
 0x224   :  { %2888 = vmatmul.msk.f32.vlgmr.msrb.gmra.mxu0 %vm158_vm1, %v3044_v57  ;;  %v500_v59 = vsel %vm158_vm1, %v3044_v57, 0.0 }
 0x225   :  { %3045 = vpow2.f32 %v629_v58  ;;  %501 = vadd.xlane.f32.xlu0 %v500_v59  ;;  %v3231_v59 = vmov 32.0  }
 0x228   :  { %v666_v60 = vpop.permute.xlu2 %665 }
 0x229   :  { %686 = vmatpush.msra.mxu0 %v666_v60 }
 0x22a   :  { %2893 = vmatmul.msk.f32.vlgmr.msrb.gmra.mxu3 %vm158_vm1, %v3042_v49 }
 0x22b   :  { %v3046_v61 = vpop.eup %3045 }
 0x22c   :  { %2894 = vmatmul.msk.f32.vlgmr.msra.gmra.mxu0 %vm158_vm1, %v3046_v61  ;;  %v634_v62 = vsel %vm158_vm1, %v3046_v61, 0.0 }
 0x22d   :  { %635 = vadd.xlane.f32.xlu1 %v634_v62 }
 0x280   :  { %v363_v63 = vpop.xlane.xlu1 %362 }
 0x281   :  { %3047 = vrcp.f32 %v363_v63 }
 0x287   :  { %v3048_v4 = vpop.eup %3047 }
 0x288   :  { %v499_v1 = vpop.xlane.xlu0 %498 }
 0x289   :  { %v366_v2 = vpop.xlane.xlu1 %365 }
 0x28a   :  { %3049 = vrcp.f32 %v366_v2 }
 0x28f   :  { %v393_v5 = vpop.f32.mrf.mxu3 }
 0x290   :  { %v423_v6 = vmul.f32 %v3048_v4, %v393_v5  ;;  %v235_v7 = vpop.xlane.xlu0 %234  ;;  %v3050_v12 = vpop.eup %3049 }
 0x291   :  { %3051 = vrcp.f32 %v235_v7  ;;  %v238_v10 = vpop.xlane.xlu1 %237  ;;  %v633_v21 = vpop.xlane.xlu2 %632 }
 0x292   :  { %695 = vrot.lane.b32.xlu0 %v423_v6, %s3225_s19  ;;  %3053 = vrcp.f32 %v238_v10  ;;  %v420_v11 = vpop.f32.mrf.mxu0 }
 0x293   :  { %v424_v15 = vmul.f32 %v3050_v12, %v420_v11  ;;  %3055 = vrcp.f32 %v499_v1  ;;  %v817_v12 = vld [vmem:[%s4049_s6 + $0x18] sm:$0xff] }
 0x294   :  { %845 = vmatpush.msrb.mxu2 %v817_v12 }
 0x297   :  { %v3052_v13 = vpop.eup %3051 }
 0x298   :  { %v287_v16 = vmul.f32 %v3052_v13, %v261_v0  ;;  %v3054_v17 = vpop.eup %3053  ;;  %v502_v22 = vpop.xlane.xlu0 %501  ;;  %v1023_v13 = vld [vmem:[#allocation2 + $0x98] sm:$0xff] }
 0x299   :  { %v288_v18 = vmul.f32 %v3054_v17, %v284_v3  ;;  %v3056_v23 = vpop.eup %3055  ;;  %1058 = vmatpush.msrb.mxu1 %v1023_v13  ;;  %v815_v17 = vld [vmem:[%s4049_s6 + $0x8] sm:$0xff] }
 0x29a   :  { %697 = vrot.lane.b32.xlu0 %v424_v15, %s3225_s19  ;;  %v816_v15 = vld [vmem:[%s4049_s6 + $0x10] sm:$0xff] }
 0x29b   :  { %846 = vmatpush.msrb.mxu2 %v816_v15 }
 0x29d   :  { %847 = vmatpush.msrb.mxu2 %v815_v17 }
 0x2a0   :  { %v636_v19 = vpop.xlane.xlu1 %635 }
 0x2a1   :  { %v554_v20 = vpop.f32.mrf.mxu0  ;;  %3057 = vrcp.f32 %v636_v19  ;;  %v814_v19 = vld [vmem:[%s4049_s6] sm:$0xff] }
 0x2a2   :  { %3059 = vrcp.f32 %v633_v21  ;;  %848 = vmatpush.msrb.mxu2 %v814_v19  ;;  %v3448_v21 = vld [vmem:[%s4045_s2] sm:$0xff] }
 0x2a3   :  { %3061 = vrcp.f32 %v502_v22 }
 0x2a4   :  { %3063 = vrcp.f32 %v3231_v59 }
 0x2a5   :  { %v528_v24 = vpop.f32.mrf.mxu3 }
 0x2a6   :  { %v557_v25 = vmul.f32 %v3056_v23, %v528_v24 }
 0x2a7   :  { %v3058_v26 = vpop.eup %3057 }
 0x2a8   :  { %703 = vrot.lane.b32.xlu2 %v557_v25, %s3229_s11  ;;  %v3060_v31 = vpop.eup %3059  ;;  %v1028_v25 = vld [vmem:[#allocation2 + $0xb8] sm:$0xff] }
 0x2a9   :  { %v688_v28 = vpop.f32.mrf.mxu0  ;;  %v3062_v32 = vpop.eup %3061  ;;  %1082 = vmatpush.msra.mxu2 %v1028_v25 }
 0x2aa   :  { %v692_v30 = vmul.f32 %v3058_v26, %v688_v28  ;;  %v558_v34 = vmul.f32 %v3062_v32, %v554_v20  ;;  %v3064_v60 = vpop.eup %3063  ;;  %v1020_v20 = vld [vmem:[#allocation2 + $0x80] sm:$0xff]  ;;  %v1027_v26 = vld [vmem:[#allocation2 + $0xb0] sm:$0xff]  ;;  %v1026_v28 = vld [vmem:[#allocation2 + $0xa8] sm:$0xff] }
 0x2ab   :  { %v764_v61 = vmul.f32 32.0, %v3064_v60  ;;  %vm768_vm4 = vweird.f32 %v3064_v60  ;;  %1083 = vmatpush.msra.mxu2 %v1027_v26  ;;  %v1025_v32 = vld [vmem:[#allocation2 + $0xa0] sm:$0xff] }
 0x2ac   :  { %713 = vrot.lane.b32.xlu0 %v692_v30, %s3230_s12 }
 0x2ad   :  { %v662_v33 = vpop.f32.mrf.mxu3  ;;  %v765_v62 = vsub.f32 1.0, %v764_v61  ;;  %1084 = vmatpush.msra.mxu2 %v1026_v28 }
 0x2ae   :  { %v691_v35 = vmul.f32 %v3060_v31, %v662_v33 }
 0x2af   :  { %v766_v63 = vmul.f32 %v3064_v60, %v765_v62  ;;  %1085 = vmatpush.msra.mxu2 %v1025_v32 }
 0x2b0   :  { %705 = vrot.lane.b32.xlu2 %v558_v34, %s3229_s11  ;;  %711 = vrot.lane.b32.xlu1 %v691_v35, %s3230_s12 }
 0x2b1   :  { %v767_v0 = vadd.f32 %v3064_v60, %v766_v63 }
 0x2b3   :  { %v3419_v1 = vsel %vm768_vm4, %v3064_v60, %v767_v0  ;;  %v822_v0 = vld [vmem:[%s4050_s7 + $0x20] sm:$0xff] }
 0x302   :  { %v704_v41 = vpop.permute.xlu2 %703 }
 0x304   :  { %v696_v40 = vpop.permute.xlu0 %695 }
 0x305   :  { %v717_v27 = vsel %vm158_vm1, %v287_v16, %v696_v40  ;;  %v1022_v16 = vld [vmem:[#allocation2 + $0x90] sm:$0xff] }
 0x306   :  { %v720_v43 = vsel %vm719_vm2, %v717_v27, %v704_v41  ;;  %1059 = vmatpush.msrb.mxu1 %v1022_v16 }
 0x30a   :  { %v706_v47 = vpop.permute.xlu2 %705 }
 0x30c   :  { %v698_v29 = vpop.permute.xlu0 %697 }
 0x30d   :  { %v718_v45 = vsel %vm158_vm1, %v288_v18, %v698_v29  ;;  %v1021_v18 = vld [vmem:[#allocation2 + $0x88] sm:$0xff] }
 0x30e   :  { %v721_v48 = vsel %vm719_vm2, %v718_v45, %v706_v47  ;;  %1060 = vmatpush.msrb.mxu1 %v1021_v18  ;;  %v976_v18 = vld [vmem:[#allocation2 + $0x1b8] sm:$0xff] }
 0x310   :  { %1061 = vmatpush.msrb.mxu1 %v1020_v20 }
 0x31e   :  { %v714_v46 = vpop.permute.xlu0 %713 }
 0x31f   :  { %v724_v49 = vsel %vm722_vm3, %v721_v48, %v714_v46  ;;  %v811_v48 = vperm.slane %v3464_v39, 7 }
 0x322   :  { %v712_v42 = vpop.permute.xlu1 %711 }
 0x323   :  { %v723_v44 = vsel %vm722_vm3, %v720_v43, %v712_v42  ;;  %v808_v42 = vperm.slane %v3464_v39, 6  ;;  %v946_v43 = vld [vmem:[#allocation2 + $0x198] sm:$0xff] }
 0x324   :  { %2895 = vmatmul.msk.f32.vlgmr.msra.gmra.mxu1 %vm80_vm0, %v723_v44  ;;  %v945_v44 = vld [vmem:[#allocation2 + $0x190] sm:$0xff]  ;;  %963 = vmatpush.msrb.mxu0 %v946_v43 }
 0x326   :  { %964 = vmatpush.msrb.mxu0 %v945_v44 }
 0x32c   :  { %2896 = vmatmul.msk.f32.gmra.mxu1 %vm80_vm0, %v724_v49  ;;  %v944_v49 = vld [vmem:[#allocation2 + $0x188] sm:$0xff] }
 0x32d   :  { %965 = vmatpush.msrb.mxu0 %v944_v49 }
 0x334   :  { %2903 = vmatmul.msk.f32.vlgmr.msrb.gmra.mxu1 %vm80_vm0, %v3448_v21 }
 0x33c   :  { %2904 = vmatmul.msk.f32.gmra.mxu1 %vm80_vm0, %v3457_v36 }
 0x3a1   :  { %v749_v51 = vpop.f32.mrf.mxu1 }
 0x3a2   :  { %v750_v52 = vadd.f32 %v749_v51, %v725_v50  ;;  %v824_v51 = vld [vmem:[%s4050_s7 + $0x30] sm:$0xff] }
 0x3a4   :  { %v755_v53 = vadd.f32 %v750_v52, %v3298_v8 }
 0x3a6   :  { %v757_v54 = vsel %vm80_vm0, %v755_v53, 0.0 }
 0x3a7   :  { %758 = vadd.xlane.f32.xlu1 %v757_v54  ;;  %v943_v54 = vld [vmem:[#allocation2 + $0x180] sm:$0xff] }
 0x3a8   :  { %966 = vmatpush.msrb.mxu0 %v943_v54 }
 0x3a9   :  { %v752_v55 = vpop.f32.mrf.mxu1 }
 0x3aa   :  { %v753_v56 = vadd.f32 %v752_v55, %v725_v50  ;;  %v825_v50 = vld [vmem:[%s4050_s7 + $0x38] sm:$0xff]  ;;  %v823_v55 = vld [vmem:[%s4050_s7 + $0x28] sm:$0xff]  ;;  %993 = vmatpush.msra.mxu0 %v976_v18 }
 0x3ab   :  { %874 = vmatpush.msra.mxu3 %v825_v50 }
 0x3ac   :  { %v756_v57 = vadd.f32 %v753_v56, %v3303_v9 }
 0x3ad   :  { %875 = vmatpush.msra.mxu3 %v824_v51 }
 0x3ae   :  { %v760_v58 = vsel %vm80_vm0, %v756_v57, 0.0 }
 0x3af   :  { %761 = vadd.xlane.f32.xlu2 %v760_v58  ;;  %876 = vmatpush.msra.mxu3 %v823_v55  ;;  %v3029_v55 = vld [vmem:[%s4046_s3] ss:$0 sm:$0xff] }
 0x3b1   :  { %877 = vmatpush.msra.mxu3 %v822_v0  ;;  %v1093_v0 = vperm.slane %v3320_v14, 6 }
 0x41a   :  { %v759_v8 = vpop.xlane.xlu1 %758 }
 0x41b   :  { %v770_v2 = vmul.f32 %v3419_v1, %v759_v8  ;;  %v821_v8 = vld [vmem:[%s4050_s7 + $0x18] sm:$0xff] }
 0x41c   :  { %878 = vmatpush.msra.mxu3 %v821_v8 }
 0x41d   :  { %v3422_v3 = vsub.f32 %v755_v53, %v770_v2  ;;  %v1039_v2 = vperm.slane %v3320_v14, 4 }
 0x41f   :  { %v774_v9 = vmul.f32 %v3422_v3, %v3422_v3 }
 0x421   :  { %v776_v4 = vsel %vm80_vm0, %v774_v9, 0.0 }
 0x422   :  { %777 = vadd.xlane.f32.xlu0 %v776_v4  ;;  %v762_v5 = vpop.xlane.xlu2 %761  ;;  %v820_v4 = vld [vmem:[%s4050_s7 + $0x10] sm:$0xff] }
 0x423   :  { %v771_v6 = vmul.f32 %v3419_v1, %v762_v5  ;;  %879 = vmatpush.msra.mxu3 %v820_v4  ;;  %v819_v5 = vld [vmem:[%s4050_s7 + $0x8] sm:$0xff] }
 0x425   :  { %v3428_v7 = vsub.f32 %v756_v57, %v771_v6  ;;  %v941_v57 = vld [vmem:[%s4047_s4] sm:$0x3]  ;;  %880 = vmatpush.msra.mxu3 %v819_v5 }
 0x426   :  { %2901 = vmatmul.msk.f32.vlgmr.msrb.gmra.mxu0 %vm80_vm0, %v941_v57  ;;  %v818_v6 = vld [vmem:[%s4050_s7] sm:$0xff] }
 0x427   :  { %v775_v10 = vmul.f32 %v3428_v7, %v3428_v7  ;;  %881 = vmatpush.msra.mxu3 %v818_v6 }
 0x429   :  { %v779_v11 = vsel %vm80_vm0, %v775_v10, 0.0 }
 0x42a   :  { %780 = vadd.xlane.f32.xlu1 %v779_v11 }
 0x495   :  { %v778_v22 = vpop.xlane.xlu0 %777 }
 0x496   :  { %v782_v23 = vmul.f32 %v778_v22, %v3419_v1  ;;  %v975_v22 = vld [vmem:[#allocation2 + $0x1b0] sm:$0xff] }
 0x497   :  { %994 = vmatpush.msra.mxu0 %v975_v22 }
 0x498   :  { %v784_v24 = vadd.f32 1e-05, %v782_v23  ;;  %v1069_v23 = vperm.slane %v3320_v14, 5 }
 0x49a   :  { %3065 = vrsqrt.f32 %v784_v24  ;;  %vm792_vm6 = vweird.f32 %v784_v24 }
 0x49d   :  { %v781_v30 = vpop.xlane.xlu1 %780 }
 0x49e   :  { %v783_v31 = vmul.f32 %v781_v30, %v3419_v1  ;;  %v974_v30 = vld [vmem:[#allocation2 + $0x1a8] sm:$0xff] }
 0x49f   :  { %995 = vmatpush.msra.mxu0 %v974_v30 }
 0x4a0   :  { %v3066_v33 = vpop.eup %3065  ;;  %v785_v34 = vadd.f32 1e-05, %v783_v31  ;;  %v973_v31 = vld [vmem:[#allocation2 + $0x1a0] sm:$0xff] }
 0x4a1   :  { %v787_v35 = vmul.f32 %v3066_v33, %v784_v24  ;;  %vm793_vm5 = vweird.f32 %v3066_v33  ;;  %996 = vmatpush.msra.mxu0 %v973_v31 }
 0x4a2   :  { %3067 = vrsqrt.f32 %v785_v34  ;;  %vm794_vm7 = vmor %vm792_vm6, %vm793_vm5  ;;  %vm802_vm9 = vweird.f32 %v785_v34 }
 0x4a3   :  { %v788_v37 = vmul.f32 %v3066_v33, %v787_v35  ;;  %v968_v20 = vpop.f32.mrf.mxu0 }
 0x4a5   :  { %v789_v38 = vmul.f32 0.5, %v788_v37 }
 0x4a7   :  { %v790_v40 = vsub.f32 1.5, %v789_v38 }
 0x4a8   :  { %v3068_v41 = vpop.eup %3067 }
 0x4a9   :  { %v791_v27 = vmul.f32 %v3066_v33, %v790_v40  ;;  %v797_v29 = vmul.f32 %v3068_v41, %v785_v34  ;;  %vm803_vm8 = vweird.f32 %v3068_v41  ;;  %v1032_v34 = vld [vmem:[#allocation2 + $0xd0] sm:$0xff]  ;;  %v1031_v40 = vld [vmem:[#allocation2 + $0xc8] sm:$0xff] }
 0x4aa   :  { %vm804_vm10 = vmor %vm802_vm9, %vm803_vm8 }
 0x4ab   :  { %v795_v45 = vsel %vm794_vm7, %v3066_v33, %v791_v27  ;;  %v798_v46 = vmul.f32 %v3068_v41, %v797_v29  ;;  %v1033_v33 = vld [vmem:[#allocation2 + $0xd8] sm:$0xff] }
 0x4ac   :  { %v806_v47 = vmul.f32 %v795_v45, %v3422_v3  ;;  %v1063_v3 = vpop.f32.mrf.mxu1  ;;  %1106 = vmatpush.msrb.mxu0 %v1033_v33 }
 0x4ad   :  { %v799_v52 = vmul.f32 0.5, %v798_v46  ;;  %v1064_v9 = vadd.f32 %v1063_v3, %v1039_v2  ;;  %v1003_v46 = vlaneseq }
 0x4ae   :  { %v809_v53 = vmul.f32 %v808_v42, %v806_v47  ;;  %1107 = vmatpush.msrb.mxu0 %v1032_v34 }
 0x4af   :  { %v800_v56 = vsub.f32 1.5, %v799_v52  ;;  %1241 = vrot.lane.b32.xlu0 %v1064_v9, %s3227_s25  ;;  %v1004_v49 = vshrl.u32 %v1003_v46, 7  ;;  %v1006_v50 = vand.u32 127, %v1003_v46 }
 0x4b0   :  { %v3481_v58 = vadd.f32 %v811_v48, %v809_v53  ;;  %1108 = vmatpush.msrb.mxu0 %v1031_v40 }
 0x4b1   :  { %v801_v59 = vmul.f32 %v3068_v41, %v800_v56  ;;  %vm1007_vm12 = vcmp.gt.s32.totalorder %v1006_v50, %v1004_v49  ;;  %v3232_v56 = vmov 0.0  }
 0x4b2   :  { %2897 = vmatmul.msk.f32.vlgmr.msrb.gmra.mxu2 %vm80_vm0, %v3481_v58  ;;  %v1008_v57 = vsel %vm1007_vm12, -1e+09, %v3232_v56 }
 0x4b3   :  { %v805_v60 = vsel %vm804_vm10, %v3068_v41, %v801_v59  ;;  %v1030_v41 = vld [vmem:[#allocation2 + $0xc0] sm:$0xff] }
 0x4b4   :  { %v807_v61 = vmul.f32 %v805_v60, %v3428_v7  ;;  %v3515_v7 = vld [vmem:[%s4051_s8 + $0x18] sm:$0x1f]  ;;  %v1066_v32 = vpop.f32.mrf.mxu1  ;;  %1109 = vmatpush.msrb.mxu0 %v1030_v41  ;;  %v3030_v59 = vld [vmem:[%s4046_s3 + $0x1] ss:$0 sm:$0xff]  ;;  %v1017_v60 = vadd.f32 %v3029_v55, %v1008_v57 }
 0x4b5   :  { %v826_v10 = vperm.slane %v3515_v7, 2  ;;  %v947_v19 = vperm.slane %v3515_v7, 0  ;;  %v1067_v35 = vadd.f32 %v1066_v32, %v1039_v2 }
 0x4b6   :  { %v810_v62 = vmul.f32 %v808_v42, %v807_v61 }
 0x4b7   :  { %v969_v24 = vadd.f32 %v968_v20, %v947_v19 }
 0x4b8   :  { %v3487_v63 = vadd.f32 %v811_v48, %v810_v62  ;;  %v3563_v62 = vadd.f32 %v3030_v59, %v1008_v57 }
 0x4b9   :  { %v971_v28 = vmax.f32 %v969_v24, 0.0 }
 0x4ba   :  { %2898 = vmatmul.msk.f32.gmra.mxu2 %vm80_vm0, %v3487_v63 }
 0x4bb   :  { %2902 = vmatmul.msk.f32.vlgmr.msra.gmra.mxu0 %vm80_vm0, %v971_v28 }
 0x4c2   :  { %2905 = vmatmul.msk.f32.vlgmr.msra.gmra.mxu2 %vm80_vm0, %v3448_v21 }
 0x4c3   :  { %2907 = vmatmul.msk.f32.vlgmr.msrb.gmra.mxu0 %vm80_vm0, %v3448_v21 }
 0x4ca   :  { %2906 = vmatmul.msk.f32.gmra.mxu2 %vm80_vm0, %v3457_v36 }
 0x4cb   :  { %2908 = vmatmul.msk.f32.gmra.mxu0 %vm80_vm0, %v3457_v36 }
 0x521   :  { %v1242_v29 = vpop.permute.xlu0 %1241 }
 0x535   :  { %v850_v11 = vpop.f32.mrf.mxu2 }
 0x536   :  { %v851_v12 = vadd.f32 %v850_v11, %v826_v10 }
 0x538   :  { %v856_v13 = vmax.f32 %v851_v12, 0.0  ;;  %v3554_v53 = vpop.f32.mrf.mxu0 }
 0x53a   :  { %2899 = vmatmul.msk.f32.vlgmr.msra.gmra.mxu3 %vm859_vm11, %v856_v13 }
 0x53d   :  { %v853_v15 = vpop.f32.mrf.mxu2 }
 0x53e   :  { %v854_v16 = vadd.f32 %v853_v15, %v826_v10 }
 0x540   :  { %v857_v17 = vmax.f32 %v854_v16, 0.0  ;;  %v1111_v6 = vpop.f32.mrf.mxu0 }
 0x541   :  { %v1112_v11 = vadd.f32 %v1111_v6, %v1093_v0 }
 0x542   :  { %2900 = vmatmul.msk.f32.gmra.mxu3 %vm859_vm11, %v857_v17 }
 0x543   :  { %1211 = vmatpush.msrb.mxu2 %v1112_v11 }
 0x545   :  { %v1087_v25 = vpop.f32.mrf.mxu2 }
 0x546   :  { %v1088_v26 = vadd.f32 %v1087_v25, %v1069_v23 }
 0x548   :  { %1379 = vrot.lane.b32.xlu0 %v1088_v26, %s3226_s24  ;;  %1243 = vrot.lane.b32.xlu2 %v1088_v26, %s3227_s25  ;;  %v1114_v15 = vpop.f32.mrf.mxu0 }
 0x549   :  { %2909 = vmatpush.xpose.msk.msrb.mxu3 %vm158_vm1, %v1088_v26  ;;  %v1115_v16 = vadd.f32 %v1114_v15, %v1093_v0 }
 0x54b   :  { %v3007_v17 = vpack.i.bf16 %v1115_v16, %v1112_v11 }
 0x54c   :  { %2910 = vmatmul.msk.f32.vlgmr.msrb.gmra.mxu3 %vm158_vm1, %v1064_v9 }
 0x54d   :  { %v1090_v37 = vpop.f32.mrf.mxu2  ;;  %1234 = vmatpush.msra.mxu3 %v1115_v16 }
 0x54e   :  { %v1091_v38 = vadd.f32 %v1090_v37, %v1069_v23 }
 0x550   :  { %1271 = vrot.lane.b32.xlu1 %v1091_v38, %s3227_s25  ;;  %2911 = vmatpush.xpose.msk.msra.mxu1 %vm158_vm1, %v1091_v38 }
 0x551   :  { %1407 = vrot.lane.b32.xlu0 %v1091_v38, %s3226_s24  ;;  %1269 = vrot.lane.b32.xlu2 %v1067_v35, %s3227_s25 }
 0x553   :  { %2912 = vmatmul.msk.f32.vlgmr.msra.gmra.mxu1 %vm158_vm1, %v1067_v35 }
 0x558   :  { %1377 = vrot.lane.b32.xlu1 %v1064_v9, %s3226_s24 }
 0x559   :  { %1511 = vrot.lane.b32.xlu0 %v1064_v9, %s3228_s26  ;;  %1513 = vrot.lane.b32.xlu2 %v1088_v26, %s3228_s26 }
 0x560   :  { %1405 = vrot.lane.b32.xlu1 %v1067_v35, %s3226_s24 }
 0x561   :  { %1541 = vrot.lane.b32.xlu2 %v1091_v38, %s3228_s26 }
 0x568   :  { %1539 = vrot.lane.b32.xlu1 %v1067_v35, %s3228_s26 }
 0x570   :  { %3008 = vrot.lane.b32.xlu1 %v3007_v17, %s3227_s25 }
 0x5a2   :  { %v1244_v27 = vpop.permute.xlu2 %1243 }
 0x5a3   :  { %2915 = vmatpush.xpose.msk.msra.mxu0 %vm158_vm1, %v1244_v27 }
 0x5a6   :  { %2916 = vmatmul.msk.f32.vlgmr.msra.gmra.mxu0 %vm158_vm1, %v1242_v29 }
 0x5ab   :  { %v1270_v42 = vpop.permute.xlu2 %1269 }
 0x5b3   :  { %v1514_v44 = vpop.permute.xlu2 %1513 }
 0x5ba   :  { %v1380_v43 = vpop.permute.xlu0 %1379 }
 0x5bb   :  { %2921 = vmatpush.xpose.msk.msrb.mxu0 %vm158_vm1, %v1380_v43  ;;  %v1542_v52 = vpop.permute.xlu2 %1541 }
 0x5bd   :  { %v3546_v45 = vpop.f32.mrf.mxu3 }
 0x5bf   :  { %2927 = vmatpush.xpose.msk.msra.mxu0 %vm158_vm1, %v1514_v44 }
 0x5c2   :  { %v1272_v47 = vpop.permute.xlu1 %1271 }
 0x5c3   :  { %v1408_v48 = vpop.permute.xlu0 %1407  ;;  %2917 = vmatpush.xpose.msk.msrb.mxu1 %vm158_vm1, %v1272_v47 }
 0x5c5   :  { %v3550_v51 = vpop.f32.mrf.mxu3 }
 0x5c6   :  { %2918 = vmatmul.msk.f32.vlgmr.msrb.gmra.mxu1 %vm158_vm1, %v1270_v42 }
 0x5c7   :  { %2923 = vmatpush.xpose.msk.msra.mxu1 %vm158_vm1, %v1408_v48 }
 0x5ca   :  { %v1378_v54 = vpop.permute.xlu1 %1377 }
 0x5cb   :  { %2929 = vmatpush.xpose.msk.msrb.mxu1 %vm158_vm1, %v1542_v52  ;;  %2922 = vmatmul.msk.f32.vlgmr.msrb.gmra.mxu0 %vm158_vm1, %v1378_v54  ;;  %v1512_v3 = vpop.permute.xlu0 %1511 }
 0x5cf   :  { %v1140_v61 = vpop.f32.mrf.mxu3 }
 0x5d0   :  { %v1169_v8 = vmul.f32 0.35355338, %v1140_v61  ;;  %v1166_v2 = vpop.f32.mrf.mxu1 }
 0x5d1   :  { %v1170_v9 = vmul.f32 0.35355338, %v1166_v2 }
 0x5d2   :  { %v1406_v4 = vpop.permute.xlu1 %1405  ;;  %v1171_v5 = vadd.f32 %v1169_v8, %v1017_v60 }
 0x5d3   :  { %2924 = vmatmul.msk.f32.vlgmr.msra.gmra.mxu1 %vm158_vm1, %v1406_v4  ;;  %2928 = vmatmul.msk.f32.vlgmr.msra.gmra.mxu0 %vm158_vm1, %v1512_v3  ;;  %v1172_v10 = vadd.f32 %v1170_v9, %v3563_v62 }
 0x5d4   :  { %v1173_v12 = vsel %vm158_vm1, %v1171_v5, -inf }
 0x5d5   :  { %1174 = vmax.xlane.f32.xlu0 %v1173_v12  ;;  %v1176_v13 = vsel %vm158_vm1, %v1172_v10, -inf }
 0x5d6   :  { %1177 = vmax.xlane.f32.xlu2 %v1176_v13 }
 0x5da   :  { %v1540_v14 = vpop.permute.xlu1 %1539 }
 0x5db   :  { %2930 = vmatmul.msk.f32.vlgmr.msrb.gmra.mxu1 %vm158_vm1, %v1540_v14 }
 0x5e2   :  { %v3009_v50 = vpop.permute.xlu1 %3008 }
 0x5e3   :  { %v3011_v52 = vunpack.i.h.bf16 %v3009_v50  ;;  %v3010_v54 = vunpack.i.l.bf16 %v3009_v50 }
 0x5e5   :  { %1343 = vmatpush.msra.mxu2 %v3010_v54  ;;  %1370 = vmatpush.msrb.mxu3 %v3011_v52 }
 0x623   :  { %v1266_v18 = vpop.f32.mrf.mxu0 }
 0x624   :  { %v1297_v19 = vmul.f32 0.35355338, %v1266_v18 }
 0x626   :  { %v1299_v20 = vadd.f32 %v1297_v19, %v1017_v60 }
 0x628   :  { %v1301_v22 = vsel %vm158_vm1, %v1299_v20, -inf }
 0x629   :  { %1302 = vmax.xlane.f32.xlu1 %v1301_v22 }
 0x642   :  { %1617 = vrot.lane.b32.xlu1 %v1115_v16, %s3228_s26 }
 0x643   :  { %v1294_v23 = vpop.f32.mrf.mxu1 }
 0x644   :  { %v1298_v24 = vmul.f32 0.35355338, %v1294_v23 }
 0x646   :  { %v1300_v25 = vadd.f32 %v1298_v24, %v3563_v62 }
 0x648   :  { %v1175_v26 = vpop.xlane.xlu0 %1174  ;;  %v1402_v28 = vpop.f32.mrf.mxu0  ;;  %v1304_v30 = vsel %vm158_vm1, %v1300_v25, -inf }
 0x649   :  { %v1179_v31 = vsub.f32 %v1171_v5, %v1175_v26  ;;  %v1433_v32 = vmul.f32 0.35355338, %v1402_v28  ;;  %v1178_v33 = vpop.xlane.xlu2 %1177  ;;  %1305 = vmax.xlane.f32.xlu0 %v1304_v30 }
 0x64a   :  { %v1180_v34 = vsub.f32 %v1172_v10, %v1178_v33 }
 0x64b   :  { %v1181_v35 = vmul.f32 1.442695, %v1179_v31  ;;  %v1435_v37 = vadd.f32 %v1433_v32, %v1017_v60 }
 0x64c   :  { %v1183_v38 = vmul.f32 1.442695, %v1180_v34 }
 0x64d   :  { %3069 = vpow2.f32 %v1181_v35  ;;  %v1437_v40 = vsel %vm158_vm1, %v1435_v37, -inf }
 0x64e   :  { %3071 = vpow2.f32 %v1183_v38  ;;  %1438 = vmax.xlane.f32.xlu2 %v1437_v40 }
 0x650   :  { %v1430_v41 = vpop.f32.mrf.mxu1  ;;  %v1536_v27 = vpop.f32.mrf.mxu0 }
 0x651   :  { %v1434_v29 = vmul.f32 0.35355338, %v1430_v41  ;;  %v1567_v42 = vmul.f32 0.35355338, %v1536_v27 }
 0x653   :  { %v3578_v43 = vpop.eup %3069  ;;  %v1569_v44 = vadd.f32 %v1567_v42, %v1017_v60  ;;  %v1436_v46 = vadd.f32 %v1434_v29, %v3563_v62 }
 0x654   :  { %v3072_v47 = vpop.eup %3071  ;;  %2913 = vmatmul.msk.f32.vlgmr.msrb.gmra.mxu2 %vm158_vm1, %v3578_v43  ;;  %v1185_v34 = vsel %vm158_vm1, %v3578_v43, 0.0 }
 0x655   :  { %2914 = vmatmul.msk.f32.vlgmr.msra.gmra.mxu3 %vm158_vm1, %v3072_v47  ;;  %v1571_v48 = vsel %vm158_vm1, %v1569_v44, -inf  ;;  %v1440_v49 = vsel %vm158_vm1, %v1436_v46, -inf }
 0x656   :  { %1572 = vmax.xlane.f32.xlu2 %v1571_v48  ;;  %1441 = vmax.xlane.f32.xlu0 %v1440_v49 }
 0x658   :  { %v1564_v55 = vpop.f32.mrf.mxu1 }
 0x659   :  { %v1568_v56 = vmul.f32 0.35355338, %v1564_v55 }
 0x65b   :  { %v1570_v57 = vadd.f32 %v1568_v56, %v3563_v62 }
 0x65d   :  { %v1574_v59 = vsel %vm158_vm1, %v1570_v57, -inf }
 0x65e   :  { %1575 = vmax.xlane.f32.xlu2 %v1574_v59 }
 0x66a   :  { %3013 = vrot.lane.b32.xlu0 %v3007_v17, %s3226_s24 }
 0x676   :  { %1591 = vrot.lane.b32.xlu2 %v1112_v11, %s3228_s26 }
 0x69c   :  { %v1303_v60 = vpop.xlane.xlu1 %1302 }
 0x69d   :  { %v1307_v61 = vsub.f32 %v1299_v20, %v1303_v60 }
 0x69f   :  { %v1309_v0 = vmul.f32 1.442695, %v1307_v61 }
 0x6a1   :  { %3073 = vpow2.f32 %v1309_v0 }
 0x6a7   :  { %v3074_v8 = vpop.eup %3073 }
 0x6a8   :  { %2919 = vmatmul.msk.f32.vlgmr.msra.gmra.mxu2 %vm158_vm1, %v3074_v8  ;;  %v1313_v2 = vsel %vm158_vm1, %v3074_v8, 0.0 }
 0x6a9   :  { %1314 = vadd.xlane.f32.xlu0 %v1313_v2 }
 0x6b4   :  { %v1618_v40 = vpop.permute.xlu1 %1617 }
 0x6bc   :  { %v1306_v3 = vpop.xlane.xlu0 %1305 }
 0x6bd   :  { %v1308_v9 = vsub.f32 %v1300_v25, %v1306_v3  ;;  %v1188_v25 = vsel %vm158_vm1, %v3072_v47, 0.0 }
 0x6bf   :  { %v1311_v62 = vmul.f32 1.442695, %v1308_v9 }
 0x6c1   :  { %3075 = vpow2.f32 %v1311_v62  ;;  %v1439_v4 = vpop.xlane.xlu2 %1438 }
 0x6c2   :  { %v1443_v5 = vsub.f32 %v1435_v37, %v1439_v4 }
 0x6c4   :  { %v1445_v6 = vmul.f32 1.442695, %v1443_v5 }
 0x6c6   :  { %3077 = vpow2.f32 %v1445_v6 }
 0x6c7   :  { %v3076_v10 = vpop.eup %3075 }
 0x6c8   :  { %2920 = vmatmul.msk.f32.vlgmr.msrb.gmra.mxu3 %vm158_vm1, %v3076_v10  ;;  %v1316_v11 = vsel %vm158_vm1, %v3076_v10, 0.0 }
 0x6c9   :  { %v1573_v12 = vpop.xlane.xlu2 %1572  ;;  %1317 = vadd.xlane.f32.xlu0 %v1316_v11  ;;  %v1442_v14 = vpop.xlane.xlu0 %1441  ;;  %v858_v11 = vperm.slane %v3464_v39, 4 }
 0x6ca   :  { %v1577_v13 = vsub.f32 %v1569_v44, %v1573_v12  ;;  %v1444_v17 = vsub.f32 %v1436_v46, %v1442_v14 }
 0x6cb   :  { %v887_v12 = vadd.f32 %v3550_v51, %v858_v11  ;;  %v1766_v51 = vld [vmem:[#allocation2 + $0x138] sm:$0xff] }
 0x6cc   :  { %v3078_v15 = vpop.eup %3077  ;;  %v1579_v16 = vmul.f32 1.442695, %v1577_v13  ;;  %v1447_v19 = vmul.f32 1.442695, %v1444_v17  ;;  %v884_v13 = vadd.f32 %v3546_v45, %v858_v11  ;;  %v1765_v45 = vld [vmem:[#allocation2 + $0x130] sm:$0xff] }
 0x6cd   :  { %v1449_v18 = vsel %vm158_vm1, %v3078_v15, 0.0  ;;  %v890_v14 = vadd.f32 %v887_v12, %v3487_v63  ;;  %v1764_v63 = vld [vmem:[#allocation2 + $0x128] sm:$0xff]  ;;  %v3669_v12 = vld [vmem:[%s4051_s8 + $0x10] sm:$0xff] }
 0x6ce   :  { %3079 = vpow2.f32 %v1579_v16  ;;  %1450 = vadd.xlane.f32.xlu1 %v1449_v18  ;;  %v1038_v18 = vld [vmem:[#allocation2 + $0xf8] sm:$0xff] }
 0x6cf   :  { %3081 = vpow2.f32 %v1447_v19  ;;  %v894_v16 = vsel %vm80_vm0, %v890_v14, 0.0  ;;  %v1037_v19 = vld [vmem:[#allocation2 + $0xf0] sm:$0xff]  ;;  %1694 = vmatpush.msrb.mxu0 %v1038_v18  ;;  %v938_v18 = vperm.slane %v3669_v12, 1 }
 0x6d1   :  { %v1576_v20 = vpop.xlane.xlu2 %1575  ;;  %1695 = vmatpush.msrb.mxu0 %v1037_v19 }
 0x6d2   :  { %v1578_v22 = vsub.f32 %v1570_v57, %v1576_v20  ;;  %v1036_v20 = vld [vmem:[#allocation2 + $0xe8] sm:$0xff] }
 0x6d3   :  { %1696 = vmatpush.msrb.mxu0 %v1036_v20 }
 0x6d4   :  { %v3080_v23 = vpop.eup %3079  ;;  %v1581_v24 = vmul.f32 1.442695, %v1578_v22  ;;  %v1035_v22 = vld [vmem:[#allocation2 + $0xe0] sm:$0xff] }
 0x6d5   :  { %v1583_v26 = vsel %vm158_vm1, %v3080_v23, 0.0  ;;  %v3082_v28 = vpop.eup %3081  ;;  %1697 = vmatpush.msrb.mxu0 %v1035_v22 }
 0x6d6   :  { %3083 = vpow2.f32 %v1581_v24  ;;  %1189 = vadd.xlane.f32.xlu1 %v1188_v25  ;;  %1584 = vadd.xlane.f32.xlu2 %v1583_v26  ;;  %v1452_v37 = vsel %vm158_vm1, %v3082_v28, 0.0 }
 0x6d7   :  { %v3605_v27 = vpop.f32.mrf.mxu2  ;;  %1876 = vmatpush.msra.mxu0 %v1766_v51 }
 0x6d8   :  { %v1236_v47 = vpop.f32.mrf.mxu3 }
 0x6d9   :  { %v1592_v38 = vpop.permute.xlu2 %1591  ;;  %1877 = vmatpush.msra.mxu0 %v1765_v45 }
 0x6db   :  { %1878 = vmatpush.msra.mxu0 %v1764_v63 }
 0x6dc   :  { %v3084_v30 = vpop.eup %3083  ;;  %v3014_v31 = vpop.permute.xlu0 %3013 }
 0x6dd   :  { %v3016_v32 = vunpack.i.h.bf16 %v3014_v31  ;;  %v3015_v33 = vunpack.i.l.bf16 %v3014_v31  ;;  %v1586_v35 = vsel %vm158_vm1, %v3084_v30, 0.0 }
 0x6de   :  { %1186 = vadd.xlane.f32.xlu2 %v1185_v34  ;;  %1587 = vadd.xlane.f32.xlu0 %v1586_v35 }
 0x6df   :  { %1453 = vadd.xlane.f32.xlu1 %v1452_v37  ;;  %1478 = vmatpush.msrb.mxu2 %v3015_v33 }
 0x6e0   :  { %1504 = vmatpush.msra.mxu3 %v3016_v32  ;;  %2925 = vmatmul.msk.f32.vlgmr.msrb.gmra.mxu2 %vm158_vm1, %v3078_v15  ;;  %v889_v15 = vadd.f32 %v884_v13, %v3481_v58  ;;  %v1763_v58 = vld [vmem:[#allocation2 + $0x120] sm:$0xff] }
 0x6e1   :  { %2926 = vmatmul.msk.f32.vlgmr.msra.gmra.mxu3 %vm158_vm1, %v3082_v28  ;;  %1612 = vmatpush.msra.mxu2 %v1592_v38 }
 0x6e2   :  { %1638 = vmatpush.msrb.mxu3 %v1618_v40  ;;  %v891_v17 = vsel %vm80_vm0, %v889_v15, 0.0  ;;  %1879 = vmatpush.msra.mxu0 %v1763_v58 }
 0x6e3   :  { %1826 = vmatpush.msrb.mxu2 %v1766_v51 }
 0x6e5   :  { %1827 = vmatpush.msrb.mxu2 %v1765_v45 }
 0x6e7   :  { %1828 = vmatpush.msrb.mxu2 %v1764_v63 }
 0x6e8   :  { %2931 = vmatmul.msk.f32.vlgmr.msra.gmra.mxu2 %vm158_vm1, %v3080_v23 }
 0x6e9   :  { %2932 = vmatmul.msk.f32.vlgmr.msrb.gmra.mxu3 %vm158_vm1, %v3084_v30  ;;  %1829 = vmatpush.msrb.mxu2 %v1763_v58 }
 0x71c   :  { %v1315_v41 = vpop.xlane.xlu0 %1314 }
 0x71d   :  { %3085 = vrcp.f32 %v1315_v41 }
 0x723   :  { %v3086_v29 = vpop.eup %3085 }
 0x72b   :  { %v1345_v42 = vpop.f32.mrf.mxu2 }
 0x72c   :  { %v1375_v43 = vmul.f32 %v3086_v29, %v1345_v42 }
 0x72e   :  { %1647 = vrot.lane.b32.xlu0 %v1375_v43, %s3225_s19 }
 0x73c   :  { %v1318_v46 = vpop.xlane.xlu0 %1317 }
 0x73d   :  { %3087 = vrcp.f32 %v1318_v46 }
 0x741   :  { %v1451_v44 = vpop.xlane.xlu1 %1450 }
 0x743   :  { %v3088_v49 = vpop.eup %3087 }
 0x749   :  { %v1190_v48 = vpop.xlane.xlu1 %1189  ;;  %v1585_v56 = vpop.xlane.xlu2 %1584 }
 0x74a   :  { %3089 = vrcp.f32 %v1190_v48  ;;  %v3165_v48 = vld [vmem:[%s4051_s8] sm:$0xff] }
 0x74b   :  { %v1372_v50 = vpop.f32.mrf.mxu3  ;;  %3091 = vrcp.f32 %v1451_v44 }
 0x74c   :  { %v1376_v52 = vmul.f32 %v3088_v49, %v1372_v50  ;;  %3093 = vrcp.f32 %v1585_v56  ;;  %v1675_v49 = vperm.slane %v3165_v48, 7 }
 0x74e   :  { %1649 = vrot.lane.b32.xlu0 %v1376_v52, %s3225_s19 }
 0x750   :  { %v3090_v54 = vpop.eup %3089 }
 0x751   :  { %v3609_v55 = vmul.f32 %v3090_v54, %v1236_v47  ;;  %v3092_v59 = vpop.eup %3091  ;;  %v1588_v60 = vpop.xlane.xlu0 %1587 }
 0x752   :  { %v1454_v57 = vpop.xlane.xlu1 %1453  ;;  %v3094_v2 = vpop.eup %3093 }
 0x753   :  { %3095 = vrcp.f32 %v1454_v57  ;;  %v1187_v23 = vpop.xlane.xlu2 %1186 }
 0x754   :  { %3097 = vrcp.f32 %v1588_v60 }
 0x755   :  { %3099 = vrcp.f32 %v1187_v23 }
 0x759   :  { %v3096_v3 = vpop.eup %3095 }
 0x75a   :  { %v3098_v62 = vpop.eup %3097 }
 0x75b   :  { %v3100_v25 = vpop.eup %3099 }
 0x75c   :  { %v1239_v28 = vmul.f32 %v3100_v25, %v3605_v27  ;;  %v977_v27 = vperm.slane %v3515_v7, 1 }
 0x75e   :  { %v3634_v29 = vadd.f32 %v3554_v53, %v977_v27 }
 0x763   :  { %v1480_v61 = vpop.f32.mrf.mxu2 }
 0x764   :  { %v1509_v0 = vmul.f32 %v3092_v59, %v1480_v61  ;;  %v1506_v8 = vpop.f32.mrf.mxu3 }
 0x765   :  { %v1510_v4 = vmul.f32 %v3096_v3, %v1506_v8  ;;  %v3658_v3 = vld [vmem:[#allocation2 + $0x148] sm:$0xff] }
 0x766   :  { %1655 = vrot.lane.b32.xlu2 %v1509_v0, %s3229_s11 }
 0x76b   :  { %v1614_v9 = vpop.f32.mrf.mxu2 }
 0x76c   :  { %v1643_v5 = vmul.f32 %v3094_v2, %v1614_v9  ;;  %v1640_v6 = vpop.f32.mrf.mxu3  ;;  %v3653_v2 = vld [vmem:[#allocation2 + $0x158] sm:$0xff]  ;;  %v3661_v9 = vld [vmem:[#allocation2 + $0x140] sm:$0xff] }
 0x76d   :  { %v1644_v10 = vmul.f32 %v3098_v62, %v1640_v6  ;;  %1850 = vmatpush.msra.mxu3 %v3653_v2 }
 0x76e   :  { %1663 = vrot.lane.b32.xlu1 %v1643_v5, %s3230_s12  ;;  %1657 = vrot.lane.b32.xlu2 %v1510_v4, %s3229_s11 }
 0x76f   :  { %1665 = vrot.lane.b32.xlu0 %v1644_v10, %s3230_s12 }
 0x797   :  { %895 = vadd.xlane.f32.xlu2 %v894_v16 }
 0x798   :  { %892 = vadd.xlane.f32.xlu1 %v891_v17 }
 0x7a0   :  { %v1648_v24 = vpop.permute.xlu0 %1647 }
 0x7a1   :  { %v1669_v31 = vsel %vm158_vm1, %v1239_v28, %v1648_v24 }
 0x7c0   :  { %v1656_v26 = vpop.permute.xlu2 %1655  ;;  %v1650_v30 = vpop.permute.xlu0 %1649 }
 0x7c1   :  { %v1671_v32 = vsel %vm719_vm2, %v1669_v31, %v1656_v26  ;;  %v1670_v38 = vsel %vm158_vm1, %v3609_v55, %v1650_v30 }
 0x7c8   :  { %v1658_v35 = vpop.permute.xlu2 %1657 }
 0x7c9   :  { %v1672_v40 = vsel %vm719_vm2, %v1670_v38, %v1658_v35 }
 0x7e0   :  { %v1664_v33 = vpop.permute.xlu1 %1663 }
 0x7e1   :  { %v1673_v34 = vsel %vm722_vm3, %v1671_v32, %v1664_v33  ;;  %v1666_v37 = vpop.permute.xlu0 %1665 }
 0x7e2   :  { %2933 = vmatmul.msk.f32.vlgmr.msrb.gmra.mxu0 %vm80_vm0, %v1673_v34  ;;  %v1674_v41 = vsel %vm722_vm3, %v1672_v40, %v1666_v37 }
 0x7ea   :  { %2934 = vmatmul.msk.f32.gmra.mxu0 %vm80_vm0, %v1674_v41 }
 0x7f2   :  { %2941 = vmatmul.msk.f32.vlgmr.msra.gmra.mxu0 %vm80_vm0, %v3634_v29 }
 0x80a   :  { %v896_v7 = vpop.xlane.xlu2 %895 }
 0x80b   :  { %v893_v42 = vpop.xlane.xlu1 %892  ;;  %v898_v53 = vmul.f32 %v896_v7, %v3419_v1 }
 0x80c   :  { %v897_v43 = vmul.f32 %v893_v42, %v3419_v1 }
 0x80d   :  { %v3645_v55 = vsub.f32 %v890_v14, %v898_v53  ;;  %v1759_v53 = vld [vmem:[#allocation2 + $0x108] sm:$0xff] }
 0x80e   :  { %v899_v44 = vsub.f32 %v889_v15, %v897_v43  ;;  %v935_v15 = vperm.slane %v3669_v12, 0 }
 0x80f   :  { %v902_v60 = vmul.f32 %v3645_v55, %v3645_v55 }
 0x810   :  { %v901_v46 = vmul.f32 %v899_v44, %v899_v44 }
 0x811   :  { %v906_v8 = vsel %vm80_vm0, %v902_v60, 0.0 }
 0x812   :  { %v903_v47 = vsel %vm80_vm0, %v901_v46, 0.0  ;;  %v3695_v46 = vperm.slane %v3464_v39, 1 }
 0x813   :  { %904 = vadd.xlane.f32.xlu2 %v903_v47 }
 0x85f   :  { %v1699_v50 = vpop.f32.mrf.mxu0 }
 0x860   :  { %v1700_v52 = vadd.f32 %v1699_v50, %v1675_v49  ;;  %v1760_v50 = vld [vmem:[#allocation2 + $0x110] sm:$0xff] }
 0x862   :  { %v1705_v54 = vadd.f32 %v1700_v52, %v3448_v21  ;;  %v3656_v21 = vld [vmem:[#allocation2 + $0x150] sm:$0xff]  ;;  %v1758_v52 = vld [vmem:[#allocation2 + $0x100] sm:$0xff] }
 0x863   :  { %1851 = vmatpush.msra.mxu3 %v3656_v21 }
 0x864   :  { %v1707_v56 = vsel %vm80_vm0, %v1705_v54, 0.0 }
 0x865   :  { %1708 = vadd.xlane.f32.xlu0 %v1707_v56  ;;  %1852 = vmatpush.msra.mxu3 %v3658_v3 }
 0x867   :  { %v1702_v57 = vpop.f32.mrf.mxu0  ;;  %1853 = vmatpush.msra.mxu3 %v3661_v9 }
 0x868   :  { %v1703_v59 = vadd.f32 %v1702_v57, %v1675_v49 }
 0x86a   :  { %v1706_v61 = vadd.f32 %v1703_v59, %v3457_v36 }
 0x86c   :  { %v1710_v0 = vsel %vm80_vm0, %v1706_v61, 0.0 }
 0x86d   :  { %1711 = vadd.xlane.f32.xlu1 %v1710_v0  ;;  %907 = vadd.xlane.f32.xlu0 %v906_v8 }
 0x886   :  { %v905_v36 = vpop.xlane.xlu2 %904 }
 0x887   :  { %v909_v62 = vmul.f32 %v905_v36, %v3419_v1 }
 0x889   :  { %v911_v4 = vadd.f32 1e-05, %v909_v62 }
 0x88b   :  { %3101 = vrsqrt.f32 %v911_v4  ;;  %vm919_vm14 = vweird.f32 %v911_v4 }
 0x891   :  { %v3102_v5 = vpop.eup %3101 }
 0x892   :  { %v914_v6 = vmul.f32 %v3102_v5, %v911_v4  ;;  %vm920_vm13 = vweird.f32 %v3102_v5 }
 0x893   :  { %vm921_vm15 = vmor %vm919_vm14, %vm920_vm13 }
 0x894   :  { %v915_v10 = vmul.f32 %v3102_v5, %v914_v6 }
 0x896   :  { %v916_v11 = vmul.f32 0.5, %v915_v10  ;;  %v1754_v10 = vperm.slane %v3669_v12, 3 }
 0x898   :  { %v917_v13 = vsub.f32 1.5, %v916_v11 }
 0x89a   :  { %v918_v14 = vmul.f32 %v3102_v5, %v917_v13 }
 0x89c   :  { %v922_v16 = vsel %vm921_vm15, %v3102_v5, %v918_v14 }
 0x89d   :  { %v933_v17 = vmul.f32 %v922_v16, %v899_v44  ;;  %v3692_v44 = vperm.slane %v3464_v39, 2  ;;  %v1761_v39 = vld [vmem:[#allocation2 + $0x118] sm:$0xff] }
 0x89e   :  { %1796 = vmatpush.msra.mxu1 %v1761_v39 }
 0x89f   :  { %v936_v19 = vmul.f32 %v935_v15, %v933_v17 }
 0x8a0   :  { %1797 = vmatpush.msra.mxu1 %v1760_v50 }
 0x8a1   :  { %v939_v20 = vadd.f32 %v938_v18, %v936_v19 }
 0x8a2   :  { %1798 = vmatpush.msra.mxu1 %v1759_v53 }
 0x8a3   :  { %2937 = vmatmul.msk.f32.vlgmr.msrb.gmra.mxu2 %vm80_vm0, %v939_v20  ;;  %2939 = vmatmul.msk.f32.vlgmr.msra.gmra.mxu3 %vm80_vm0, %v939_v20 }
 0x8a4   :  { %1799 = vmatpush.msra.mxu1 %v1758_v52 }
 0x8a6   :  { %1896 = vmatpush.msrb.mxu1 %v3653_v2 }
 0x8a8   :  { %1897 = vmatpush.msrb.mxu1 %v3656_v21 }
 0x8aa   :  { %1898 = vmatpush.msrb.mxu1 %v3658_v3  ;;  %v1751_v3 = vperm.slane %v3669_v12, 2 }
 0x8ac   :  { %1899 = vmatpush.msrb.mxu1 %v3661_v9 }
 0x8d8   :  { %v1709_v22 = vpop.xlane.xlu0 %1708 }
 0x8d9   :  { %v1713_v51 = vmul.f32 %v1709_v22, %v3419_v1 }
 0x8db   :  { %v3676_v45 = vsub.f32 %v1705_v54, %v1713_v51 }
 0x8dd   :  { %v1717_v63 = vmul.f32 %v3676_v45, %v3676_v45 }
 0x8df   :  { %v1719_v58 = vsel %vm80_vm0, %v1717_v63, 0.0 }
 0x8e0   :  { %1720 = vadd.xlane.f32.xlu1 %v1719_v58  ;;  %v1712_v23 = vpop.xlane.xlu1 %1711  ;;  %v908_v24 = vpop.xlane.xlu0 %907 }
 0x8e1   :  { %v1714_v25 = vmul.f32 %v1712_v23, %v3419_v1  ;;  %v910_v26 = vmul.f32 %v908_v24, %v3419_v1  ;;  %v1881_v24 = vpop.f32.mrf.mxu0 }
 0x8e3   :  { %v3683_v28 = vsub.f32 %v1706_v61, %v1714_v25  ;;  %v912_v30 = vadd.f32 1e-05, %v910_v26 }
 0x8e5   :  { %3103 = vrsqrt.f32 %v912_v30  ;;  %v1718_v31 = vmul.f32 %v3683_v28, %v3683_v28  ;;  %vm929_vm5 = vweird.f32 %v912_v30 }
 0x8e7   :  { %v1722_v32 = vsel %vm80_vm0, %v1718_v31, 0.0 }
 0x8e8   :  { %1723 = vadd.xlane.f32.xlu2 %v1722_v32 }
 0x8eb   :  { %v3104_v33 = vpop.eup %3103 }
 0x8ec   :  { %v924_v34 = vmul.f32 %v3104_v33, %v912_v30  ;;  %vm930_vm4 = vweird.f32 %v3104_v33 }
 0x8ed   :  { %vm931_vm6 = vmor %vm929_vm5, %vm930_vm4 }
 0x8ee   :  { %v925_v35 = vmul.f32 %v3104_v33, %v924_v34 }
 0x8f0   :  { %v926_v37 = vmul.f32 0.5, %v925_v35 }
 0x8f2   :  { %v927_v38 = vsub.f32 1.5, %v926_v37 }
 0x8f4   :  { %v928_v40 = vmul.f32 %v3104_v33, %v927_v38 }
 0x8f6   :  { %v932_v41 = vsel %vm931_vm6, %v3104_v33, %v928_v40 }
 0x8f7   :  { %v934_v27 = vmul.f32 %v932_v41, %v3645_v55 }
 0x8f9   :  { %v937_v42 = vmul.f32 %v935_v15, %v934_v27 }
 0x8fb   :  { %v940_v43 = vadd.f32 %v938_v18, %v937_v42 }
 0x8fd   :  { %2938 = vmatmul.msk.f32.gmra.mxu2 %vm80_vm0, %v940_v43  ;;  %2940 = vmatmul.msk.f32.gmra.mxu3 %vm80_vm0, %v940_v43 }
 0x926   :  { %v1831_v47 = vpop.f32.mrf.mxu2  ;;  %v1855_v48 = vpop.f32.mrf.mxu3 }
 0x927   :  { %v3698_v49 = vadd.f32 %v1831_v47, %v3695_v46  ;;  %v3701_v7 = vadd.f32 %v1855_v48, %v3692_v44 }
 0x929   :  { %2032 = vmatpush.msrb.mxu0 %v3701_v7  ;;  %2064 = vrot.lane.b32.xlu0 %v3698_v49, %s3227_s25 }
 0x92a   :  { %2943 = vmatpush.xpose.msk.msra.mxu2 %vm158_vm1, %v3698_v49 }
 0x931   :  { %2236 = vrot.lane.b32.xlu0 %v3698_v49, %s3226_s24 }
 0x953   :  { %v1721_v54 = vpop.xlane.xlu1 %1720 }
 0x954   :  { %v1725_v55 = vmul.f32 %v1721_v54, %v3419_v1 }
 0x956   :  { %v1727_v56 = vadd.f32 1e-05, %v1725_v55 }
 0x958   :  { %3105 = vrsqrt.f32 %v1727_v56  ;;  %vm1735_vm8 = vweird.f32 %v1727_v56 }
 0x95b   :  { %v1724_v57 = vpop.xlane.xlu2 %1723 }
 0x95c   :  { %v1726_v59 = vmul.f32 %v1724_v57, %v3419_v1 }
 0x95e   :  { %v3106_v60 = vpop.eup %3105  ;;  %v1728_v61 = vadd.f32 1e-05, %v1726_v59  ;;  %v3167_v59 = vld [vmem:[%s4044_s1] ss:$0 sm:$0xff] }
 0x95f   :  { %v1730_v0 = vmul.f32 %v3106_v60, %v1727_v56  ;;  %vm1736_vm7 = vweird.f32 %v3106_v60 }
 0x960   :  { %3107 = vrsqrt.f32 %v1728_v61  ;;  %vm1737_vm9 = vmor %vm1735_vm8, %vm1736_vm7  ;;  %vm1745_vm12 = vweird.f32 %v1728_v61 }
 0x961   :  { %v1731_v8 = vmul.f32 %v3106_v60, %v1730_v0 }
 0x963   :  { %v1732_v2 = vmul.f32 0.5, %v1731_v8 }
 0x965   :  { %v1733_v36 = vsub.f32 1.5, %v1732_v2 }
 0x966   :  { %v3108_v62 = vpop.eup %3107 }
 0x967   :  { %v1734_v4 = vmul.f32 %v3106_v60, %v1733_v36  ;;  %v1740_v21 = vmul.f32 %v3108_v62, %v1728_v61  ;;  %vm1746_vm10 = vweird.f32 %v3108_v62  ;;  %v3168_v36 = vld [vmem:[%s4044_s1 + $0x1] ss:$0 sm:$0xff] }
 0x968   :  { %vm1747_vm13 = vmor %vm1745_vm12, %vm1746_vm10 }
 0x969   :  { %v1738_v5 = vsel %vm1737_vm9, %v3106_v60, %v1734_v4  ;;  %v1741_v9 = vmul.f32 %v3108_v62, %v1740_v21 }
 0x96a   :  { %v1749_v6 = vmul.f32 %v1738_v5, %v3676_v45 }
 0x96b   :  { %v1742_v11 = vmul.f32 0.5, %v1741_v9 }
 0x96c   :  { %v1752_v13 = vmul.f32 %v1751_v3, %v1749_v6 }
 0x96d   :  { %v1743_v14 = vsub.f32 1.5, %v1742_v11 }
 0x96e   :  { %v3719_v15 = vadd.f32 %v1754_v10, %v1752_v13 }
 0x96f   :  { %v1744_v16 = vmul.f32 %v3108_v62, %v1743_v14 }
 0x970   :  { %2935 = vmatmul.msk.f32.vlgmr.msra.gmra.mxu1 %vm80_vm0, %v3719_v15 }
 0x971   :  { %v1748_v17 = vsel %vm1747_vm13, %v3108_v62, %v1744_v16 }
 0x972   :  { %v1750_v18 = vmul.f32 %v1748_v17, %v3683_v28  ;;  %v1882_v28 = vadd.f32 %v1881_v24, %v3695_v46 }
 0x974   :  { %v1753_v19 = vmul.f32 %v1751_v3, %v1750_v18  ;;  %v1962_v31 = vperm.slane %v1882_v28, 0  ;;  %v1961_v37 = vrot.slane %v1882_v28, 1 }
 0x976   :  { %v3724_v20 = vadd.f32 %v1754_v10, %v1753_v19  ;;  %v1963_v38 = vperm.slane %v1961_v37, 0 }
 0x978   :  { %2936 = vmatmul.msk.f32.gmra.mxu1 %vm80_vm0, %v3724_v20 }
 0x980   :  { %v1834_v12 = vpop.f32.mrf.mxu2  ;;  %v1858_v22 = vpop.f32.mrf.mxu3  ;;  %2942 = vmatmul.msk.f32.vlgmr.msrb.gmra.mxu1 %vm80_vm0, %v3634_v29  ;;  %v3743_v29 = vld [vmem:[%s4051_s8 + $0x8] sm:$0xff] }
 0x981   :  { %v1835_v51 = vadd.f32 %v1834_v12, %v3695_v46  ;;  %v3732_v45 = vadd.f32 %v1858_v22, %v3692_v44  ;;  %v1777_v23 = vperm.slane %v3743_v29, 0 }
 0x983   :  { %2055 = vmatpush.msra.mxu1 %v3732_v45  ;;  %2092 = vrot.lane.b32.xlu2 %v1835_v51, %s3227_s25  ;;  %v3017_v14 = vpack.i.bf16 %v3732_v45, %v3701_v7 }
 0x984   :  { %2945 = vmatpush.xpose.msk.msrb.mxu3 %vm158_vm1, %v1835_v51 }
 0x98b   :  { %2264 = vrot.lane.b32.xlu2 %v1835_v51, %s3226_s24 }
 0x99b   :  { %v2065_v63 = vpop.permute.xlu0 %2064 }
 0x99c   :  { %2949 = vmatpush.xpose.msk.msrb.mxu2 %vm158_vm1, %v2065_v63 }
 0x9a3   :  { %v2237_v30 = vpop.permute.xlu0 %2236 }
 0x9dd   :  { %v2093_v58 = vpop.permute.xlu2 %2092 }
 0x9de   :  { %2951 = vmatpush.xpose.msk.msra.mxu3 %vm158_vm1, %v2093_v58 }
 0x9e5   :  { %v2265_v35 = vpop.permute.xlu2 %2264 }
 0x9ed   :  { %v1801_v25 = vpop.f32.mrf.mxu1 }
 0x9ee   :  { %v1802_v26 = vadd.f32 %v1801_v25, %v1777_v23 }
 0x9f0   :  { %2062 = vrot.lane.b32.xlu1 %v1802_v26, %s3227_s25  ;;  %2402 = vrot.lane.b32.xlu2 %v1802_v26, %s3228_s26  ;;  %v1966_v34 = vmul.f32 %v1962_v31, %v1802_v26 }
 0x9f1   :  { %2234 = vrot.lane.b32.xlu0 %v1802_v26, %s3226_s24  ;;  %2944 = vmatmul.msk.f32.vlgmr.msra.gmra.mxu2 %vm158_vm1, %v1802_v26 }
 0x9f2   :  { %2955 = vmatpush.xpose.msk.msra.mxu2 %vm158_vm1, %v2237_v30  ;;  %v1968_v41 = vsel %vm158_vm1, %v1966_v34, 0.0 }
 0x9f5   :  { %v1804_v32 = vpop.f32.mrf.mxu1 }
 0x9f6   :  { %v1805_v33 = vadd.f32 %v1804_v32, %v1777_v23 }
 0x9f8   :  { %2124 = vrot.lane.b32.xlu2 %v1966_v34, %s3227_s25  ;;  %2090 = vrot.lane.b32.xlu1 %v1805_v33, %s3227_s25  ;;  %v1967_v40 = vmul.f32 %v1963_v38, %v1805_v33 }
 0x9f9   :  { %2262 = vrot.lane.b32.xlu0 %v1805_v33, %s3226_s24  ;;  %2946 = vmatmul.msk.f32.vlgmr.msrb.gmra.mxu3 %vm158_vm1, %v1805_v33 }
 0x9fa   :  { %2957 = vmatpush.xpose.msk.msrb.mxu3 %vm158_vm1, %v2265_v35  ;;  %v1971_v27 = vsel %vm158_vm1, %v1967_v40, 0.0 }
 0xa00   :  { %2404 = vrot.lane.b32.xlu1 %v3698_v49, %s3228_s26 }
 0xa01   :  { %2430 = vrot.lane.b32.xlu0 %v1805_v33, %s3228_s26 }
 0xa08   :  { %2432 = vrot.lane.b32.xlu1 %v1835_v51, %s3228_s26 }
 0xa09   :  { %2294 = vrot.lane.b32.xlu0 %v1966_v34, %s3226_s24 }
 0xa10   :  { %2462 = vrot.lane.b32.xlu1 %v1966_v34, %s3228_s26 }
 0xa11   :  { %2464 = vrot.lane.b32.xlu0 %v1967_v40, %s3228_s26 }
 0xa18   :  { %2126 = vrot.lane.b32.xlu1 %v1967_v40, %s3227_s25 }
 0xa21   :  { %1969 = vadd.xlane.f32.xlu2 %v1968_v41 }
 0xa39   :  { %2296 = vrot.lane.b32.xlu2 %v1967_v40, %s3226_s24 }
 0xa3b   :  { %1972 = vadd.xlane.f32.xlu0 %v1971_v27 }
 0xa4a   :  { %v2403_v42 = vpop.permute.xlu2 %2402 }
 0xa52   :  { %v2125_v43 = vpop.permute.xlu2 %2124 }
 0xa53   :  { %v2130_v46 = vsel %vm158_vm1, %v2125_v43, 0.0 }
 0xa62   :  { %v2063_v47 = vpop.permute.xlu1 %2062  ;;  %2131 = vadd.xlane.f32.xlu2 %v2130_v46 }
 0xa63   :  { %v2235_v48 = vpop.permute.xlu0 %2234  ;;  %2950 = vmatmul.msk.f32.vlgmr.msrb.gmra.mxu2 %vm158_vm1, %v2063_v47 }
 0xa6a   :  { %v2091_v49 = vpop.permute.xlu1 %2090 }
 0xa6b   :  { %v2263_v39 = vpop.permute.xlu0 %2262  ;;  %2952 = vmatmul.msk.f32.vlgmr.msra.gmra.mxu3 %vm158_vm1, %v2091_v49  ;;  %2956 = vmatmul.msk.f32.vlgmr.msra.gmra.mxu2 %vm158_vm1, %v2235_v48 }
 0xa72   :  { %v2405_v50 = vpop.permute.xlu1 %2404 }
 0xa73   :  { %v2431_v53 = vpop.permute.xlu0 %2430  ;;  %2958 = vmatmul.msk.f32.vlgmr.msrb.gmra.mxu3 %vm158_vm1, %v2263_v39  ;;  %2961 = vmatpush.xpose.msk.msrb.mxu2 %vm158_vm1, %v2405_v50 }
 0xa74   :  { %v1927_v52 = vpop.f32.mrf.mxu2 }
 0xa75   :  { %v1956_v56 = vmul.f32 0.35355338, %v1927_v52 }
 0xa76   :  { %2962 = vmatmul.msk.f32.vlgmr.msrb.gmra.mxu2 %vm158_vm1, %v2403_v42 }
 0xa77   :  { %v1958_v60 = vadd.f32 %v3167_v59, %v1956_v56 }
 0xa79   :  { %v1976_v2 = vsel %vm158_vm1, %v1958_v60, -inf }
 0xa7a   :  { %v2433_v54 = vpop.permute.xlu1 %2432 }
 0xa7b   :  { %v2295_v55 = vpop.permute.xlu0 %2294  ;;  %2963 = vmatpush.xpose.msk.msra.mxu3 %vm158_vm1, %v2433_v54 }
 0xa7c   :  { %v2300_v57 = vsel %vm158_vm1, %v2295_v55, 0.0  ;;  %v1953_v61 = vpop.f32.mrf.mxu3 }
 0xa7d   :  { %2301 = vadd.xlane.f32.xlu1 %v2300_v57  ;;  %v1957_v8 = vmul.f32 0.35355338, %v1953_v61 }
 0xa7e   :  { %2964 = vmatmul.msk.f32.vlgmr.msra.gmra.mxu3 %vm158_vm1, %v2431_v53 }
 0xa7f   :  { %v1959_v62 = vadd.f32 %v3168_v36, %v1957_v8 }
 0xa81   :  { %v1979_v3 = vsel %vm158_vm1, %v1959_v62, -inf }
 0xa82   :  { %v2463_v0 = vpop.permute.xlu1 %2462 }
 0xa83   :  { %v2468_v5 = vsel %vm158_vm1, %v2463_v0, 0.0  ;;  %v2465_v6 = vpop.permute.xlu0 %2464 }
 0xa84   :  { %v2471_v10 = vsel %vm158_vm1, %v2465_v6, 0.0 }
 0xa85   :  { %1977 = vmax.xlane.f32.xlu1 %v1976_v2 }
 0xa8a   :  { %v2127_v4 = vpop.permute.xlu1 %2126 }
 0xa8b   :  { %v2133_v21 = vsel %vm158_vm1, %v2127_v4, 0.0 }
 0xa8c   :  { %2134 = vadd.xlane.f32.xlu2 %v2133_v21 }
 0xa8d   :  { %1980 = vmax.xlane.f32.xlu1 %v1979_v3 }
 0xa94   :  { %2469 = vadd.xlane.f32.xlu2 %v2468_v5  ;;  %v1970_v9 = vpop.xlane.xlu2 %1969 }
 0xa95   :  { %v3808_v30 = vmul.f32 0.35355338, %v1970_v9 }
 0xa9c   :  { %2472 = vadd.xlane.f32.xlu2 %v2471_v10  ;;  %v2297_v11 = vpop.permute.xlu2 %2296 }
 0xa9d   :  { %v2303_v13 = vsel %vm158_vm1, %v2297_v11, 0.0 }
 0xa9e   :  { %2304 = vadd.xlane.f32.xlu0 %v2303_v13 }
 0xaa6   :  { %3018 = vrot.lane.b32.xlu1 %v3017_v14, %s3227_s25 }
 0xaae   :  { %v1973_v27 = vpop.xlane.xlu0 %1972 }
 0xaaf   :  { %v3824_v47 = vmul.f32 0.35355338, %v1973_v27 }
 0xab2   :  { %3023 = vrot.lane.b32.xlu0 %v3017_v14, %s3226_s24  ;;  %v1901_v14 = vpop.f32.mrf.mxu1 }
 0xad5   :  { %v2132_v4 = vpop.xlane.xlu2 %2131 }
 0xad6   :  { %v2136_v5 = vmul.f32 0.35355338, %v2132_v4 }
 0xae6   :  { %v2087_v16 = vpop.f32.mrf.mxu2 }
 0xae7   :  { %v2118_v17 = vmul.f32 0.35355338, %v2087_v16 }
 0xae9   :  { %v3794_v18 = vadd.f32 %v3167_v59, %v2118_v17 }
 0xaeb   :  { %v2138_v19 = vsel %vm158_vm1, %v3794_v18, -inf }
 0xaec   :  { %2139 = vmax.xlane.f32.xlu0 %v2138_v19 }
 0xaee   :  { %v2115_v12 = vpop.f32.mrf.mxu3  ;;  %v2259_v22 = vpop.f32.mrf.mxu2 }
 0xaef   :  { %v2119_v51 = vmul.f32 0.35355338, %v2115_v12  ;;  %v2290_v63 = vmul.f32 0.35355338, %v2259_v22  ;;  %v3853_v22 = vadd.f32 %v1901_v14, %v3692_v44 }
 0xaf0   :  { %v3798_v58 = vpop.xlane.xlu1 %2301 }
 0xaf1   :  { %v3800_v23 = vadd.f32 %v3167_v59, %v2290_v63  ;;  %v3802_v24 = vadd.f32 %v3168_v36, %v2119_v51  ;;  %v2306_v16 = vmul.f32 0.35355338, %v3798_v58  ;;  %v2007_v14 = vrot.slane %v3853_v22, 1 }
 0xaf3   :  { %v2308_v25 = vsel %vm158_vm1, %v3800_v23, -inf  ;;  %v2141_v26 = vsel %vm158_vm1, %v3802_v24, -inf }
 0xaf4   :  { %2309 = vmax.xlane.f32.xlu2 %v2308_v25  ;;  %2142 = vmax.xlane.f32.xlu0 %v2141_v26 }
 0xaf6   :  { %v2287_v28 = vpop.f32.mrf.mxu3 }
 0xaf7   :  { %v2291_v31 = vmul.f32 0.35355338, %v2287_v28  ;;  %v3864_v28 = vperm.slane %v3853_v22, 0 }
 0xaf8   :  { %v1978_v32 = vpop.xlane.xlu1 %1977 }
 0xaf9   :  { %v3811_v33 = vmax.f32 %v1978_v32, %v3808_v30  ;;  %v2427_v34 = vpop.f32.mrf.mxu2  ;;  %v3813_v35 = vadd.f32 %v3168_v36, %v2291_v31 }
 0xafa   :  { %v2458_v37 = vmul.f32 0.35355338, %v2427_v34 }
 0xafb   :  { %v1984_v38 = vsub.f32 %v1958_v60, %v3811_v33  ;;  %v1990_v40 = vsub.f32 %v3808_v30, %v3811_v33  ;;  %v2311_v41 = vsel %vm158_vm1, %v3813_v35, -inf }
 0xafc   :  { %2312 = vmax.xlane.f32.xlu0 %v2311_v41  ;;  %v3820_v42 = vadd.f32 %v3167_v59, %v2458_v37 }
 0xafd   :  { %v1986_v43 = vmul.f32 1.442695, %v1984_v38 }
 0xafe   :  { %v2476_v46 = vsel %vm158_vm1, %v3820_v42, -inf }
 0xaff   :  { %3109 = vpow2.f32 %v1986_v43  ;;  %2477 = vmax.xlane.f32.xlu2 %v2476_v46  ;;  %v2135_v21 = vpop.xlane.xlu2 %2134 }
 0xb00   :  { %v1981_v48 = vpop.xlane.xlu1 %1980  ;;  %v3850_v17 = vmul.f32 0.35355338, %v2135_v21 }
 0xb01   :  { %v3827_v49 = vmax.f32 %v1981_v48, %v3824_v47  ;;  %v2455_v39 = vpop.f32.mrf.mxu3 }
 0xb02   :  { %v2459_v50 = vmul.f32 0.35355338, %v2455_v39 }
 0xb03   :  { %v1985_v53 = vsub.f32 %v1959_v62, %v3827_v49  ;;  %v1991_v52 = vsub.f32 %v3824_v47, %v3827_v49 }
 0xb04   :  { %v3832_v54 = vadd.f32 %v3168_v36, %v2459_v50 }
 0xb05   :  { %v3834_v55 = vpop.eup %3109  ;;  %v1988_v56 = vmul.f32 1.442695, %v1985_v53 }
 0xb06   :  { %2947 = vmatmul.msk.f32.vlgmr.msrb.gmra.mxu0 %vm158_vm1, %v3834_v55  ;;  %v2479_v57 = vsel %vm158_vm1, %v3832_v54, -inf }
 0xb07   :  { %3111 = vpow2.f32 %v1988_v56  ;;  %2480 = vmax.xlane.f32.xlu1 %v2479_v57  ;;  %v2470_v3 = vpop.xlane.xlu2 %2469 }
 0xb08   :  { %v2474_v41 = vmul.f32 0.35355338, %v2470_v3 }
 0xb0d   :  { %v3840_v59 = vpop.eup %3111 }
 0xb0e   :  { %2948 = vmatmul.msk.f32.vlgmr.msra.gmra.mxu1 %vm158_vm1, %v3840_v59 }
 0xb0f   :  { %v2473_v9 = vpop.xlane.xlu2 %2472 }
 0xb10   :  { %2538 = vrot.lane.b32.xlu0 %v3732_v45, %s3228_s26 }
 0xb11   :  { %v2305_v8 = vpop.xlane.xlu0 %2304 }
 0xb12   :  { %v3870_v37 = vmul.f32 0.35355338, %v2305_v8 }
 0xb17   :  { %2508 = vrot.lane.b32.xlu2 %v3701_v7, %s3228_s26 }
 0xb18   :  { %v3019_v60 = vpop.permute.xlu1 %3018 }
 0xb19   :  { %v3021_v61 = vunpack.i.h.bf16 %v3019_v60  ;;  %v3020_v0 = vunpack.i.l.bf16 %v3019_v60 }
 0xb1b   :  { %2196 = vmatpush.msra.mxu0 %v3020_v0  ;;  %2227 = vmatpush.msrb.mxu1 %v3021_v61 }
 0xb24   :  { %v3024_v2 = vpop.permute.xlu0 %3023 }
 0xb25   :  { %v3026_v36 = vunpack.i.h.bf16 %v3024_v2  ;;  %v3025_v62 = vunpack.i.l.bf16 %v3024_v2 }
 0xb27   :  { %2365 = vmatpush.msrb.mxu0 %v3025_v62  ;;  %2395 = vmatpush.msra.mxu1 %v3026_v36 }
 0xb5f   :  { %v2140_v45 = vpop.xlane.xlu0 %2139 }
 0xb60   :  { %v2144_v6 = vmax.f32 %v2140_v45, %v2136_v5 }
 0xb62   :  { %v2146_v7 = vsub.f32 %v3794_v18, %v2144_v6  ;;  %v2152_v10 = vsub.f32 %v2136_v5, %v2144_v6 }
 0xb64   :  { %v2148_v11 = vmul.f32 1.442695, %v2146_v7  ;;  %v2154_v13 = vmul.f32 1.442695, %v2152_v10 }
 0xb66   :  { %3113 = vpow2.f32 %v2148_v11 }
 0xb67   :  { %3115 = vpow2.f32 %v2154_v13  ;;  %v2143_v19 = vpop.xlane.xlu0 %2142  ;;  %v2310_v12 = vpop.xlane.xlu2 %2309 }
 0xb68   :  { %v3856_v51 = vmax.f32 %v2143_v19, %v3850_v17  ;;  %v2314_v63 = vmax.f32 %v2310_v12, %v2306_v16  ;;  %v3897_v19 = vperm.slane %v2007_v14, 0 }
 0xb6a   :  { %v2147_v18 = vsub.f32 %v3802_v24, %v3856_v51  ;;  %v2153_v25 = vsub.f32 %v3850_v17, %v3856_v51  ;;  %v2316_v58 = vsub.f32 %v3800_v23, %v2314_v63  ;;  %v2322_v36 = vsub.f32 %v2306_v16, %v2314_v63 }
 0xb6c   :  { %v3114_v26 = vpop.eup %3113  ;;  %v2150_v31 = vmul.f32 1.442695, %v2147_v18  ;;  %v2318_v32 = vmul.f32 1.442695, %v2316_v58  ;;  %v2324_v3 = vmul.f32 1.442695, %v2322_v36 }
 0xb6d   :  { %v3866_v44 = vpop.eup %3115  ;;  %2953 = vmatmul.msk.f32.vlgmr.msra.gmra.mxu0 %vm158_vm1, %v3114_v26  ;;  %v2158_v34 = vsel %vm158_vm1, %v3114_v26, 0.0  ;;  %v2156_v26 = vmul.f32 1.442695, %v2153_v25 }
 0xb6e   :  { %3117 = vpow2.f32 %v2150_v31  ;;  %2159 = vadd.xlane.f32.xlu0 %v2158_v34  ;;  %v2168_v24 = vmul.f32 %v3866_v44, %v3864_v28 }
 0xb6f   :  { %v2313_v23 = vpop.xlane.xlu0 %2312  ;;  %3119 = vpow2.f32 %v2318_v32 }
 0xb70   :  { %v3875_v38 = vmax.f32 %v2313_v23, %v3870_v37  ;;  %2175 = vrot.lane.b32.xlu1 %v2168_v24, %s3227_s25  ;;  %v1996_v23 = vsel %vm158_vm1, %v3834_v55, 0.0 }
 0xb72   :  { %v2317_v27 = vsub.f32 %v3813_v35, %v3875_v38  ;;  %v2323_v43 = vsub.f32 %v3870_v37, %v3875_v38  ;;  %v2478_v46 = vpop.xlane.xlu2 %2477  ;;  %v2475_v35 = vmul.f32 0.35355338, %v2473_v9 }
 0xb73   :  { %v2482_v48 = vmax.f32 %v2478_v46, %v2474_v41 }
 0xb74   :  { %v3118_v39 = vpop.eup %3117  ;;  %v2320_v50 = vmul.f32 1.442695, %v2317_v27  ;;  %v2326_v31 = vmul.f32 1.442695, %v2323_v43 }
 0xb75   :  { %v2484_v53 = vsub.f32 %v3820_v42, %v2482_v48  ;;  %2954 = vmatmul.msk.f32.vlgmr.msrb.gmra.mxu1 %vm158_vm1, %v3118_v39  ;;  %v3120_v56 = vpop.eup %3119  ;;  %v2490_v7 = vsub.f32 %v2474_v41, %v2482_v48  ;;  %v2161_v18 = vsel %vm158_vm1, %v3118_v39, 0.0  ;;  %v1999_v39 = vsel %vm158_vm1, %v3840_v59, 0.0 }
 0xb76   :  { %3121 = vpow2.f32 %v2320_v50  ;;  %2959 = vmatmul.msk.f32.vlgmr.msrb.gmra.mxu0 %vm158_vm1, %v3120_v56  ;;  %v2328_v60 = vsel %vm158_vm1, %v3120_v56, 0.0 }
 0xb77   :  { %v2486_v57 = vmul.f32 1.442695, %v2484_v53  ;;  %2329 = vadd.xlane.f32.xlu2 %v2328_v60  ;;  %v2492_v11 = vmul.f32 1.442695, %v2490_v7 }
 0xb79   :  { %3123 = vpow2.f32 %v2486_v57 }
 0xb7a   :  { %v2481_v61 = vpop.xlane.xlu1 %2480  ;;  %v2509_v0 = vpop.permute.xlu2 %2508 }
 0xb7b   :  { %v2483_v8 = vmax.f32 %v2481_v61, %v2475_v35  ;;  %2533 = vmatpush.msra.mxu0 %v2509_v0 }
 0xb7c   :  { %v3122_v2 = vpop.eup %3121 }
 0xb7d   :  { %v2485_v42 = vsub.f32 %v3832_v54, %v2483_v8  ;;  %2960 = vmatmul.msk.f32.vlgmr.msra.gmra.mxu1 %vm158_vm1, %v3122_v2  ;;  %v2331_v62 = vsel %vm158_vm1, %v3122_v2, 0.0  ;;  %v2491_v9 = vsub.f32 %v2475_v35, %v2483_v8 }
 0xb7e   :  { %2332 = vadd.xlane.f32.xlu0 %v2331_v62 }
 0xb7f   :  { %v3124_v4 = vpop.eup %3123  ;;  %v2488_v21 = vmul.f32 1.442695, %v2485_v42  ;;  %v2494_v6 = vmul.f32 1.442695, %v2491_v9 }
 0xb80   :  { %2965 = vmatmul.msk.f32.vlgmr.msra.gmra.mxu0 %vm158_vm1, %v3124_v4  ;;  %v2496_v22 = vsel %vm158_vm1, %v3124_v4, 0.0 }
 0xb81   :  { %3125 = vpow2.f32 %v2488_v21 }
 0xb82   :  { %v2539_v5 = vpop.permute.xlu0 %2538  ;;  %3127 = vpow2.f32 %v2324_v3 }
 0xb83   :  { %2563 = vmatpush.msrb.mxu1 %v2539_v5  ;;  %3129 = vpow2.f32 %v2494_v6  ;;  %v3915_v17 = vpop.f32.mrf.mxu0 }
 0xb84   :  { %3131 = vpow2.f32 %v2492_v11 }
 0xb85   :  { %3133 = vpow2.f32 %v2156_v26 }
 0xb86   :  { %3135 = vpow2.f32 %v2326_v31  ;;  %v1776_v31 = vld [vmem:[#allocation2 + $0x178] sm:$0xff] }
 0xb87   :  { %v3126_v45 = vpop.eup %3125  ;;  %2619 = vmatpush.msra.mxu2 %v1776_v31 }
 0xb88   :  { %2966 = vmatmul.msk.f32.vlgmr.msrb.gmra.mxu1 %vm158_vm1, %v3126_v45  ;;  %v2499_v54 = vsel %vm158_vm1, %v3126_v45, 0.0  ;;  %v3128_v10 = vpop.eup %3127 }
 0xb89   :  { %2500 = vadd.xlane.f32.xlu0 %v2499_v54  ;;  %v2338_v13 = vmul.f32 %v3128_v10, %v3864_v28  ;;  %v3895_v16 = vpop.eup %3129 }
 0xb8a   :  { %v2507_v12 = vmul.f32 %v3895_v16, %v3897_v19  ;;  %v3132_v63 = vpop.eup %3131 }
 0xb8b   :  { %v2506_v58 = vmul.f32 %v3132_v63, %v3864_v28  ;;  %v3134_v32 = vpop.eup %3133  ;;  %v3922_v61 = vpop.f32.mrf.mxu1 }
 0xb8c   :  { %v2169_v34 = vmul.f32 %v3134_v32, %v3897_v19  ;;  %v3136_v37 = vpop.eup %3135 }
 0xb8d   :  { %v2339_v24 = vmul.f32 %v3136_v37, %v3897_v19 }
 0xb8f   :  { %2344 = vrot.lane.b32.xlu2 %v2338_v13, %s3226_s24 }
 0xb97   :  { %2542 = vrot.lane.b32.xlu2 %v2507_v12, %s3228_s26 }
 0xb9a   :  { %2162 = vadd.xlane.f32.xlu1 %v2161_v18 }
 0xb9d   :  { %2512 = vrot.lane.b32.xlu0 %v2506_v58, %s3228_s26 }
 0xba2   :  { %2497 = vadd.xlane.f32.xlu1 %v2496_v22 }
 0xbbb   :  { %2206 = vrot.lane.b32.xlu1 %v2169_v34, %s3227_s25  ;;  %v1774_v34 = vld [vmem:[#allocation2 + $0x168] sm:$0xff] }
 0xbc3   :  { %2374 = vrot.lane.b32.xlu1 %v2339_v24, %s3226_s24 }
 0xbc7   :  { %1997 = vadd.xlane.f32.xlu0 %v1996_v23 }
 0xbe1   :  { %v2160_v38 = vpop.xlane.xlu0 %2159 }
 0xbe2   :  { %v2164_v51 = vadd.f32 %v3866_v44, %v2160_v38  ;;  %v2176_v25 = vpop.permute.xlu1 %2175 }
 0xbe4   :  { %3137 = vrcp.f32 %v2164_v51 }
 0xbea   :  { %v2198_v41 = vpop.f32.mrf.mxu0  ;;  %v2330_v27 = vpop.xlane.xlu2 %2329 }
 0xbeb   :  { %v2199_v43 = vadd.f32 %v2198_v41, %v2176_v25  ;;  %v3138_v46 = vpop.eup %3137  ;;  %v2334_v48 = vadd.f32 %v3128_v10, %v2330_v27  ;;  %v1994_v41 = vmul.f32 1.442695, %v1991_v52 }
 0xbed   :  { %2000 = vadd.xlane.f32.xlu1 %v1999_v39  ;;  %v2232_v50 = vmul.f32 %v3138_v46, %v2199_v43  ;;  %3139 = vrcp.f32 %v2334_v48 }
 0xbef   :  { %2572 = vrot.lane.b32.xlu2 %v2232_v50, %s3225_s19 }
 0xbf1   :  { %v2333_v35 = vpop.xlane.xlu0 %2332 }
 0xbf2   :  { %v2345_v55 = vpop.permute.xlu2 %2344  ;;  %v2229_v36 = vpop.f32.mrf.mxu1  ;;  %v2335_v9 = vadd.f32 %v3136_v37, %v2333_v35  ;;  %v1773_v37 = vld [vmem:[#allocation2 + $0x160] sm:$0xff] }
 0xbf3   :  { %v2367_v53 = vpop.f32.mrf.mxu0  ;;  %v3140_v57 = vpop.eup %3139 }
 0xbf4   :  { %v2368_v56 = vadd.f32 %v2367_v53, %v2345_v55 }
 0xbf6   :  { %v2400_v44 = vmul.f32 %v3140_v57, %v2368_v56 }
 0xbf8   :  { %2580 = vrot.lane.b32.xlu2 %v2400_v44, %s3229_s11 }
 0xbfa   :  { %v2397_v7 = vpop.f32.mrf.mxu1  ;;  %v2543_v18 = vpop.permute.xlu2 %2542 }
 0xbfc   :  { %v2501_v59 = vpop.xlane.xlu0 %2500 }
 0xbfd   :  { %v2535_v45 = vpop.f32.mrf.mxu0  ;;  %v2503_v13 = vadd.f32 %v3895_v16, %v2501_v59  ;;  %v1992_v16 = vmul.f32 1.442695, %v1990_v40 }
 0xc0d   :  { %v2163_v60 = vpop.xlane.xlu1 %2162 }
 0xc0e   :  { %v2165_v0 = vadd.f32 %v3134_v32, %v2163_v60  ;;  %v1775_v32 = vld [vmem:[#allocation2 + $0x170] sm:$0xff] }
 0xc0f   :  { %v2513_v3 = vpop.permute.xlu0 %2512  ;;  %2620 = vmatpush.msra.mxu2 %v1775_v32  ;;  %v2978_v32 = vld [vmem:[%s4050_s7 + $0x68] sm:$0xff] }
 0xc10   :  { %3141 = vrcp.f32 %v2165_v0  ;;  %v2536_v54 = vadd.f32 %v2535_v45, %v2513_v3  ;;  %v2600_v0 = vperm.slane %v3743_v29, 3 }
 0xc11   :  { %2621 = vmatpush.msra.mxu2 %v1774_v34 }
 0xc13   :  { %2622 = vmatpush.msra.mxu2 %v1773_v37 }
 0xc15   :  { %v2498_v8 = vpop.xlane.xlu1 %2497 }
 0xc16   :  { %v2502_v2 = vadd.f32 %v3132_v63, %v2498_v8  ;;  %v3142_v4 = vpop.eup %3141  ;;  %v2565_v63 = vpop.f32.mrf.mxu1 }
 0xc17   :  { %v2566_v58 = vadd.f32 %v2565_v63, %v2543_v18 }
 0xc18   :  { %3143 = vrcp.f32 %v2502_v2 }
 0xc19   :  { %3145 = vrcp.f32 %v2335_v9 }
 0xc1a   :  { %3147 = vrcp.f32 %v2503_v13  ;;  %v2969_v13 = vld [vmem:[%s4049_s6 + $0x20] sm:$0xff] }
 0xc1b   :  { %3149 = vpow2.f32 %v1992_v16 }
 0xc1e   :  { %v3144_v5 = vpop.eup %3143 }
 0xc1f   :  { %v2568_v6 = vmul.f32 %v3144_v5, %v2536_v54  ;;  %v3146_v14 = vpop.eup %3145 }
 0xc20   :  { %v3148_v22 = vpop.eup %3147 }
 0xc21   :  { %v2569_v26 = vmul.f32 %v3148_v22, %v2566_v58  ;;  %v3150_v38 = vpop.eup %3149  ;;  %v2980_v22 = vld [vmem:[%s4050_s7 + $0x78] sm:$0xff] }
 0xc22   :  { %v2012_v43 = vmul.f32 %v3150_v38, %v3864_v28  ;;  %2743 = vmatpush.msrb.mxu0 %v2980_v22 }
 0xc24   :  { %v2035_v48 = vadd.f32 %v3915_v17, %v2012_v43 }
 0xc2d   :  { %v2207_v42 = vpop.permute.xlu1 %2206 }
 0xc2e   :  { %v2230_v62 = vadd.f32 %v2229_v36, %v2207_v42 }
 0xc30   :  { %v2233_v21 = vmul.f32 %v3142_v4, %v2230_v62 }
 0xc32   :  { %2574 = vrot.lane.b32.xlu2 %v2233_v21, %s3225_s19 }
 0xc35   :  { %v2375_v10 = vpop.permute.xlu1 %2374 }
 0xc36   :  { %v2398_v11 = vadd.f32 %v2397_v7, %v2375_v10  ;;  %v2971_v10 = vld [vmem:[%s4049_s6 + $0x30] sm:$0xff] }
 0xc38   :  { %v2401_v12 = vmul.f32 %v3146_v14, %v2398_v11  ;;  %v2970_v11 = vld [vmem:[%s4049_s6 + $0x28] sm:$0xff] }
 0xc3a   :  { %2588 = vrot.lane.b32.xlu2 %v2568_v6, %s3230_s12  ;;  %v1998_v23 = vpop.xlane.xlu0 %1997 }
 0xc3b   :  { %v2002_v51 = vadd.f32 %v3150_v38, %v1998_v23 }
 0xc3d   :  { %3151 = vrcp.f32 %v2002_v51  ;;  %v2976_v51 = vld [vmem:[%s4050_s7 + $0x58] sm:$0xff] }
 0xc3e   :  { %3153 = vpow2.f32 %v1994_v41  ;;  %v3988_v41 = vld [vmem:[%s4051_s8 + $0x10] sm:$0xff] }
 0xc42   :  { %2582 = vrot.lane.b32.xlu2 %v2401_v12, %s3229_s11 }
 0xc43   :  { %v3152_v46 = vpop.eup %3151 }
 0xc44   :  { %v2060_v30 = vmul.f32 %v3152_v46, %v2035_v48  ;;  %v3154_v40 = vpop.eup %3153  ;;  %v2679_v48 = vperm.slane %v3988_v41, 5 }
 0xc45   :  { %v2013_v49 = vmul.f32 %v3154_v40, %v3897_v19 }
 0xc47   :  { %v2058_v28 = vadd.f32 %v3922_v61, %v2013_v49 }
 0xc49   :  { %v2573_v24 = vpop.permute.xlu2 %2572 }
 0xc4a   :  { %2590 = vrot.lane.b32.xlu2 %v2569_v26, %s3230_s12  ;;  %v2594_v39 = vsel %vm158_vm1, %v2060_v30, %v2573_v24  ;;  %v2979_v26 = vld [vmem:[%s4050_s7 + $0x70] sm:$0xff]  ;;  %v2977_v24 = vld [vmem:[%s4050_s7 + $0x60] sm:$0xff] }
 0xc4b   :  { %2744 = vmatpush.msrb.mxu0 %v2979_v26 }
 0xc4d   :  { %2745 = vmatpush.msrb.mxu0 %v2978_v32 }
 0xc4f   :  { %2746 = vmatpush.msrb.mxu0 %v2977_v24 }
 0xc51   :  { %2747 = vmatpush.msrb.mxu0 %v2976_v51 }
 0xc52   :  { %v2581_v25 = vpop.permute.xlu2 %2580 }
 0xc53   :  { %v2596_v50 = vsel %vm719_vm2, %v2594_v39, %v2581_v25 }
 0xc60   :  { %v2001_v33 = vpop.xlane.xlu1 %2000 }
 0xc61   :  { %v2003_v55 = vadd.f32 %v3154_v40, %v2001_v33 }
 0xc63   :  { %3155 = vrcp.f32 %v2003_v55 }
 0xc69   :  { %v3156_v52 = vpop.eup %3155 }
 0xc6a   :  { %v2061_v17 = vmul.f32 %v3156_v52, %v2058_v28 }
 0xc8c   :  { %v2575_v27 = vpop.permute.xlu2 %2574 }
 0xc8d   :  { %v2595_v57 = vsel %vm158_vm1, %v2061_v17, %v2575_v27  ;;  %v2676_v27 = vperm.slane %v3988_v41, 4  ;;  %v2975_v17 = vld [vmem:[%s4050_s7 + $0x50] sm:$0xff] }
 0xc8e   :  { %2748 = vmatpush.msrb.mxu0 %v2975_v17 }
 0xc94   :  { %v2589_v53 = vpop.permute.xlu2 %2588 }
 0xc95   :  { %v2598_v56 = vsel %vm722_vm3, %v2596_v50, %v2589_v53 }
 0xc96   :  { %2967 = vmatmul.msk.f32.vlgmr.msra.gmra.mxu2 %vm80_vm0, %v2598_v56 }
 0xc9c   :  { %v2583_v47 = vpop.permute.xlu2 %2582 }
 0xc9d   :  { %v2597_v44 = vsel %vm719_vm2, %v2595_v57, %v2583_v47  ;;  %v2974_v57 = vld [vmem:[%s4050_s7 + $0x48] sm:$0xff] }
 0xc9e   :  { %2749 = vmatpush.msrb.mxu0 %v2974_v57 }
 0xca4   :  { %v2591_v60 = vpop.permute.xlu2 %2590 }
 0xca5   :  { %v2599_v35 = vsel %vm722_vm3, %v2597_v44, %v2591_v60  ;;  %v2973_v44 = vld [vmem:[%s4050_s7 + $0x40] sm:$0xff]  ;;  %v4006_v60 = vld [vmem:[%s4051_s8 + $0x18] sm:$0x1f] }
 0xca6   :  { %2968 = vmatmul.msk.f32.gmra.mxu2 %vm80_vm0, %v2599_v35  ;;  %2750 = vmatpush.msrb.mxu0 %v2973_v44  ;;  %v2696_v35 = vperm.slane %v4006_v60, 3 }
 0xd19   :  { %v2624_v8 = vpop.f32.mrf.mxu2 }
 0xd1a   :  { %v2625_v59 = vadd.f32 %v2624_v8, %v2600_v0 }
 0xd1c   :  { %v2630_v2 = vadd.f32 %v2625_v59, %v3719_v15 }
 0xd1e   :  { %v2632_v19 = vsel %vm80_vm0, %v2630_v2, 0.0 }
 0xd1f   :  { %2633 = vadd.xlane.f32.xlu0 %v2632_v19 }
 0xd29   :  { %v2627_v61 = vpop.f32.mrf.mxu2 }
 0xd2a   :  { %v2628_v36 = vadd.f32 %v2627_v61, %v2600_v0 }
 0xd2c   :  { %v2631_v42 = vadd.f32 %v2628_v36, %v3724_v20  ;;  %v2972_v20 = vld [vmem:[%s4049_s6 + $0x38] sm:$0xff]  ;;  %v2728_v36 = vperm.slane %v3743_v29, 5 }
 0xd2d   :  { %2715 = vmatpush.msrb.mxu3 %v2972_v20 }
 0xd2e   :  { %v2635_v62 = vsel %vm80_vm0, %v2631_v42, 0.0 }
 0xd2f   :  { %2636 = vadd.xlane.f32.xlu1 %v2635_v62  ;;  %2716 = vmatpush.msrb.mxu3 %v2971_v10 }
 0xd31   :  { %2717 = vmatpush.msrb.mxu3 %v2970_v11 }
 0xd33   :  { %2718 = vmatpush.msrb.mxu3 %v2969_v13 }
 0xd92   :  { %v2634_v4 = vpop.xlane.xlu0 %2633 }
 0xd93   :  { %v2638_v21 = vmul.f32 %v2634_v4, %v3419_v1 }
 0xd95   :  { %v2640_v3 = vsub.f32 %v2630_v2, %v2638_v21 }
 0xd97   :  { %v2642_v5 = vmul.f32 %v2640_v3, %v2640_v3 }
 0xd99   :  { %v2644_v9 = vsel %vm80_vm0, %v2642_v5, 0.0 }
 0xd9a   :  { %2645 = vadd.xlane.f32.xlu2 %v2644_v9 }
 0xda2   :  { %v2637_v45 = vpop.xlane.xlu1 %2636 }
 0xda3   :  { %v2639_v15 = vmul.f32 %v2637_v45, %v3419_v1 }
 0xda5   :  { %v2641_v54 = vsub.f32 %v2631_v42, %v2639_v15 }
 0xda7   :  { %v2643_v6 = vmul.f32 %v2641_v54, %v2641_v54 }
 0xda9   :  { %v2647_v7 = vsel %vm80_vm0, %v2643_v6, 0.0 }
 0xdaa   :  { %2648 = vadd.xlane.f32.xlu0 %v2647_v7 }
 0xe0d   :  { %v2646_v14 = vpop.xlane.xlu2 %2645 }
 0xe0e   :  { %v2650_v12 = vmul.f32 %v2646_v14, %v3419_v1 }
 0xe10   :  { %v2652_v63 = vadd.f32 1e-05, %v2650_v12  ;;  %v2813_v12 = vld [vmem:[%s4052_s9 + $0x18] sm:$0xff] }
 0xe11   :  { %2833 = vmatpush.msra.mxu1 %v2813_v12 }
 0xe12   :  { %3157 = vrsqrt.f32 %v2652_v63  ;;  %vm2660_vm2 = vweird.f32 %v2652_v63 }
 0xe18   :  { %v3158_v18 = vpop.eup %3157 }
 0xe19   :  { %v2655_v58 = vmul.f32 %v3158_v18, %v2652_v63  ;;  %vm2661_vm1 = vweird.f32 %v3158_v18  ;;  %v2812_v63 = vld [vmem:[%s4052_s9 + $0x10] sm:$0xff] }
 0xe1a   :  { %vm2662_vm3 = vmor %vm2660_vm2, %vm2661_vm1  ;;  %2834 = vmatpush.msra.mxu1 %v2812_v63 }
 0xe1b   :  { %v2656_v31 = vmul.f32 %v3158_v18, %v2655_v58  ;;  %v2810_v58 = vld [vmem:[%s4052_s9] sm:$0xff] }
 0xe1d   :  { %v2657_v34 = vmul.f32 0.5, %v2656_v31  ;;  %v2649_v37 = vpop.xlane.xlu0 %2648 }
 0xe1e   :  { %v2651_v16 = vmul.f32 %v2649_v37, %v3419_v1 }
 0xe1f   :  { %v2658_v23 = vsub.f32 1.5, %v2657_v34 }
 0xe20   :  { %v2653_v38 = vadd.f32 1e-05, %v2651_v16 }
 0xe21   :  { %v2659_v25 = vmul.f32 %v3158_v18, %v2658_v23 }
 0xe22   :  { %3159 = vrsqrt.f32 %v2653_v38  ;;  %vm2670_vm15 = vweird.f32 %v2653_v38 }
 0xe23   :  { %v2663_v43 = vsel %vm2662_vm3, %v3158_v18, %v2659_v25  ;;  %v2811_v18 = vld [vmem:[%s4052_s9 + $0x8] sm:$0xff]  ;;  %s3233_s9 = smov [#allocation5]  }
 0xe24   :  { %v2674_v46 = vmul.f32 %v2663_v43, %v2640_v3  ;;  %2835 = vmatpush.msra.mxu1 %v2811_v18  ;;  %s2850_s13 = sshll.u32 %s3233_s9, 4  ;;  %s2851_s13 = int_to_ptr.vmem [resolvable:$true] %s2850_s13 }
 0xe26   :  { %v2677_v30 = vmul.f32 %v2676_v27, %v2674_v46  ;;  %2836 = vmatpush.msra.mxu1 %v2810_v58 }
 0xe28   :  { %v3160_v33 = vpop.eup %3159  ;;  %v2680_v40 = vadd.f32 %v2679_v48, %v2677_v30 }
 0xe29   :  { %v2665_v39 = vmul.f32 %v3160_v33, %v2653_v38  ;;  %vm2671_vm14 = vweird.f32 %v3160_v33 }
 0xe2a   :  { %2981 = vmatmul.msk.f32.vlgmr.msrb.gmra.mxu3 %vm80_vm0, %v2680_v40  ;;  %vm2672_vm4 = vmor %vm2670_vm15, %vm2671_vm14 }
 0xe2b   :  { %v2666_v50 = vmul.f32 %v3160_v33, %v2665_v39 }
 0xe2d   :  { %v2667_v55 = vmul.f32 0.5, %v2666_v50 }
 0xe2f   :  { %v2668_v53 = vsub.f32 1.5, %v2667_v55 }
 0xe31   :  { %v2669_v56 = vmul.f32 %v3160_v33, %v2668_v53 }
 0xe33   :  { %v2673_v47 = vsel %vm2672_vm4, %v3160_v33, %v2669_v56 }
 0xe34   :  { %v2675_v49 = vmul.f32 %v2673_v47, %v2641_v54 }
 0xe36   :  { %v2678_v52 = vmul.f32 %v2676_v27, %v2675_v49  ;;  %v2804_v27 = vperm.slane %v3988_v41, 6 }
 0xe38   :  { %v2681_v28 = vadd.f32 %v2679_v48, %v2678_v52  ;;  %v2807_v48 = vperm.slane %v3988_v41, 7  ;;  %v2814_v41 = vperm.slane %v4006_v60, 4 }
 0xe3a   :  { %2982 = vmatmul.msk.f32.gmra.mxu3 %vm80_vm0, %v2681_v28 }
 0xead   :  { %v2720_v0 = vpop.f32.mrf.mxu3 }
 0xeae   :  { %v2721_v8 = vadd.f32 %v2720_v0, %v2696_v35 }
 0xeb0   :  { %v2726_v59 = vmax.f32 %v2721_v8, 0.0 }
 0xeb2   :  { %2983 = vmatmul.msk.f32.vlgmr.msrb.gmra.mxu0 %vm859_vm11, %v2726_v59 }
 0xebd   :  { %v2723_v2 = vpop.f32.mrf.mxu3 }
 0xebe   :  { %v2724_v19 = vadd.f32 %v2723_v2, %v2696_v35 }
 0xec0   :  { %v2727_v61 = vmax.f32 %v2724_v19, 0.0 }
 0xec2   :  { %2984 = vmatmul.msk.f32.gmra.mxu0 %vm859_vm11, %v2727_v61 }
 0xf2f   :  { %v2752_v42 = vpop.f32.mrf.mxu0 }
 0xf30   :  { %v2753_v62 = vadd.f32 %v2752_v42, %v2728_v36 }
 0xf32   :  { %v2758_v4 = vadd.f32 %v2753_v62, %v2680_v40 }
 0xf34   :  { %v2760_v21 = vsel %vm80_vm0, %v2758_v4, 0.0 }
 0xf35   :  { %2761 = vadd.xlane.f32.xlu1 %v2760_v21 }
 0xf3f   :  { %v2755_v3 = vpop.f32.mrf.mxu0 }
 0xf40   :  { %v2756_v5 = vadd.f32 %v2755_v3, %v2728_v36 }
 0xf42   :  { %v2759_v9 = vadd.f32 %v2756_v5, %v2681_v28 }
 0xf44   :  { %v2763_v45 = vsel %vm80_vm0, %v2759_v9, 0.0 }
 0xf45   :  { %2764 = vadd.xlane.f32.xlu0 %v2763_v45 }
 0xfa8   :  { %v2762_v15 = vpop.xlane.xlu1 %2761 }
 0xfa9   :  { %v2766_v54 = vmul.f32 %v2762_v15, %v3419_v1 }
 0xfab   :  { %v2768_v6 = vsub.f32 %v2758_v4, %v2766_v54 }
 0xfad   :  { %v2770_v7 = vmul.f32 %v2768_v6, %v2768_v6 }
 0xfaf   :  { %v2772_v20 = vsel %vm80_vm0, %v2770_v7, 0.0 }
 0xfb0   :  { %2773 = vadd.xlane.f32.xlu1 %v2772_v20 }
 0xfb8   :  { %v2765_v29 = vpop.xlane.xlu0 %2764 }
 0xfb9   :  { %v2767_v10 = vmul.f32 %v2765_v29, %v3419_v1 }
 0xfbb   :  { %v2769_v11 = vsub.f32 %v2759_v9, %v2767_v10 }
 0xfbd   :  { %v2771_v13 = vmul.f32 %v2769_v11, %v2769_v11 }
 0xfbf   :  { %v2775_v14 = vsel %vm80_vm0, %v2771_v13, 0.0 }
 0xfc0   :  { %2776 = vadd.xlane.f32.xlu0 %v2775_v14 }
0x1023   :  { %v2774_v22 = vpop.xlane.xlu1 %2773 }
0x1024   :  { %v2778_v26 = vmul.f32 %v2774_v22, %v3419_v1 }
0x1026   :  { %v2780_v31 = vadd.f32 1e-05, %v2778_v26 }
0x1028   :  { %3161 = vrsqrt.f32 %v2780_v31  ;;  %vm2788_vm5 = vweird.f32 %v2780_v31 }
0x102e   :  { %v3162_v32 = vpop.eup %3161 }
0x102f   :  { %v2783_v34 = vmul.f32 %v3162_v32, %v2780_v31  ;;  %vm2789_vm11 = vweird.f32 %v3162_v32 }
0x1030   :  { %vm2790_vm6 = vmor %vm2788_vm5, %vm2789_vm11 }
0x1031   :  { %v2784_v37 = vmul.f32 %v3162_v32, %v2783_v34 }
0x1033   :  { %v2785_v16 = vmul.f32 0.5, %v2784_v37  ;;  %v2777_v24 = vpop.xlane.xlu0 %2776 }
0x1034   :  { %v2779_v23 = vmul.f32 %v2777_v24, %v3419_v1 }
0x1035   :  { %v2786_v38 = vsub.f32 1.5, %v2785_v16 }
0x1036   :  { %v2781_v51 = vadd.f32 1e-05, %v2779_v23 }
0x1037   :  { %v2787_v25 = vmul.f32 %v3162_v32, %v2786_v38 }
0x1038   :  { %3163 = vrsqrt.f32 %v2781_v51  ;;  %vm2798_vm8 = vweird.f32 %v2781_v51 }
0x1039   :  { %v2791_v43 = vsel %vm2790_vm6, %v3162_v32, %v2787_v25 }
0x103a   :  { %v2802_v46 = vmul.f32 %v2791_v43, %v2768_v6 }
0x103c   :  { %v2805_v30 = vmul.f32 %v2804_v27, %v2802_v46 }
0x103e   :  { %v3164_v33 = vpop.eup %3163  ;;  %v2808_v40 = vadd.f32 %v2807_v48, %v2805_v30 }
0x103f   :  { %v2793_v39 = vmul.f32 %v3164_v33, %v2781_v51  ;;  %vm2799_vm7 = vweird.f32 %v3164_v33 }
0x1040   :  { %2985 = vmatmul.msk.f32.vlgmr.msra.gmra.mxu1 %vm80_vm0, %v2808_v40  ;;  %vm2800_vm9 = vmor %vm2798_vm8, %vm2799_vm7 }
0x1041   :  { %v2794_v1 = vmul.f32 %v3164_v33, %v2793_v39 }
0x1043   :  { %v2795_v50 = vmul.f32 0.5, %v2794_v1 }
0x1045   :  { %v2796_v55 = vsub.f32 1.5, %v2795_v50 }
0x1047   :  { %v2797_v53 = vmul.f32 %v3164_v33, %v2796_v55 }
0x1049   :  { %v2801_v56 = vsel %vm2800_vm9, %v3164_v33, %v2797_v53 }
0x104a   :  { %v2803_v47 = vmul.f32 %v2801_v56, %v2769_v11 }
0x104c   :  { %v2806_v49 = vmul.f32 %v2804_v27, %v2803_v47 }
0x104e   :  { %v2809_v52 = vadd.f32 %v2807_v48, %v2806_v49 }
0x1050   :  { %2986 = vmatmul.msk.f32.gmra.mxu1 %vm80_vm0, %v2809_v52 }
0x10bd   :  { %v2838_v28 = vpop.f32.mrf.mxu1 }
0x10be   :  { %v2839_v17 = vadd.f32 %v2838_v28, %v2814_v41 }
0x10c0   :  { %2844 = vst [vmem:[#allocation5] sm:$0xff] %v2839_v17 }
0x10cd   :  { %v2841_v57 = vpop.f32.mrf.mxu1 }
0x10ce   :  { %v2842_v44 = vadd.f32 %v2841_v57, %v2814_v41 }
0x10d0   :  { %2845 = vst [vmem:[#allocation5 + $0x8] sm:$0xff] %v2842_v44 }
0x10d1   :  { %2858 = dma.vmem_to_hbm [thread:$0]  %s2851_s13, 256, %s2853_s16, [#allocation4], %s3224_s18, %s3224_s18, %s3225_s19  }
0x10d2   :  { %3221 = dma.done.wait [#allocation4], 256  }
0x10d3   :  { %3222 = vsyncadd [#allocation4], 4294967040 }
0x10d4   :  { %2863 = vsyncpa [#allocation3], 1 }
0x10d5   :  { %2864 = vsyncpa [#allocation4], 1 }

</bundles_post_ra>
